<compile_context>
chip_gen: v5e
topology: v5e:2x2
jax: 0.10.0
libtpu: 0.0.40
codegen_flags: <defaults>
</compile_context>

<pallas_src>
import functools

import jax
import jax.numpy as jnp
from jax.experimental import pallas as pl
from jax.experimental.pallas import tpu as pltpu

BN_EPS = 1e-5


def _repvgg_fused_kernel(x_ref, w_ref, b_ref, o_ref, *, stride, Ho, Wo, Cin):
    """One (batch, Cout-tile) grid cell.

    x_ref: (1, Hp, Wp, Cin)  bf16 padded input
    w_ref: (9*Cin, TC)       bf16 re-parameterized (BN-folded) 3x3 weight
    b_ref: (1, TC)           f32 merged bias
    o_ref: (1, Ho, Wo, TC)
    """
    if stride == 1:
        # Slice the Ref per tap (static offsets) -- no whole-image materialize.
        cols = [
            x_ref[0, pl.ds(kh, Ho), pl.ds(kw, Wo), :].reshape(Ho * Wo, Cin)
            for kh in range(3)
            for kw in range(3)
        ]
    else:
        # Strided taps (stride==2): load once, take strided slices per tap.
        x = x_ref[0]
        cols = []
        for kh in range(3):
            for kw in range(3):
                cols.append(
                    jax.lax.slice(
                        x,
                        (kh, kw, 0),
                        (kh + (Ho - 1) * stride + 1,
                         kw + (Wo - 1) * stride + 1,
                         Cin),
                        (stride, stride, 1),
                    ).reshape(Ho * Wo, Cin))
    # im2col: one large-K MXU matmul (K = 9*Cin), f32 accumulation.
    patch = jnp.concatenate(cols, axis=-1)                  # (Ho*Wo, 9*Cin) bf16
    acc = jnp.dot(patch, w_ref[...], preferred_element_type=jnp.float32)
    y = acc + b_ref[...]                                    # bias add in f32
    o_ref[0] = y.reshape(Ho, Wo, -1).astype(o_ref.dtype)


def _bn_affine(gamma, beta, mean, var):
    scale = gamma / jnp.sqrt(var + BN_EPS)
    bias = beta - mean * scale
    return scale, bias


def repvgg_block_forward(x_nchw, params, stride):
    """x_nchw: (N, Cin, H, W) float32. Returns (N, Cout, Ho, Wo)."""
    N, Cin, H, W = x_nchw.shape
    w3 = params["w3"]                          # (Cout, Cin, 3, 3) PyTorch layout
    Cout = w3.shape[0]
    has_branch = (stride == 1) and (Cin == Cout)

    # ---- RepVGG re-parameterization (exact for eval-mode BN) ----
    w3_hwio = jnp.transpose(w3, (2, 3, 1, 0)).astype(jnp.float32)  # (3,3,Cin,Cout)
    s1, b1 = _bn_affine(params["bn1_gamma"], params["bn1_beta"],
                        params["bn1_mean"], params["bn1_var"])
    w_fused = w3_hwio * s1                      # fold BN1 scale into weight
    bias = b1
    if has_branch:
        s2, b2 = _bn_affine(params["bn2_gamma"], params["bn2_beta"],
                            params["bn2_mean"], params["bn2_var"])
        w1 = jnp.transpose(params["w1"][:, :, 0, 0], (1, 0))       # (Cin, Cout)
        w_fused = w_fused.at[1, 1].add(w1 * s2)  # fold 1x1+BN2 into center tap
        bias = bias + b2
    w_flat = w_fused.reshape(9 * Cin, Cout).astype(jnp.bfloat16)
    bias = bias.reshape(1, Cout).astype(jnp.float32)

    # NCHW -> NHWC (channels on the 128-lane axis), zero-pad, cast to bf16.
    # TODO(synk): in a full network keep activations NHWC end-to-end so these
    # two transposes (an extra HBM round trip each) disappear.
    x = jnp.transpose(x_nchw, (0, 2, 3, 1)).astype(jnp.bfloat16)
    x_pad = jnp.pad(x, ((0, 0), (1, 1), (1, 1), (0, 0)))
    Hp, Wp = H + 2, W + 2
    Ho = (H + 2 - 3) // stride + 1
    Wo = (W + 2 - 3) // stride + 1

    # Lane-dense Cout tile: 256 on v6e/v7x-style MXU, 128 otherwise, else full.
    if Cout % 256 == 0:
        tc = 256
    elif Cout % 128 == 0:
        tc = 128
    else:
        tc = Cout
    n_ct = Cout // tc

    # TODO(synk): for very large spatial shapes on v7x (64 MiB VMEM) add an
    # H-tiling grid axis with halo (manual DMA) instead of whole-image blocks.
    est_vmem = (2 * (Hp * Wp * Cin * 2 + 9 * Cin * tc * 2 + tc * 4
                     + Ho * Wo * tc * 4)
                + Ho * Wo * 9 * Cin * 2 + 2 * Ho * Wo * tc * 4)
    vmem_limit = int(min(max(2 * est_vmem, 32 * 1024 * 1024),
                         64 * 1024 * 1024))

    kernel = functools.partial(_repvgg_fused_kernel,
                               stride=stride, Ho=Ho, Wo=Wo, Cin=Cin)

    y_nhwc = pl.pallas_call(
        kernel,
        out_shape=jax.ShapeDtypeStruct((N, Ho, Wo, Cout), x_nchw.dtype),
        grid_spec=pltpu.PrefetchScalarGridSpec(
            num_scalar_prefetch=0,
            grid=(N, n_ct),
            in_specs=[
                pl.BlockSpec((1, Hp, Wp, Cin), lambda n, c: (n, 0, 0, 0)),
                pl.BlockSpec((9 * Cin, tc), lambda n, c: (0, c)),
                pl.BlockSpec((1, tc), lambda n, c: (0, c)),
            ],
            out_specs=pl.BlockSpec((1, Ho, Wo, tc), lambda n, c: (n, 0, 0, c)),
        ),
        compiler_params=pltpu.CompilerParams(
            dimension_semantics=("parallel", "parallel"),
            vmem_limit_bytes=vmem_limit),
    )(x_pad, w_flat, bias)

    return jnp.transpose(y_nhwc, (0, 3, 1, 2))  # NHWC -> NCHW


def _reference_forward(x_nchw, params, stride):
    """Pure-JAX f32 reference (same eval-mode BN semantics)."""
    x = jnp.transpose(x_nchw, (0, 2, 3, 1))
    w3 = jnp.transpose(params["w3"], (2, 3, 1, 0))
    y = jax.lax.conv_general_dilated(
        x, w3, window_strides=(stride, stride), padding=((1, 1), (1, 1)),
        dimension_numbers=("NHWC", "HWIO", "NHWC"))
    s1, b1 = _bn_affine(params["bn1_gamma"], params["bn1_beta"],
                        params["bn1_mean"], params["bn1_var"])
    y = y * s1 + b1
    Cin = x.shape[-1]
    Cout = params["w3"].shape[0]
    if stride == 1 and Cin == Cout:
        w1 = jnp.transpose(params["w1"], (2, 3, 1, 0))
        y2 = jax.lax.conv_general_dilated(
            x, w1, window_strides=(1, 1), padding=((0, 0), (0, 0)),
            dimension_numbers=("NHWC", "HWIO", "NHWC"))
        s2, b2 = _bn_affine(params["bn2_gamma"], params["bn2_beta"],
                            params["bn2_mean"], params["bn2_var"])
        y = y + y2 * s2 + b2
    return jnp.transpose(y, (0, 3, 1, 2))


def make_params(key, in_channels, out_channels, stride):
    ks = jax.random.split(key, 10)
    p = {
        "w3": 0.1 * jax.random.normal(ks[0], (out_channels, in_channels, 3, 3),
                                      jnp.float32),
        "bn1_gamma": 1.0 + 0.1 * jax.random.normal(ks[1], (out_channels,),
                                                   jnp.float32),
        "bn1_beta": 0.1 * jax.random.normal(ks[2], (out_channels,), jnp.float32),
        "bn1_mean": 0.05 * jax.random.normal(ks[3], (out_channels,), jnp.float32),
        "bn1_var": 1.0 + 0.1 * jnp.abs(
            jax.random.normal(ks[4], (out_channels,), jnp.float32)),
    }
    if stride == 1 and in_channels == out_channels:
        p.update({
            "w1": 0.1 * jax.random.normal(ks[5], (out_channels, in_channels, 1, 1),
                                          jnp.float32),
            "bn2_gamma": 1.0 + 0.1 * jax.random.normal(ks[6], (out_channels,),
                                                       jnp.float32),
            "bn2_beta": 0.1 * jax.random.normal(ks[7], (out_channels,),
                                                jnp.float32),
            "bn2_mean": 0.05 * jax.random.normal(ks[8], (out_channels,),
                                                 jnp.float32),
            "bn2_var": 1.0 + 0.1 * jnp.abs(
                jax.random.normal(ks[9], (out_channels,), jnp.float32)),
        })
    return p


if __name__ == "__main__":
    key = jax.random.PRNGKey(0)
    k_x1, k_p1, k_x2, k_p2 = jax.random.split(key, 4)

    # Case 1: stride=1, Cin==Cout=4, 16x16 spatial (3x3 + folded 1x1 branch).
    N, C, H, W = 2, 4, 16, 16
    x1 = jax.random.normal(k_x1, (N, C, H, W), jnp.float32)
    p1 = make_params(k_p1, C, C, 1)
    out1 = jax.block_until_ready(repvgg_block_forward(x1, p1, 1))
    ref1 = _reference_forward(x1, p1, 1)
    assert out1.shape == ref1.shape, (out1.shape, ref1.shape)
    assert jnp.allclose(out1, ref1, rtol=5e-2, atol=5e-2), \
        float(jnp.max(jnp.abs(out1 - ref1)))

    # Case 2: stride=2, Cin=4 -> Cout=8 (no 1x1 branch).
    x2 = jax.random.normal(k_x2, (N, C, H, W), jnp.float32)
    p2 = make_params(k_p2, C, 8, 2)
    out2 = jax.block_until_ready(repvgg_block_forward(x2, p2, 2))
    ref2 = _reference_forward(x2, p2, 2)
    assert out2.shape == ref2.shape, (out2.shape, ref2.shape)
    assert jnp.allclose(out2, ref2, rtol=5e-2, atol=5e-2), \
        float(jnp.max(jnp.abs(out2 - ref2)))

    print("KERNEL_OK")
</pallas_src>

<mosaic_0001>
module attributes {stable_mosaic.version = 11 : i64} {
  func.func @_repvgg_fused_kernel(%arg0: i32, %arg1: i32, %arg2: memref<1x18x18x4xbf16, #tpu.memory_space<vmem>>, %arg3: memref<36x4xbf16, #tpu.memory_space<vmem>>, %arg4: memref<1x4xf32, #tpu.memory_space<vmem>>, %arg5: memref<1x16x16x4xf32, #tpu.memory_space<vmem>>) attributes {dimension_semantics = [#tpu.dimension_semantics<parallel>, #tpu.dimension_semantics<parallel>], iteration_bounds = array<i64: 2, 1>, scalar_prefetch = 0 : i64, scratch_operands = 0 : i64, tpu.core_type = #tpu.core_type<tc>, window_params = [{transform_indices = @transform_0, window_bounds = array<i64: 1, 18, 18, 4>}, {transform_indices = @transform_1, window_bounds = array<i64: 36, 4>}, {transform_indices = @transform_2, window_bounds = array<i64: 1, 4>}, {transform_indices = @transform_3, window_bounds = array<i64: 1, 16, 16, 4>}]} {
    %c0 = arith.constant 0 : index
    %c0_0 = arith.constant 0 : index
    %c0_1 = arith.constant 0 : index
    %c0_2 = arith.constant 0 : index
    %0 = vector.load %arg2[%c0, %c0_0, %c0_1, %c0_2] : memref<1x18x18x4xbf16, #tpu.memory_space<vmem>>, vector<1x16x16x4xbf16>
    %1 = vector.shape_cast %0 : vector<1x16x16x4xbf16> to vector<16x16x4xbf16>
    %2 = vector.shape_cast %1 : vector<16x16x4xbf16> to vector<256x4xbf16>
    %c0_3 = arith.constant 0 : index
    %c0_4 = arith.constant 0 : index
    %c1 = arith.constant 1 : index
    %c0_5 = arith.constant 0 : index
    %3 = vector.load %arg2[%c0_3, %c0_4, %c1, %c0_5] : memref<1x18x18x4xbf16, #tpu.memory_space<vmem>>, vector<1x16x16x4xbf16>
    %4 = vector.shape_cast %3 : vector<1x16x16x4xbf16> to vector<16x16x4xbf16>
    %5 = vector.shape_cast %4 : vector<16x16x4xbf16> to vector<256x4xbf16>
    %c0_6 = arith.constant 0 : index
    %c0_7 = arith.constant 0 : index
    %c2 = arith.constant 2 : index
    %c0_8 = arith.constant 0 : index
    %6 = vector.load %arg2[%c0_6, %c0_7, %c2, %c0_8] : memref<1x18x18x4xbf16, #tpu.memory_space<vmem>>, vector<1x16x16x4xbf16>
    %7 = vector.shape_cast %6 : vector<1x16x16x4xbf16> to vector<16x16x4xbf16>
    %8 = vector.shape_cast %7 : vector<16x16x4xbf16> to vector<256x4xbf16>
    %c0_9 = arith.constant 0 : index
    %c1_10 = arith.constant 1 : index
    %c0_11 = arith.constant 0 : index
    %c0_12 = arith.constant 0 : index
    %9 = vector.load %arg2[%c0_9, %c1_10, %c0_11, %c0_12] : memref<1x18x18x4xbf16, #tpu.memory_space<vmem>>, vector<1x16x16x4xbf16>
    %10 = vector.shape_cast %9 : vector<1x16x16x4xbf16> to vector<16x16x4xbf16>
    %11 = vector.shape_cast %10 : vector<16x16x4xbf16> to vector<256x4xbf16>
    %c0_13 = arith.constant 0 : index
    %c1_14 = arith.constant 1 : index
    %c1_15 = arith.constant 1 : index
    %c0_16 = arith.constant 0 : index
    %12 = vector.load %arg2[%c0_13, %c1_14, %c1_15, %c0_16] : memref<1x18x18x4xbf16, #tpu.memory_space<vmem>>, vector<1x16x16x4xbf16>
    %13 = vector.shape_cast %12 : vector<1x16x16x4xbf16> to vector<16x16x4xbf16>
    %14 = vector.shape_cast %13 : vector<16x16x4xbf16> to vector<256x4xbf16>
    %c0_17 = arith.constant 0 : index
    %c1_18 = arith.constant 1 : index
    %c2_19 = arith.constant 2 : index
    %c0_20 = arith.constant 0 : index
    %15 = vector.load %arg2[%c0_17, %c1_18, %c2_19, %c0_20] : memref<1x18x18x4xbf16, #tpu.memory_space<vmem>>, vector<1x16x16x4xbf16>
    %16 = vector.shape_cast %15 : vector<1x16x16x4xbf16> to vector<16x16x4xbf16>
    %17 = vector.shape_cast %16 : vector<16x16x4xbf16> to vector<256x4xbf16>
    %c0_21 = arith.constant 0 : index
    %c2_22 = arith.constant 2 : index
    %c0_23 = arith.constant 0 : index
    %c0_24 = arith.constant 0 : index
    %18 = vector.load %arg2[%c0_21, %c2_22, %c0_23, %c0_24] : memref<1x18x18x4xbf16, #tpu.memory_space<vmem>>, vector<1x16x16x4xbf16>
    %19 = vector.shape_cast %18 : vector<1x16x16x4xbf16> to vector<16x16x4xbf16>
    %20 = vector.shape_cast %19 : vector<16x16x4xbf16> to vector<256x4xbf16>
    %c0_25 = arith.constant 0 : index
    %c2_26 = arith.constant 2 : index
    %c1_27 = arith.constant 1 : index
    %c0_28 = arith.constant 0 : index
    %21 = vector.load %arg2[%c0_25, %c2_26, %c1_27, %c0_28] : memref<1x18x18x4xbf16, #tpu.memory_space<vmem>>, vector<1x16x16x4xbf16>
    %22 = vector.shape_cast %21 : vector<1x16x16x4xbf16> to vector<16x16x4xbf16>
    %23 = vector.shape_cast %22 : vector<16x16x4xbf16> to vector<256x4xbf16>
    %c0_29 = arith.constant 0 : index
    %c2_30 = arith.constant 2 : index
    %c2_31 = arith.constant 2 : index
    %c0_32 = arith.constant 0 : index
    %24 = vector.load %arg2[%c0_29, %c2_30, %c2_31, %c0_32] : memref<1x18x18x4xbf16, #tpu.memory_space<vmem>>, vector<1x16x16x4xbf16>
    %25 = vector.shape_cast %24 : vector<1x16x16x4xbf16> to vector<16x16x4xbf16>
    %26 = vector.shape_cast %25 : vector<16x16x4xbf16> to vector<256x4xbf16>
    %27 = tpu.concatenate %2, %5, %8, %11, %14, %17, %20, %23, %26 in 1 : vector<256x4xbf16>, vector<256x4xbf16>, vector<256x4xbf16>, vector<256x4xbf16>, vector<256x4xbf16>, vector<256x4xbf16>, vector<256x4xbf16>, vector<256x4xbf16>, vector<256x4xbf16> -> vector<256x36xbf16>
    %c0_33 = arith.constant 0 : index
    %c0_34 = arith.constant 0 : index
    %28 = vector.load %arg3[%c0_33, %c0_34] : memref<36x4xbf16, #tpu.memory_space<vmem>>, vector<36x4xbf16>
    %cst = arith.constant dense<0.000000e+00> : vector<256x4xf32>
    %29 = tpu.matmul %27, %28, %cst {dimension_numbers = #tpu.dot_dimension_numbers<[1], [0], [0], [1], [0, 0, 1, 1], [], []>} : vector<256x36xbf16>, vector<36x4xbf16>, vector<256x4xf32> -> vector<256x4xf32>
    %c0_35 = arith.constant 0 : index
    %c0_36 = arith.constant 0 : index
    %30 = vector.load %arg4[%c0_35, %c0_36] : memref<1x4xf32, #tpu.memory_space<vmem>>, vector<1x4xf32>
    %31 = vector.broadcast %30 : vector<1x4xf32> to vector<256x4xf32>
    %32 = arith.addf %29, %31 : vector<256x4xf32>
    %33 = vector.shape_cast %32 : vector<256x4xf32> to vector<16x16x4xf32>
    %c0_37 = arith.constant 0 : index
    %c0_38 = arith.constant 0 : index
    %c0_39 = arith.constant 0 : index
    %c0_40 = arith.constant 0 : index
    %34 = vector.load %arg5[%c0_37, %c0_38, %c0_39, %c0_40] : memref<1x16x16x4xf32, #tpu.memory_space<vmem>>, vector<1x16x16x4xf32>
    %35 = vector.shape_cast %34 : vector<1x16x16x4xf32> to vector<16x16x4xf32>
    %36 = vector.shape_cast %33 : vector<16x16x4xf32> to vector<1x16x16x4xf32>
    tpu.vector_store %arg5[%c0_37, %c0_38, %c0_39, %c0_40], %36 {strides = array<i32>} : memref<1x16x16x4xf32, #tpu.memory_space<vmem>>, vector<1x16x16x4xf32>,
    return
  }
  func.func @transform_0(%arg0: i32, %arg1: i32) -> (i32, i32, i32, i32) {
    %c0_i32 = arith.constant 0 : i32
    %c0_i32_0 = arith.constant 0 : i32
    %c0_i32_1 = arith.constant 0 : i32
    %c0_i32_2 = arith.constant 0 : i32
    return %arg0, %c0_i32, %c0_i32_0, %c0_i32_1 : i32, i32, i32, i32
  }
  func.func @transform_1(%arg0: i32, %arg1: i32) -> (i32, i32) {
    %c0_i32 = arith.constant 0 : i32
    %c0_i32_0 = arith.constant 0 : i32
    return %c0_i32, %arg1 : i32, i32
  }
  func.func @transform_2(%arg0: i32, %arg1: i32) -> (i32, i32) {
    %c0_i32 = arith.constant 0 : i32
    %c0_i32_0 = arith.constant 0 : i32
    return %c0_i32, %arg1 : i32, i32
  }
  func.func @transform_3(%arg0: i32, %arg1: i32) -> (i32, i32, i32, i32) {
    %c0_i32 = arith.constant 0 : i32
    %c0_i32_0 = arith.constant 0 : i32
    %c0_i32_1 = arith.constant 0 : i32
    return %arg0, %c0_i32, %c0_i32_0, %arg1 : i32, i32, i32, i32
  }
}

</mosaic_0001>

<bundles_post_ra>
// kernel: tpu_custom_call.1
= control target key start
LH: loop header
LB: loop body
LE: loop exit
PB: predicated region body
PF: predicated region fallthrough
CT: control target
= control target key end

     0   :  { %s3908_s12 = smov 0   ;;  %s3910_s13 = smov 0   ;;  %s5747_s0 = inlined_call_operand.vmem [shape: bf16[2,18,18,4], index: 0, kind: input, shape index: {}]   ;;  %s5748_s1 = inlined_call_operand.vmem [shape: bf16[36,4], index: 1, kind: input, shape index: {}]   ;;  %s5749_s2 = inlined_call_operand.vmem [shape: f32[1,4], index: 2, kind: input, shape index: {}]   ;;  %s5750_s3 = inlined_call_operand.vmem [shape: f32[2,16,16,4], index: 3, kind: output, shape index: {}]  }
   0x1   :  { %s3912_s14 = smov 0  }
   0x2 LB: > { %s25_s15 = sadd.s32 1, %s3874_s13  ;;  %p3364_p0 = scmp.ge.s32.totalorder %s3878_s14, 1  ;;  %s3878_s14 = sphi %s3912_s14, %s13_s14   ;;  %s3874_s13 = sphi %s3910_s13, %s5756_s13   ;;  %s3870_s12 = sphi %s3908_s12, %s5755_s12  }
   0x3   : > { %p27_p1 = scmp.ge.s32.totalorder %s25_s15, 2  ;;  %p168_p2 = scmp.lt.s32.totalorder %s3878_s14, 3 }
   0x5   : > { %s5758_s15 = smov (%p27_p1, %s25_s15), 0  ;;  %p169_p3 = pnand %p3364_p0, %p168_p2 }
   0x6   : > { %p202_p4 = scmp.lt.s32.totalorder (!%p169_p3), %s3870_s12, 1  ;;  %s3880_s20 = smov (!%p169_p3), 4  }
   0x7   : > { %172 = sbr.rel (%p169_p3) target bundleno = 655 (0x28f), region = 32  ;;  %s3881_s21 = smov (!%p169_p3), 8  }
   0x8   : > { %s3882_s22 = smov (!%p169_p3), 12   ;;  %s3883_s23 = smov (!%p169_p3), 16  }
   0x9   : > { %s3884_s24 = smov (!%p169_p3), 20   ;;  %s3885_s25 = smov (!%p169_p3), 28  }
   0xa   : > { %s3886_s26 = smov (!%p169_p3), 24   ;;  %s3887_s27 = smov (!%p169_p3), 32  }
   0xc   : > { %s5760_s12 = smov (!%p202_p4, %s3870_s12), 1  ;;  %vm271_vm0 = vsmask.f32 3328  ;;  %vm272_vm1 = vsmask.f32 7440  ;;  %vm722_vm3 = vcmask 1042432  }
   0xd   : > { %s3822_s16 = smul.u32 216, %s5760_s12  ;;  %vm3960_vm2 = vmor %vm271_vm0, %vm272_vm1  ;;  %vm723_vm4 = vcmask 1046532   ;;  %vm2791_vm6 = vcmask 31744   ;;  %vm2840_vm7 = vcmask 64512   ;;  %vm2873_vm8 = vcmask 97280   ;;  %s3762_s7 = sshll.u32 %s5760_s12, 8 }
   0xe   : > { %vm4162_vm5 = vmor %vm722_vm3, %vm723_vm4  ;;  %vm2906_vm9 = vcmask 130048   ;;  %vm3128_vm10 = vcmask 1041408   ;;  %vm2939_vm11 = vcmask 162816   ;;  %vm2972_vm12 = vcmask 195584  }
   0xf   : > { %s3932_s19 = scalar_lea.vmem %s5747_s0, %s3822_s16  ;;  %vm3005_vm13 = vcmask 228352   ;;  %vm3038_vm14 = vcmask 261120   ;;  %vm3095_vm15 = vcmask 293888   ;;  %s5608_s16 = scalar_lea.vmem %s5750_s3, %s3762_s7 }
  0x10   : > { %v231_v0 = vld [vmem:[%s3932_s19 + $0x30] sm:$0xf]  ;;  %v3936_v1 = vld [vmem:[%s3932_s19 + $0x34] sm:$0xf]  ;;  %v3939_v2 = vld [vmem:[%s3932_s19 + $0x38] sm:$0x1] }
  0x11   : > { %v371_v3 = vshrl.u32 %v231_v0, 16  ;;  %v374_v4 = vshll.u32 %v231_v0, 16  ;;  %v380_v5 = vshll.u32 %v3936_v1, 16  ;;  %v384_v6 = vshrl.u32 %v3936_v1, 16  ;;  %v227_v7 = vld [vmem:[%s3932_s19 + $0x18] sm:$0xf] }
  0x12   : > { %v390_v8 = vshll.u32 %v3939_v2, 16  ;;  %v3946_v9 = vld [vmem:[%s3932_s19 + $0x1c] sm:$0xf]  ;;  %v3949_v10 = vld [vmem:[%s3932_s19 + $0x20] sm:$0x1]  ;;  %v323_v11 = vshrl.u32 %v227_v7, 16 }
  0x13   : > { %v373_v12 = vrot.slane %v371_v3, 4  ;;  %v376_v13 = vrot.slane %v374_v4, 5  ;;  %v382_v14 = vrot.slane %v380_v5, 5  ;;  %v386_v15 = vrot.slane %v384_v6, 4  ;;  %v223_v16 = vld [vmem:[%s3932_s19] sm:$0xf] }
  0x14   : > { %v392_v17 = vrot.slane %v390_v8, 5  ;;  %v325_v18 = vrot.slane %v323_v11, 4  ;;  %v326_v19 = vshll.u32 %v227_v7, 16  ;;  %v332_v20 = vshll.u32 %v3946_v9, 16  ;;  %v3956_v25 = vld [vmem:[%s3932_s19 + $0x4] sm:$0xf] }
  0x15   : > { %v377_v21 = vor.u32 %v376_v13, %v373_v12  ;;  %v387_v22 = vor.u32 %v386_v15, %v382_v14  ;;  %v336_v23 = vshrl.u32 %v3946_v9, 16  ;;  %v342_v24 = vshll.u32 %v3949_v10, 16  ;;  %v3965_v36 = vld [vmem:[%s3932_s19 + $0x8] sm:$0x1]  ;;  %v233_v44 = vld [vmem:[%s3932_s19 + $0x3c] sm:$0xf] }
  0x16   : > { %v328_v27 = vrot.slane %v326_v19, 5  ;;  %v334_v28 = vrot.slane %v332_v20, 5  ;;  %v275_v29 = vshrl.u32 %v223_v16, 16  ;;  %v278_v30 = vshll.u32 %v223_v16, 16  ;;  %v3978_v56 = vld [vmem:[%s3932_s19 + $0x40] sm:$0xf] }
  0x17   : > { %v378_v31 = vrot.slane %v377_v21, 4  ;;  %v388_v32 = vrot.slane %v387_v22, 4  ;;  %v338_v33 = vrot.slane %v336_v23, 4  ;;  %v344_v34 = vrot.slane %v342_v24, 5  ;;  %v3983_v62 = vld [vmem:[%s3932_s19 + $0x44] sm:$0x1] }
  0x18   : > { %v329_v35 = vor.u32 %v328_v27, %v325_v18  ;;  %v277_v37 = vrot.slane %v275_v29, 4  ;;  %v280_v38 = vrot.slane %v278_v30, 5  ;;  %v284_v39 = vshll.u32 %v3956_v25, 16  ;;  %v229_v63 = vld [vmem:[%s3932_s19 + $0x24] sm:$0xf] }
  0x19   : > { %v383_v40 = vsel %vm3960_vm2, %v378_v31, %v382_v14  ;;  %v393_v41 = vsel %vm3960_vm2, %v388_v32, %v392_v17  ;;  %v339_v42 = vor.u32 %v338_v33, %v334_v28  ;;  %v288_v43 = vshrl.u32 %v3956_v25, 16  ;;  %v3992_v12 = vld [vmem:[%s3932_s19 + $0x28] sm:$0xf]  ;;  %v3996_v16 = vld [vmem:[%s3932_s19 + $0x2c] sm:$0x1] }
  0x1a   : > { %v2127_v45 = vunpack.c.l.b16 %v383_v40  ;;  %v2128_v46 = vunpack.c.l.b16 %v393_v41  ;;  %v330_v47 = vrot.slane %v329_v35, 4  ;;  %v281_v48 = vor.u32 %v280_v38, %v277_v37  ;;  %v225_v22 = vld [vmem:[%s3932_s19 + $0xc] sm:$0xf]  ;;  %v4006_v37 = vld [vmem:[%s3932_s19 + $0x10] sm:$0xf] }
  0x1b   : > { %v340_v49 = vrot.slane %v339_v42, 4  ;;  %v286_v50 = vrot.slane %v284_v39, 5  ;;  %v290_v51 = vrot.slane %v288_v43, 4  ;;  %v294_v52 = vshll.u32 %v3965_v36, 16  ;;  %v4009_v43 = vld [vmem:[%s3932_s19 + $0x14] sm:$0x1] }
  0x1c   : > { %v2155_v53 = vpack.c.b16 %v2128_v46, %v2127_v45  ;;  %v335_v54 = vsel %vm3960_vm2, %v330_v47, %v334_v28  ;;  %v282_v55 = vrot.slane %v281_v48, 4  ;;  %v395_v57 = vshrl.u32 %v233_v44, 16  ;;  %v239_v48 = vld [vmem:[%s3932_s19 + $0x60] sm:$0xf] }
  0x1d   : > { %v345_v58 = vsel %vm3960_vm2, %v340_v49, %v344_v34  ;;  %v2123_v59 = vunpack.c.l.b16 %v335_v54  ;;  %v291_v60 = vor.u32 %v290_v51, %v286_v50  ;;  %v296_v61 = vrot.slane %v294_v52, 5 }
  0x1e   : > { %2175 = vrot.lane.b32.xlu2 %v2155_v53, %s3880_s20  ;;  %v2124_v0 = vunpack.c.l.b16 %v345_v58  ;;  %v287_v3 = vsel %vm3960_vm2, %v282_v55, %v286_v50  ;;  %v397_v4 = vrot.slane %v395_v57, 4  ;;  %v398_v5 = vshll.u32 %v233_v44, 16 }
  0x1f   : > { %v292_v6 = vrot.slane %v291_v60, 4  ;;  %v2119_v7 = vunpack.c.l.b16 %v287_v3  ;;  %v404_v8 = vshll.u32 %v3978_v56, 16  ;;  %v408_v11 = vshrl.u32 %v3978_v56, 16 }
  0x20   : > { %v2153_v13 = vpack.c.b16 %v2124_v0, %v2123_v59  ;;  %v400_v14 = vrot.slane %v398_v5, 5  ;;  %v414_v15 = vshll.u32 %v3983_v62, 16  ;;  %v347_v17 = vshrl.u32 %v229_v63, 16 }
  0x21   : > { %v297_v18 = vsel %vm3960_vm2, %v292_v6, %v296_v61  ;;  %v406_v19 = vrot.slane %v404_v8, 5  ;;  %v410_v20 = vrot.slane %v408_v11, 4  ;;  %v350_v21 = vshll.u32 %v229_v63, 16  ;;  %v4023_v61 = vld [vmem:[%s3932_s19 + $0x64] sm:$0xf] }
  0x22   : > { %2171 = vrot.lane.b32.xlu1 %v2153_v13, %s3880_s20  ;;  %v2120_v23 = vunpack.c.l.b16 %v297_v18  ;;  %v401_v24 = vor.u32 %v400_v14, %v397_v4  ;;  %v416_v27 = vrot.slane %v414_v15, 5  ;;  %v349_v28 = vrot.slane %v347_v17, 4  ;;  %v4026_v6 = vld [vmem:[%s3932_s19 + $0x68] sm:$0x1] }
  0x23   : > { %v411_v29 = vor.u32 %v410_v20, %v406_v19  ;;  %v352_v30 = vrot.slane %v350_v21, 5  ;;  %v356_v31 = vshll.u32 %v3992_v12, 16  ;;  %v360_v32 = vshrl.u32 %v3992_v12, 16 }
  0x24   : > { %v2151_v33 = vpack.c.b16 %v2120_v23, %v2119_v7  ;;  %v402_v34 = vrot.slane %v401_v24, 4  ;;  %v366_v35 = vshll.u32 %v3996_v16, 16  ;;  %v299_v38 = vshrl.u32 %v225_v22, 16  ;;  %v237_v7 = vld [vmem:[%s3932_s19 + $0x54] sm:$0xf] }
  0x25   : > { %v412_v39 = vrot.slane %v411_v29, 4  ;;  %v353_v40 = vor.u32 %v352_v30, %v349_v28  ;;  %v358_v41 = vrot.slane %v356_v31, 5  ;;  %v362_v42 = vrot.slane %v360_v32, 4  ;;  %v4036_v23 = vld [vmem:[%s3932_s19 + $0x58] sm:$0xf] }
  0x26   : > { %2167 = vrot.lane.b32.xlu0 %v2151_v33, %s3880_s20  ;;  %v407_v44 = vsel %vm3960_vm2, %v402_v34, %v406_v19  ;;  %v368_v45 = vrot.slane %v366_v35, 5  ;;  %v301_v46 = vrot.slane %v299_v38, 4  ;;  %v302_v47 = vshll.u32 %v225_v22, 16  ;;  %v4041_v31 = vld [vmem:[%s3932_s19 + $0x5c] sm:$0x1] }
  0x27   : > { %v417_v49 = vsel %vm3960_vm2, %v412_v39, %v416_v27  ;;  %v2129_v50 = vunpack.c.l.b16 %v407_v44  ;;  %v354_v51 = vrot.slane %v353_v40, 4  ;;  %v363_v52 = vor.u32 %v362_v42, %v358_v41  ;;  %v235_v42 = vld [vmem:[%s3932_s19 + $0x48] sm:$0xf] }
  0x28   : > { %v2130_v53 = vunpack.c.l.b16 %v417_v49  ;;  %v304_v54 = vrot.slane %v302_v47, 5  ;;  %v308_v55 = vshll.u32 %v4006_v37, 16  ;;  %v312_v57 = vshrl.u32 %v4006_v37, 16 }
  0x29   : > { %v359_v58 = vsel %vm3960_vm2, %v354_v51, %v358_v41  ;;  %v364_v59 = vrot.slane %v363_v52, 4  ;;  %v318_v60 = vshll.u32 %v4009_v43, 16  ;;  %v467_v63 = vshrl.u32 %v239_v48, 16 }
  0x2a   : > { %v2156_v0 = vpack.c.b16 %v2130_v53, %v2129_v50  ;;  %v2125_v3 = vunpack.c.l.b16 %v359_v58  ;;  %v305_v4 = vor.u32 %v304_v54, %v301_v46  ;;  %v310_v5 = vrot.slane %v308_v55, 5  ;;  %v4051_v55 = vld [vmem:[%s3932_s19 + $0x4c] sm:$0xf] }
  0x2b   : > { %v369_v8 = vsel %vm3960_vm2, %v364_v59, %v368_v45  ;;  %v314_v11 = vrot.slane %v312_v57, 4  ;;  %v320_v13 = vrot.slane %v318_v60, 5  ;;  %v469_v14 = vrot.slane %v467_v63, 4  ;;  %v4056_v63 = vld [vmem:[%s3932_s19 + $0x50] sm:$0x1] }
  0x2c   : > { %2177 = vrot.lane.b32.xlu2 %v2156_v0, %s3880_s20  ;;  %v2126_v15 = vunpack.c.l.b16 %v369_v8  ;;  %v306_v17 = vrot.slane %v305_v4, 4  ;;  %v470_v18 = vshll.u32 %v239_v48, 16  ;;  %v476_v19 = vshll.u32 %v4023_v61, 16 }
  0x2d   : > { %v315_v20 = vor.u32 %v314_v11, %v310_v5  ;;  %v480_v21 = vshrl.u32 %v4023_v61, 16  ;;  %v486_v22 = vshll.u32 %v4026_v6, 16  ;;  %v443_v24 = vshrl.u32 %v237_v7, 16 }
  0x2e   : > { %v2154_v27 = vpack.c.b16 %v2126_v15, %v2125_v3  ;;  %v311_v28 = vsel %vm3960_vm2, %v306_v17, %v310_v5  ;;  %v472_v29 = vrot.slane %v470_v18, 5  ;;  %v478_v30 = vrot.slane %v476_v19, 5  ;;  %v245_v3 = vld [vmem:[%s3932_s19 + $0x84] sm:$0xf] }
  0x2f   : > { %v316_v32 = vrot.slane %v315_v20, 4  ;;  %v2121_v33 = vunpack.c.l.b16 %v311_v28  ;;  %v482_v34 = vrot.slane %v480_v21, 4  ;;  %v488_v35 = vrot.slane %v486_v22, 5  ;;  %v4068_v28 = vld [vmem:[%s3932_s19 + $0x88] sm:$0xf] }
  0x30   : > { %2173 = vrot.lane.b32.xlu1 %v2154_v27, %s3880_s20  ;;  %v473_v38 = vor.u32 %v472_v29, %v469_v14  ;;  %v445_v39 = vrot.slane %v443_v24, 4  ;;  %v446_v40 = vshll.u32 %v237_v7, 16  ;;  %v452_v41 = vshll.u32 %v4036_v23, 16  ;;  %v4071_v29 = vld [vmem:[%s3932_s19 + $0x8c] sm:$0x1] }
  0x31   : > { %v321_v44 = vsel %vm3960_vm2, %v316_v32, %v320_v13  ;;  %v483_v45 = vor.u32 %v482_v34, %v478_v30  ;;  %v456_v46 = vshrl.u32 %v4036_v23, 16  ;;  %v462_v47 = vshll.u32 %v4041_v31, 16 }
  0x32   : > { %v2122_v48 = vunpack.c.l.b16 %v321_v44  ;;  %v474_v49 = vrot.slane %v473_v38, 4  ;;  %v448_v50 = vrot.slane %v446_v40, 5  ;;  %v454_v51 = vrot.slane %v452_v41, 5 }
  0x33   : > { %v484_v52 = vrot.slane %v483_v45, 4  ;;  %v458_v53 = vrot.slane %v456_v46, 4  ;;  %v464_v54 = vrot.slane %v462_v47, 5  ;;  %v419_v57 = vshrl.u32 %v235_v42, 16 }
  0x34   : > { %v2152_v58 = vpack.c.b16 %v2122_v48, %v2121_v33  ;;  %v479_v59 = vsel %vm3960_vm2, %v474_v49, %v478_v30  ;;  %v449_v60 = vor.u32 %v448_v50, %v445_v39  ;;  %v422_v0 = vshll.u32 %v235_v42, 16  ;;  %v4083_v50 = vld [vmem:[%s3932_s19 + $0x7c] sm:$0xf] }
  0x35   : > { %v489_v4 = vsel %vm3960_vm2, %v484_v52, %v488_v35  ;;  %v2135_v5 = vunpack.c.l.b16 %v479_v59  ;;  %v459_v7 = vor.u32 %v458_v53, %v454_v51  ;;  %v421_v8 = vrot.slane %v419_v57, 4  ;;  %v243_v35 = vld [vmem:[%s3932_s19 + $0x78] sm:$0xf] }
  0x36   : > { %2169 = vrot.lane.b32.xlu0 %v2152_v58, %s3880_s20  ;;  %v2136_v11 = vunpack.c.l.b16 %v489_v4  ;;  %v450_v13 = vrot.slane %v449_v60, 4  ;;  %v424_v14 = vrot.slane %v422_v0, 5  ;;  %v428_v15 = vshll.u32 %v4051_v55, 16  ;;  %v4086_v58 = vld [vmem:[%s3932_s19 + $0x80] sm:$0x1] }
  0x37   : > { %v460_v17 = vrot.slane %v459_v7, 4  ;;  %v432_v18 = vshrl.u32 %v4051_v55, 16  ;;  %v438_v19 = vshll.u32 %v4056_v63, 16  ;;  %v539_v20 = vshrl.u32 %v245_v3, 16  ;;  %v241_v4 = vld [vmem:[%s3932_s19 + $0x6c] sm:$0xf] }
  0x38   : > { %v2159_v21 = vpack.c.b16 %v2136_v11, %v2135_v5  ;;  %v455_v22 = vsel %vm3960_vm2, %v450_v13, %v454_v51  ;;  %v425_v24 = vor.u32 %v424_v14, %v421_v8  ;;  %v430_v27 = vrot.slane %v428_v15, 5 }
  0x39   : > { %v465_v30 = vsel %vm3960_vm2, %v460_v17, %v464_v54  ;;  %v2133_v32 = vunpack.c.l.b16 %v455_v22  ;;  %v434_v33 = vrot.slane %v432_v18, 4  ;;  %v440_v34 = vrot.slane %v438_v19, 5 }
  0x3a   : > { %2183 = vrot.lane.b32.xlu2 %v2159_v21, %s3880_s20  ;;  %v2134_v38 = vunpack.c.l.b16 %v465_v30  ;;  %v426_v39 = vrot.slane %v425_v24, 4  ;;  %v541_v40 = vrot.slane %v539_v20, 4  ;;  %v542_v41 = vshll.u32 %v245_v3, 16  ;;  %v4096_v21 = vld [vmem:[%s3932_s19 + $0x70] sm:$0xf] }
  0x3b   : > { %v435_v42 = vor.u32 %v434_v33, %v430_v27  ;;  %v548_v44 = vshll.u32 %v4068_v28, 16  ;;  %v552_v45 = vshrl.u32 %v4068_v28, 16  ;;  %v558_v46 = vshll.u32 %v4071_v29, 16  ;;  %v4101_v33 = vld [vmem:[%s3932_s19 + $0x74] sm:$0x1] }
  0x3c   : > { %v2158_v47 = vpack.c.b16 %v2134_v38, %v2133_v32  ;;  %v431_v48 = vsel %vm3960_vm2, %v426_v39, %v430_v27  ;;  %v544_v49 = vrot.slane %v542_v41, 5  ;;  %v515_v51 = vshrl.u32 %v243_v35, 16 }
  0x3d   : > { %v436_v52 = vrot.slane %v435_v42, 4  ;;  %v2131_v53 = vunpack.c.l.b16 %v431_v48  ;;  %v550_v54 = vrot.slane %v548_v44, 5  ;;  %v554_v57 = vrot.slane %v552_v45, 4 }
  0x3e   : > { %2181 = vrot.lane.b32.xlu1 %v2158_v47, %s3880_s20  ;;  %v545_v59 = vor.u32 %v544_v49, %v541_v40  ;;  %v560_v60 = vrot.slane %v558_v46, 5  ;;  %v517_v0 = vrot.slane %v515_v51, 4  ;;  %v518_v3 = vshll.u32 %v243_v35, 16 }
  0x3f   : > { %v441_v5 = vsel %vm3960_vm2, %v436_v52, %v440_v34  ;;  %v555_v7 = vor.u32 %v554_v57, %v550_v54  ;;  %v524_v8 = vshll.u32 %v4083_v50, 16  ;;  %v528_v11 = vshrl.u32 %v4083_v50, 16  ;;  %v251_v34 = vld [vmem:[%s3932_s19 + $0xa8] sm:$0xf]  ;;  %v4113_v57 = vld [vmem:[%s3932_s19 + $0xac] sm:$0xf] }
  0x40   : > { %v2132_v13 = vunpack.c.l.b16 %v441_v5  ;;  %v546_v14 = vrot.slane %v545_v59, 4  ;;  %v520_v15 = vrot.slane %v518_v3, 5  ;;  %v534_v17 = vshll.u32 %v4086_v58, 16  ;;  %v4116_v59 = vld [vmem:[%s3932_s19 + $0xb0] sm:$0x1] }
  0x41   : > { %v556_v18 = vrot.slane %v555_v7, 4  ;;  %v526_v19 = vrot.slane %v524_v8, 5  ;;  %v530_v20 = vrot.slane %v528_v11, 4  ;;  %v491_v22 = vshrl.u32 %v241_v4, 16  ;;  %v249_v5 = vld [vmem:[%s3932_s19 + $0x9c] sm:$0xf] }
  0x42   : > { %v2157_v24 = vpack.c.b16 %v2132_v13, %v2131_v53  ;;  %v551_v27 = vsel %vm3960_vm2, %v546_v14, %v550_v54  ;;  %v521_v30 = vor.u32 %v520_v15, %v517_v0  ;;  %v536_v32 = vrot.slane %v534_v17, 5 }
  0x43   : > { %v561_v35 = vsel %vm3960_vm2, %v556_v18, %v560_v60  ;;  %v2141_v38 = vunpack.c.l.b16 %v551_v27  ;;  %v531_v39 = vor.u32 %v530_v20, %v526_v19  ;;  %v493_v40 = vrot.slane %v491_v22, 4 }
  0x44   : > { %2179 = vrot.lane.b32.xlu0 %v2157_v24, %s3880_s20  ;;  %v2142_v41 = vunpack.c.l.b16 %v561_v35  ;;  %v522_v42 = vrot.slane %v521_v30, 4  ;;  %v494_v44 = vshll.u32 %v241_v4, 16  ;;  %v500_v45 = vshll.u32 %v4096_v21, 16  ;;  %v4126_v24 = vld [vmem:[%s3932_s19 + $0xa0] sm:$0xf] }
  0x45   : > { %v532_v46 = vrot.slane %v531_v39, 4  ;;  %v504_v47 = vshrl.u32 %v4096_v21, 16  ;;  %v510_v48 = vshll.u32 %v4101_v33, 16  ;;  %v611_v49 = vshrl.u32 %v251_v34, 16 }
  0x46   : > { %v2162_v51 = vpack.c.b16 %v2142_v41, %v2141_v38  ;;  %v527_v52 = vsel %vm3960_vm2, %v522_v42, %v526_v19  ;;  %v496_v53 = vrot.slane %v494_v44, 5  ;;  %v502_v54 = vrot.slane %v500_v45, 5  ;;  %v247_v44 = vld [vmem:[%s3932_s19 + $0x90] sm:$0xf] }
  0x47   : > { %v537_v60 = vsel %vm3960_vm2, %v532_v46, %v536_v32  ;;  %v2139_v0 = vunpack.c.l.b16 %v527_v52  ;;  %v506_v3 = vrot.slane %v504_v47, 4  ;;  %v512_v4 = vrot.slane %v510_v48, 5 }
  0x48   : > { %2189 = vrot.lane.b32.xlu2 %v2162_v51, %s3880_s20  ;;  %v2140_v7 = vunpack.c.l.b16 %v537_v60  ;;  %v497_v8 = vor.u32 %v496_v53, %v493_v40  ;;  %v613_v11 = vrot.slane %v611_v49, 4  ;;  %v614_v13 = vshll.u32 %v251_v34, 16  ;;  %v4132_v40 = vld [vmem:[%s3932_s19 + $0xa4] sm:$0x1] }
  0x49   : > { %v507_v14 = vor.u32 %v506_v3, %v502_v54  ;;  %v620_v15 = vshll.u32 %v4113_v57, 16  ;;  %v624_v17 = vshrl.u32 %v4113_v57, 16  ;;  %v630_v18 = vshll.u32 %v4116_v59, 16 }
  0x4a   : > { %v2161_v19 = vpack.c.b16 %v2140_v7, %v2139_v0  ;;  %v498_v20 = vrot.slane %v497_v8, 4  ;;  %v616_v22 = vrot.slane %v614_v13, 5  ;;  %v587_v27 = vshrl.u32 %v249_v5, 16  ;;  %v4146_v13 = vld [vmem:[%s3932_s19 + $0x98] sm:$0x1] }
  0x4b   : > { %v508_v30 = vrot.slane %v507_v14, 4  ;;  %v622_v32 = vrot.slane %v620_v15, 5  ;;  %v626_v35 = vrot.slane %v624_v17, 4  ;;  %v632_v38 = vrot.slane %v630_v18, 5 }
  0x4c   : > { %2187 = vrot.lane.b32.xlu1 %v2161_v19, %s3880_s20  ;;  %v503_v34 = vsel %vm3960_vm2, %v498_v20, %v502_v54  ;;  %v617_v39 = vor.u32 %v616_v22, %v613_v11  ;;  %v589_v41 = vrot.slane %v587_v27, 4  ;;  %v590_v42 = vshll.u32 %v249_v5, 16  ;;  %v4143_v11 = vld [vmem:[%s3932_s19 + $0x94] sm:$0xf] }
  0x4d   : > { %v513_v45 = vsel %vm3960_vm2, %v508_v30, %v512_v4  ;;  %v2137_v46 = vunpack.c.l.b16 %v503_v34  ;;  %v627_v47 = vor.u32 %v626_v35, %v622_v32  ;;  %v596_v48 = vshll.u32 %v4126_v24, 16  ;;  %v659_v34 = vld [vmem:[%s3932_s19 + $0xc] sm:$0xe] }
  0x4e   : > { %v2138_v49 = vunpack.c.l.b16 %v513_v45  ;;  %v618_v51 = vrot.slane %v617_v39, 4  ;;  %v592_v52 = vrot.slane %v590_v42, 5  ;;  %v600_v53 = vshrl.u32 %v4126_v24, 16 }
  0x4f   : > { %v628_v54 = vrot.slane %v627_v47, 4  ;;  %v598_v60 = vrot.slane %v596_v48, 5  ;;  %v606_v0 = vshll.u32 %v4132_v40, 16  ;;  %v563_v3 = vshrl.u32 %v247_v44, 16 }
  0x50   : > { %v2160_v5 = vpack.c.b16 %v2138_v49, %v2137_v46  ;;  %v623_v4 = vsel %vm3960_vm2, %v618_v51, %v622_v32  ;;  %v593_v7 = vor.u32 %v592_v52, %v589_v41  ;;  %v602_v8 = vrot.slane %v600_v53, 4  ;;  %v658_v49 = vld [vmem:[%s3932_s19] sm:$0xe] }
  0x51   : > { %v633_v14 = vsel %vm3960_vm2, %v628_v54, %v632_v38  ;;  %v2147_v15 = vunpack.c.l.b16 %v623_v4  ;;  %v608_v17 = vrot.slane %v606_v0, 5  ;;  %v565_v18 = vrot.slane %v563_v3, 4 }
  0x52   : > { %2185 = vrot.lane.b32.xlu0 %v2160_v5, %s3880_s20  ;;  %v2148_v19 = vunpack.c.l.b16 %v633_v14  ;;  %v594_v20 = vrot.slane %v593_v7, 4  ;;  %v603_v22 = vor.u32 %v602_v8, %v598_v60  ;;  %v566_v27 = vshll.u32 %v247_v44, 16 }
  0x53   : > { %v572_v30 = vshll.u32 %v4143_v11, 16  ;;  %v576_v32 = vshrl.u32 %v4143_v11, 16  ;;  %v582_v35 = vshll.u32 %v4146_v13, 16  ;;  %v3369_v52 = vrot.slane %v659_v34, 9 }
  0x54   : > { %v2165_v39 = vpack.c.b16 %v2148_v19, %v2147_v15  ;;  %v599_v38 = vsel %vm3960_vm2, %v594_v20, %v598_v60  ;;  %v604_v41 = vrot.slane %v603_v22, 4  ;;  %v568_v42 = vrot.slane %v566_v27, 5  ;;  %v253_v19 = vld [vmem:[%s3932_s19 + $0xb4] sm:$0xf] }
  0x55   : > { %v2145_v45 = vunpack.c.l.b16 %v599_v38  ;;  %v574_v46 = vrot.slane %v572_v30, 5  ;;  %v578_v47 = vrot.slane %v576_v32, 4  ;;  %v584_v48 = vrot.slane %v582_v35, 5  ;;  %v4186_v35 = vld [vmem:[%s3932_s19 + $0xbc] sm:$0x1] }
  0x56   : > { %2195 = vrot.lane.b32.xlu2 %v2165_v39, %s3880_s20  ;;  %v609_v44 = vsel %vm3960_vm2, %v604_v41, %v608_v17  ;;  %v569_v51 = vor.u32 %v568_v42, %v565_v18  ;;  %v734_v0 = vrot.slane %v4006_v37, 5  ;;  %v737_v3 = vrot.slane %v4009_v43, 5 }
  0x57   : > { %v2146_v53 = vunpack.c.l.b16 %v609_v44  ;;  %v579_v54 = vor.u32 %v578_v47, %v574_v46  ;;  %v3368_v4 = vrot.slane %v658_v49, 9  ;;  %v727_v7 = vrot.slane %v3956_v25, 5  ;;  %v4178_v25 = vld [vmem:[%s3932_s19 + $0xb8] sm:$0xf] }
  0x58   : > { %v570_v5 = vrot.slane %v569_v51, 4  ;;  %v730_v8 = vrot.slane %v3965_v36, 5  ;;  %v735_v17 = vsel %vm4162_vm5, %v3369_v52, %v734_v0  ;;  %v736_v18 = vrot.slane %v734_v0, 4 }
  0x59   : > { %v2164_v14 = vpack.c.b16 %v2146_v53, %v2145_v45  ;;  %v580_v15 = vrot.slane %v579_v54, 4  ;;  %v2201_v37 = vunpack.c.l.b16 %v735_v17  ;;  %v728_v43 = vsel %vm4162_vm5, %v3368_v4, %v727_v7  ;;  %v661_v53 = vld [vmem:[%s3932_s19 + $0x24] sm:$0xe]  ;;  %v660_v4 = vld [vmem:[%s3932_s19 + $0x18] sm:$0xe] }
  0x5a   : > { %v575_v20 = vsel %vm3960_vm2, %v570_v5, %v574_v46  ;;  %v729_v22 = vrot.slane %v727_v7, 4  ;;  %v738_v30 = vsel %vm4162_vm5, %v736_v18, %v737_v3  ;;  %v2199_v32 = vunpack.c.l.b16 %v728_v43 }
  0x5b   : > { %2193 = vrot.lane.b32.xlu1 %v2164_v14, %s3880_s20  ;;  %v585_v36 = vsel %vm3960_vm2, %v580_v15, %v584_v48  ;;  %v2143_v27 = vunpack.c.l.b16 %v575_v20  ;;  %v2202_v39 = vunpack.c.l.b16 %v738_v30  ;;  %v635_v41 = vshrl.u32 %v253_v19, 16  ;;  %v662_v48 = vld [vmem:[%s3932_s19 + $0x30] sm:$0xe] }
  0x5c   : > { %v2144_v34 = vunpack.c.l.b16 %v585_v36  ;;  %v731_v38 = vsel %vm4162_vm5, %v729_v22, %v730_v8  ;;  %v638_v45 = vshll.u32 %v253_v19, 16  ;;  %v644_v46 = vshll.u32 %v4178_v25, 16 }
  0x5d   : > { %v2200_v42 = vunpack.c.l.b16 %v731_v38  ;;  %v648_v47 = vshrl.u32 %v4178_v25, 16  ;;  %v2232_v44 = vpack.c.b16 %v2202_v39, %v2201_v37  ;;  %v637_v51 = vrot.slane %v635_v41, 4 }
  0x5e   : > { %v2163_v49 = vpack.c.b16 %v2144_v34, %v2143_v27  ;;  %v654_v52 = vshll.u32 %v4186_v35, 16  ;;  %v640_v0 = vrot.slane %v638_v45, 5  ;;  %v646_v3 = vrot.slane %v644_v46, 5  ;;  %v665_v45 = vld [vmem:[%s3932_s19 + $0x54] sm:$0xe] }
  0x5f   : > { %v2231_v54 = vpack.c.b16 %v2200_v42, %v2199_v32  ;;  %v650_v5 = vrot.slane %v648_v47, 4  ;;  %2249 = vrot.lane.b32.xlu2 %v2232_v44, %s3881_s21  ;;  %v3372_v8 = vrot.slane %v662_v48, 9  ;;  %v755_v14 = vrot.slane %v3936_v1, 5 }
  0x60   : > { %2191 = vrot.lane.b32.xlu0 %v2163_v49, %s3880_s20  ;;  %v656_v7 = vrot.slane %v654_v52, 5  ;;  %v758_v15 = vrot.slane %v3939_v2, 5  ;;  %v641_v17 = vor.u32 %v640_v0, %v637_v51  ;;  %v3371_v19 = vrot.slane %v661_v53, 9 }
  0x61   : > { %v651_v18 = vor.u32 %v650_v5, %v646_v3  ;;  %v748_v20 = vrot.slane %v3992_v12, 5  ;;  %v756_v37 = vsel %vm4162_vm5, %v3372_v8, %v755_v14  ;;  %v757_v43 = vrot.slane %v755_v14, 4  ;;  %v663_v5 = vld [vmem:[%s3932_s19 + $0x3c] sm:$0xe] }
  0x62   : > { %v751_v22 = vrot.slane %v3996_v16, 5  ;;  %v3370_v36 = vrot.slane %v660_v4, 9  ;;  %v642_v27 = vrot.slane %v641_v17, 4  ;;  %v2207_v1 = vunpack.c.l.b16 %v756_v37 }
  0x63   : > { %2247 = vrot.lane.b32.xlu1 %v2231_v54, %s3881_s21  ;;  %v652_v30 = vrot.slane %v651_v18, 4  ;;  %v749_v2 = vsel %vm4162_vm5, %v3371_v19, %v748_v20  ;;  %v759_v12 = vsel %vm4162_vm5, %v757_v43, %v758_v15  ;;  %v750_v32 = vrot.slane %v748_v20, 4  ;;  %v668_v18 = vld [vmem:[%s3932_s19 + $0x78] sm:$0xe] }
  0x64   : > { %v2205_v34 = vunpack.c.l.b16 %v749_v2  ;;  %v741_v39 = vrot.slane %v3946_v9, 5  ;;  %v647_v16 = vsel %vm3960_vm2, %v642_v27, %v646_v3  ;;  %v2208_v41 = vunpack.c.l.b16 %v759_v12  ;;  %v664_v9 = vld [vmem:[%s3932_s19 + $0x48] sm:$0xe] }
  0x65   : > { %v657_v38 = vsel %vm3960_vm2, %v652_v30, %v656_v7  ;;  %v744_v42 = vrot.slane %v3949_v10, 5  ;;  %v2149_v46 = vunpack.c.l.b16 %v647_v16  ;;  %v752_v48 = vsel %vm4162_vm5, %v750_v32, %v751_v22  ;;  %v667_v30 = vld [vmem:[%s3932_s19 + $0x6c] sm:$0xe] }
  0x66   : > { %v2150_v47 = vunpack.c.l.b16 %v657_v38  ;;  %v742_v49 = vsel %vm4162_vm5, %v3370_v36, %v741_v39  ;;  %v2235_v44 = vpack.c.b16 %v2208_v41, %v2207_v1  ;;  %v2206_v51 = vunpack.c.l.b16 %v752_v48 }
  0x67   : > { %v743_v52 = vrot.slane %v741_v39, 4  ;;  %v2203_v53 = vunpack.c.l.b16 %v742_v49  ;;  %v3375_v0 = vrot.slane %v665_v45, 9  ;;  %v776_v3 = vrot.slane %v4036_v23, 5 }
  0x68   : > { %v2166_v54 = vpack.c.b16 %v2150_v47, %v2149_v46  ;;  %v779_v10 = vrot.slane %v4041_v31, 5  ;;  %2255 = vrot.lane.b32.xlu2 %v2235_v44, %s3881_s21  ;;  %v2234_v4 = vpack.c.b16 %v2206_v51, %v2205_v34  ;;  %v3374_v8 = vrot.slane %v664_v9, 9 }
  0x69   : > { %v745_v7 = vsel %vm4162_vm5, %v743_v52, %v744_v42  ;;  %v769_v14 = vrot.slane %v4051_v55, 5  ;;  %v777_v17 = vsel %vm4162_vm5, %v3375_v0, %v776_v3  ;;  %v778_v23 = vrot.slane %v776_v3, 4  ;;  %v666_v42 = vld [vmem:[%s3932_s19 + $0x60] sm:$0xe]  ;;  %v670_v3 = vld [vmem:[%s3932_s19 + $0x90] sm:$0xe] }
  0x6a   : > { %2197 = vrot.lane.b32.xlu0 %v2166_v54, %s3880_s20  ;;  %v2204_v15 = vunpack.c.l.b16 %v745_v7  ;;  %v772_v31 = vrot.slane %v4056_v63, 5  ;;  %v2213_v19 = vunpack.c.l.b16 %v777_v17  ;;  %v3373_v43 = vrot.slane %v663_v5, 9 }
  0x6b   : > { %2253 = vrot.lane.b32.xlu1 %v2234_v4, %s3881_s21  ;;  %v770_v20 = vsel %vm4162_vm5, %v3374_v8, %v769_v14  ;;  %v771_v37 = vrot.slane %v769_v14, 4  ;;  %v780_v22 = vsel %vm4162_vm5, %v778_v23, %v779_v10  ;;  %v762_v27 = vrot.slane %v3978_v56, 5 }
  0x6c   : > { %v2233_v55 = vpack.c.b16 %v2204_v15, %v2203_v53  ;;  %v2211_v36 = vunpack.c.l.b16 %v770_v20  ;;  %v2214_v1 = vunpack.c.l.b16 %v780_v22  ;;  %v765_v2 = vrot.slane %v3983_v62, 5  ;;  %v669_v15 = vld [vmem:[%s3932_s19 + $0x84] sm:$0xe] }
  0x6d   : > { %v773_v63 = vsel %vm4162_vm5, %v771_v37, %v772_v31  ;;  %v3378_v12 = vrot.slane %v668_v18, 9  ;;  %v763_v34 = vsel %vm4162_vm5, %v3373_v43, %v762_v27  ;;  %v764_v39 = vrot.slane %v762_v27, 4 }
  0x6e   : > { %v2212_v32 = vunpack.c.l.b16 %v773_v63  ;;  %v797_v16 = vrot.slane %v4083_v50, 5  ;;  %v2238_v38 = vpack.c.b16 %v2214_v1, %v2213_v19  ;;  %v800_v41 = vrot.slane %v4086_v58, 5  ;;  %v671_v58 = vld [vmem:[%s3932_s19 + $0x9c] sm:$0xe] }
  0x6f   : > { %v3377_v56 = vrot.slane %v667_v30, 9  ;;  %v766_v46 = vsel %vm4162_vm5, %v764_v39, %v765_v2  ;;  %v2209_v48 = vunpack.c.l.b16 %v763_v34  ;;  %v790_v50 = vrot.slane %v4096_v21, 5 }
  0x70   : > { %v2237_v45 = vpack.c.b16 %v2212_v32, %v2211_v36  ;;  %v798_v62 = vsel %vm4162_vm5, %v3378_v12, %v797_v16  ;;  %v799_v47 = vrot.slane %v797_v16, 4  ;;  %2261 = vrot.lane.b32.xlu2 %v2238_v38, %s3881_s21  ;;  %v793_v9 = vrot.slane %v4101_v33, 5  ;;  %v673_v36 = vld [vmem:[%s3932_s19 + $0xb4] sm:$0xe] }
  0x71   : > { %v2219_v49 = vunpack.c.l.b16 %v798_v62  ;;  %v2210_v44 = vunpack.c.l.b16 %v766_v46  ;;  %v3376_v52 = vrot.slane %v666_v42, 9  ;;  %v783_v53 = vrot.slane %v4023_v61, 5 }
  0x72   : > { %2251 = vrot.lane.b32.xlu0 %v2233_v55, %s3881_s21  ;;  %v801_v51 = vsel %vm4162_vm5, %v799_v47, %v800_v41  ;;  %v791_v0 = vsel %vm4162_vm5, %v3377_v56, %v790_v50  ;;  %v792_v21 = vrot.slane %v790_v50, 4  ;;  %v786_v33 = vrot.slane %v4026_v6, 5 }
  0x73   : > { %2259 = vrot.lane.b32.xlu1 %v2237_v45, %s3881_s21  ;;  %v2220_v54 = vunpack.c.l.b16 %v801_v51  ;;  %v2217_v10 = vunpack.c.l.b16 %v791_v0  ;;  %v785_v5 = vrot.slane %v783_v53, 4  ;;  %v3381_v4 = vrot.slane %v671_v58, 9 }
  0x74   : > { %v794_v8 = vsel %vm4162_vm5, %v792_v21, %v793_v9  ;;  %v784_v61 = vsel %vm4162_vm5, %v3376_v52, %v783_v53  ;;  %v818_v14 = vrot.slane %v4126_v24, 5  ;;  %v2236_v17 = vpack.c.b16 %v2210_v44, %v2209_v48  ;;  %v672_v48 = vld [vmem:[%s3932_s19 + $0xa8] sm:$0xe]  ;;  %v3779_v52 = vld [vmem:[%s3932_s19 + $0xc] sm:$0xff] }
  0x75   : > { %v2241_v7 = vpack.c.b16 %v2220_v54, %v2219_v49  ;;  %v2218_v23 = vunpack.c.l.b16 %v794_v8  ;;  %v821_v31 = vrot.slane %v4132_v40, 5  ;;  %v3380_v6 = vrot.slane %v670_v3, 9  ;;  %v3782_v3 = vld [vmem:[%s3932_s19 + $0x30] sm:$0xff] }
  0x76   : > { %v787_v18 = vsel %vm4162_vm5, %v785_v5, %v786_v33  ;;  %v819_v19 = vsel %vm4162_vm5, %v3381_v4, %v818_v14  ;;  %v820_v20 = vrot.slane %v818_v14, 4  ;;  %v811_v37 = vrot.slane %v4143_v11, 5  ;;  %v3781_v5 = vld [vmem:[%s3932_s19 + $0x24] sm:$0xff]  ;;  %v4325_v8 = vld [vmem:[%s3932_s19 + $0x70] sm:$0xf]  ;;  %v3785_v14 = vld [vmem:[%s3932_s19 + $0x54] sm:$0xff] }
  0x77   : > { %v2240_v43 = vpack.c.b16 %v2218_v23, %v2217_v10  ;;  %v2215_v55 = vunpack.c.l.b16 %v784_v61  ;;  %v814_v22 = vrot.slane %v4146_v13, 5  ;;  %v3379_v24 = vrot.slane %v669_v15, 9  ;;  %v3386_v61 = vld [vmem:[%s3932_s19 + $0x18] sm:$0xf]  ;;  %v4330_v23 = vld [vmem:[%s3932_s19 + $0x1c] sm:$0xf] }
  0x78   : > { %2267 = vrot.lane.b32.xlu2 %v2241_v7, %s3881_s21  ;;  %v822_v40 = vsel %vm4162_vm5, %v820_v20, %v821_v31  ;;  %v2225_v27 = vunpack.c.l.b16 %v819_v19  ;;  %v812_v30 = vsel %vm4162_vm5, %v3380_v6, %v811_v37  ;;  %v813_v1 = vrot.slane %v811_v37, 4  ;;  %v4311_v21 = vpop.permute.xlu2 %2175  ;;  %v3400_v7 = vld [vmem:[%s3932_s19 + $0x6c] sm:$0xf]  ;;  %v3780_v31 = vld [vmem:[%s3932_s19 + $0x18] sm:$0xff] }
  0x79   : > { %v2216_v63 = vunpack.c.l.b16 %v787_v18  ;;  %v2226_v11 = vunpack.c.l.b16 %v822_v40  ;;  %v804_v2 = vrot.slane %v4068_v28, 5  ;;  %v807_v13 = vrot.slane %v4071_v29, 5  ;;  %v3784_v6 = vld [vmem:[%s3932_s19 + $0x48] sm:$0xff]  ;;  %v4340_v40 = vld [vmem:[%s3932_s19 + $0x74] sm:$0x1] }
  0x7a   : > { %2257 = vrot.lane.b32.xlu0 %v2236_v17, %s3881_s21  ;;  %v815_v12 = vsel %vm4162_vm5, %v813_v1, %v814_v22  ;;  %v2223_v32 = vunpack.c.l.b16 %v812_v30  ;;  %v3383_v34 = vrot.slane %v673_v36, 9  ;;  %v832_v39 = vrot.slane %v4178_v25, 5  ;;  %v3384_v36 = vld [vmem:[%s3932_s19 + $0xc] sm:$0xf]  ;;  %v4343_v1 = vld [vmem:[%s3932_s19 + $0x20] sm:$0x1] }
  0x7b   : > { %2265 = vrot.lane.b32.xlu1 %v2240_v43, %s3881_s21  ;;  %v2224_v16 = vunpack.c.l.b16 %v815_v12  ;;  %v805_v38 = vsel %vm4162_vm5, %v3379_v24, %v804_v2  ;;  %v806_v41 = vrot.slane %v804_v2, 4  ;;  %v835_v56 = vrot.slane %v4186_v35, 5 }
  0x7c   : > { %v2244_v28 = vpack.c.b16 %v2226_v11, %v2225_v27  ;;  %v2221_v42 = vunpack.c.l.b16 %v805_v38  ;;  %v834_v29 = vrot.slane %v832_v39, 4  ;;  %v2239_v45 = vpack.c.b16 %v2216_v63, %v2215_v55  ;;  %v4350_v38 = vld [vmem:[%s3932_s19 + $0x10] sm:$0xf] }
  0x7d   : > { %v808_v46 = vsel %vm4162_vm5, %v806_v41, %v807_v13  ;;  %v2243_v62 = vpack.c.b16 %v2224_v16, %v2223_v32  ;;  %v825_v25 = vrot.slane %v4113_v57, 5  ;;  %v833_v49 = vsel %vm4162_vm5, %v3383_v34, %v832_v39  ;;  %v3767_v13 = vld [vmem:[%s3932_s19 + $0x30] sm:$0xff] }
  0x7e   : > { %v2222_v47 = vunpack.c.l.b16 %v808_v46  ;;  %v836_v50 = vsel %vm4162_vm5, %v834_v29, %v835_v56  ;;  %v3382_v9 = vrot.slane %v672_v48, 9  ;;  %v2229_v58 = vunpack.c.l.b16 %v833_v49  ;;  %v3768_v29 = vld [vmem:[%s3932_s19 + $0x3c] sm:$0xff] }
  0x7f   : > { %v2230_v44 = vunpack.c.l.b16 %v836_v50  ;;  %v827_v51 = vrot.slane %v825_v25, 4  ;;  %v828_v57 = vrot.slane %v4116_v59, 5  ;;  %v1079_v15 = vshrl.u32 %v3400_v7, 16  ;;  %v3771_v49 = vld [vmem:[%s3932_s19 + $0x60] sm:$0xff]  ;;  %v3765_v50 = vld [vmem:[%s3932_s19 + $0x18] sm:$0xff] }
  0x80   : > { %2273 = vrot.lane.b32.xlu2 %v2244_v28, %s3881_s21  ;;  %v2242_v35 = vpack.c.b16 %v2222_v47, %v2221_v42  ;;  %v826_v54 = vsel %vm4162_vm5, %v3382_v9, %v825_v25  ;;  %v1082_v17 = vshll.u32 %v3400_v7, 16  ;;  %v1088_v18 = vshll.u32 %v4325_v8, 16  ;;  %v3788_v25 = vld [vmem:[%s3932_s19 + $0x78] sm:$0xff] }
  0x81   : > { %v2246_v53 = vpack.c.b16 %v2230_v44, %v2229_v58  ;;  %v829_v0 = vsel %vm4162_vm5, %v827_v51, %v828_v57  ;;  %v2227_v59 = vunpack.c.l.b16 %v826_v54  ;;  %v1092_v19 = vshrl.u32 %v4325_v8, 16  ;;  %v3783_v51 = vld [vmem:[%s3932_s19 + $0x3c] sm:$0xff]  ;;  %v3787_v54 = vld [vmem:[%s3932_s19 + $0x6c] sm:$0xff] }
  0x82   : > { %2263 = vrot.lane.b32.xlu0 %v2239_v45, %s3881_s21  ;;  %v2228_v33 = vunpack.c.l.b16 %v829_v0  ;;  %v911_v20 = vshrl.u32 %v3386_v61, 16  ;;  %v914_v37 = vshll.u32 %v3386_v61, 16  ;;  %v1081_v43 = vrot.slane %v1079_v15, 4 }
  0x83   : > { %2271 = vrot.lane.b32.xlu1 %v2243_v62, %s3881_s21  ;;  %v1084_v55 = vrot.slane %v1082_v17, 5  ;;  %v920_v22 = vshll.u32 %v4330_v23, 16  ;;  %v924_v24 = vshrl.u32 %v4330_v23, 16  ;;  %v1090_v27 = vrot.slane %v1088_v18, 5  ;;  %v4392_v18 = vld [vmem:[%s3932_s19 + $0xa0] sm:$0xf] }
  0x84   : > { %v2245_v10 = vpack.c.b16 %v2228_v33, %v2227_v59  ;;  %v1094_v30 = vrot.slane %v1092_v19, 4  ;;  %v1098_v11 = vshll.u32 %v4340_v40, 16  ;;  %v913_v2 = vrot.slane %v911_v20, 4  ;;  %v3774_v19 = vld [vmem:[%s3932_s19 + $0x84] sm:$0xff] }
  0x85   : > { %v1085_v63 = vor.u32 %v1084_v55, %v1081_v43  ;;  %v916_v34 = vrot.slane %v914_v37, 5  ;;  %v922_v39 = vrot.slane %v920_v22, 5  ;;  %v926_v16 = vrot.slane %v924_v24, 4  ;;  %v3766_v20 = vld [vmem:[%s3932_s19 + $0x24] sm:$0xff] }
  0x86   : > { %v4320_v4 = vpop.permute.xlu2 %2177  ;;  %v1095_v32 = vor.u32 %v1094_v30, %v1090_v27  ;;  %v1100_v56 = vrot.slane %v1098_v11, 5  ;;  %v930_v28 = vshll.u32 %v4343_v1, 16  ;;  %v887_v42 = vshrl.u32 %v3384_v36, 16  ;;  %v4402_v22 = vld [vmem:[%s3932_s19 + $0xa4] sm:$0x1] }
  0x87   : > { %v1086_v41 = vrot.slane %v1085_v63, 4  ;;  %v917_v62 = vor.u32 %v916_v34, %v913_v2  ;;  %v927_v47 = vor.u32 %v926_v16, %v922_v39  ;;  %v890_v48 = vshll.u32 %v3384_v36, 16  ;;  %v3444_v63 = vld [vmem:[%s3932_s19 + $0x9c] sm:$0xe]  ;;  %v3440_v11 = vld [vmem:[%s3932_s19 + $0x6c] sm:$0xe] }
  0x88   : > { %2343 = vrot.lane.b32.xlu2 %v3779_v52, %s3882_s22  ;;  %v1096_v46 = vrot.slane %v1095_v32, 4  ;;  %v889_v9 = vrot.slane %v887_v42, 4  ;;  %v896_v58 = vshll.u32 %v4350_v38, 16  ;;  %v4361_v44 = vsel %vm2791_vm6, %v3767_v13, %v4311_v21  ;;  %v3791_v16 = vld [vmem:[%s3932_s19 + $0x9c] sm:$0xff] }
  0x89   : > { %v918_v57 = vrot.slane %v917_v62, 4  ;;  %v928_v52 = vrot.slane %v927_v47, 4  ;;  %v1091_v59 = vsel %vm3960_vm2, %v1086_v41, %v1090_v27  ;;  %v900_v21 = vshrl.u32 %v4350_v38, 16 }
  0x8a   : > { %2269 = vrot.lane.b32.xlu0 %v2242_v35, %s3881_s21  ;;  %v932_v35 = vrot.slane %v930_v28, 5  ;;  %v1101_v33 = vsel %vm3960_vm2, %v1096_v46, %v1100_v56  ;;  %v898_v61 = vrot.slane %v896_v58, 5  ;;  %v4397_v37 = vunpack.c.l.b16 %v1091_v59 }
  0x8b   : > { %2277 = vrot.lane.b32.xlu1 %v2246_v53, %s3881_s21  ;;  %v4365_v53 = vld [vmem:[%s3932_s19 + $0x14] sm:$0x1]  ;;  %v4399_v43 = vunpack.c.l.b16 %v1101_v33  ;;  %v902_v55 = vrot.slane %v900_v21, 4  ;;  %v1420_v24 = vrot.slane %v4392_v18, 5  ;;  %v3460_v32 = vrot.slane %v3444_v63, 9  ;;  %v3794_v63 = vld [vmem:[%s3932_s19 + $0xc0] sm:$0xff] }
  0x8c   : > { %v933_v7 = vsel %vm3960_vm2, %v928_v52, %v932_v35  ;;  %v3456_v28 = vrot.slane %v3440_v11, 9  ;;  %v1392_v42 = vrot.slane %v4325_v8, 5 }
  0x8d   : > { %v4408_v27 = vunpack.c.l.b16 %v933_v7  ;;  %v1422_v34 = vrot.slane %v1420_v24, 4  ;;  %v1421_v47 = vsel %vm4162_vm5, %v3460_v32, %v1420_v24  ;;  %v2415_v8 = vpack.c.b16 %v4399_v43, %v4397_v37 }
  0x8e   : > { %v4439_v58 = vsel %vm4162_vm5, %v3456_v28, %v1392_v42  ;;  %v2479_v33 = vunpack.c.l.b16 %v1421_v47  ;;  %v1394_v21 = vrot.slane %v1392_v42, 4  ;;  %v3793_v28 = vld [vmem:[%s3932_s19 + $0xb4] sm:$0xff] }
  0x90   : > { %2349 = vrot.lane.b32.xlu2 %v3782_v3, %s3882_s22  ;;  %v892_v3 = vrot.slane %v890_v48, 5 }
  0x92   : > { %2275 = vrot.lane.b32.xlu0 %v2245_v10, %s3881_s21  ;;  %v4375_v10 = vsel %vm2791_vm6, %v3768_v29, %v4320_v4  ;;  %v893_v4 = vor.u32 %v892_v3, %v889_v9  ;;  %v3786_v29 = vld [vmem:[%s3932_s19 + $0x60] sm:$0xff]  ;;  %v3764_v9 = vld [vmem:[%s3932_s19 + $0xc] sm:$0xff] }
  0x93   : > { %2347 = vrot.lane.b32.xlu1 %v3781_v5, %s3882_s22  ;;  %v923_v5 = vsel %vm3960_vm2, %v918_v57, %v922_v39  ;;  %v1423_v39 = vrot.slane %v4402_v22, 5 }
  0x94   : > { %v2172_v12 = vpop.permute.xlu1 %2171  ;;  %v2184_v45 = vpop.permute.xlu2 %2183  ;;  %v4406_v36 = vunpack.c.l.b16 %v923_v5  ;;  %v894_v30 = vrot.slane %v893_v4, 4  ;;  %v1194_v4 = vshll.u32 %v4402_v22, 16 }
  0x95   : > { %v4384_v15 = vsel %vm2791_vm6, %v3771_v49, %v2184_v45  ;;  %v4387_v17 = vsel %vm2791_vm6, %v3765_v50, %v2172_v12  ;;  %v903_v12 = vor.u32 %v902_v55, %v898_v61  ;;  %v1424_v48 = vsel %vm4162_vm5, %v1422_v34, %v1423_v39 }
  0x96   : > { %v899_v46 = vsel %vm3960_vm2, %v894_v30, %v898_v61  ;;  %v2408_v35 = vpack.c.b16 %v4408_v27, %v4406_v36  ;;  %v2480_v3 = vunpack.c.l.b16 %v1424_v48  ;;  %v1188_v61 = vshrl.u32 %v4392_v18, 16 }
  0x97   : > { %v904_v62 = vrot.slane %v903_v12, 4  ;;  %v4444_v59 = vunpack.c.l.b16 %v899_v46  ;;  %v3789_v12 = vld [vmem:[%s3932_s19 + $0x84] sm:$0xff] }
  0x98   : > { %2355 = vrot.lane.b32.xlu2 %v3785_v14, %s3882_s22  ;;  %v2168_v0 = vpop.permute.xlu0 %2167  ;;  %v3408_v14 = vld [vmem:[%s3932_s19 + $0x9c] sm:$0xf]  ;;  %v1190_v30 = vrot.slane %v1188_v61, 4  ;;  %v4475_v48 = vpack.c.b16 %v2480_v3, %v2479_v33  ;;  %v3524_v33 = vld [vmem:[%s3932_s19 + $0xa8] sm:$0xe] }
  0x99   : > { %v1175_v2 = vshrl.u32 %v3408_v14, 16  ;;  %v1178_v52 = vshll.u32 %v3408_v14, 16  ;;  %v4452_v14 = vld [vmem:[%s3932_s19 + $0x7c] sm:$0xf] }
  0x9a   : > { %2345 = vrot.lane.b32.xlu0 %v3780_v31, %s3882_s22  ;;  %v3763_v31 = vld [vmem:[%s3932_s19] sm:$0xff]  ;;  %v1697_v22 = vshll.u32 %v4452_v14, 16  ;;  %v1701_v39 = vshrl.u32 %v4452_v14, 16 }
  0x9b   : > { %2353 = vrot.lane.b32.xlu1 %v3784_v6, %s3882_s22  ;;  %v906_v6 = vshll.u32 %v4365_v53, 16  ;;  %v4415_v41 = vsel %vm2791_vm6, %v3763_v31, %v2168_v0  ;;  %v1177_v57 = vrot.slane %v1175_v2, 4  ;;  %v1180_v7 = vrot.slane %v1178_v52, 5  ;;  %v3489_v52 = vld [vmem:[%s3932_s19 + $0xac] sm:$0xf] }
  0x9c   : > { %v2471_v31 = vunpack.c.l.b16 %v4439_v58  ;;  %v1699_v46 = vrot.slane %v1697_v22, 5  ;;  %v1703_v58 = vrot.slane %v1701_v39, 4  ;;  %v2029_v3 = vrot.slane %v3489_v52, 5 }
  0x9d   : > { %v908_v56 = vrot.slane %v906_v6, 5  ;;  %v4458_v6 = vld [vmem:[%s3932_s19 + $0x80] sm:$0x1]  ;;  %v1181_v24 = vor.u32 %v1180_v7, %v1177_v57  ;;  %v4483_v7 = vld [vmem:[%s3932_s19 + $0xb0] sm:$0x1] }
  0x9f   : > { %v909_v5 = vsel %vm3960_vm2, %v904_v62, %v908_v56  ;;  %v3488_v56 = vld [vmem:[%s3932_s19 + $0xa8] sm:$0xf]  ;;  %v1182_v42 = vrot.slane %v1181_v24, 4  ;;  %v3520_v24 = vld [vmem:[%s3932_s19 + $0x78] sm:$0xe] }
  0xa0   : > { %2361 = vrot.lane.b32.xlu2 %v3788_v25, %s3882_s22  ;;  %v3790_v25 = vld [vmem:[%s3932_s19 + $0x90] sm:$0xff]  ;;  %v4468_v32 = vunpack.c.l.b16 %v909_v5  ;;  %v3777_v62 = vld [vmem:[%s3932_s19 + $0xa8] sm:$0xff]  ;;  %v1704_v5 = vor.u32 %v1703_v58, %v1699_v46 }
  0xa2   : > { %2351 = vrot.lane.b32.xlu0 %v3783_v51, %s3882_s22  ;;  %v2174_v13 = vpop.permute.xlu1 %2173  ;;  %v2190_v45 = vpop.permute.xlu2 %2189  ;;  %v1395_v51 = vrot.slane %v4340_v40, 5  ;;  %v1184_v40 = vshll.u32 %v4392_v18, 16 }
  0xa3   : > { %2359 = vrot.lane.b32.xlu1 %v3787_v54, %s3882_s22  ;;  %v4427_v49 = vsel %vm2791_vm6, %v3774_v19, %v2190_v45  ;;  %v4430_v50 = vsel %vm2791_vm6, %v3766_v20, %v2174_v13  ;;  %v3480_v54 = vld [vmem:[%s3932_s19 + $0x78] sm:$0xf] }
  0xa4   : > { %v1688_v19 = vshrl.u32 %v3480_v54, 16  ;;  %v1691_v20 = vshll.u32 %v3480_v54, 16  ;;  %v1186_v18 = vrot.slane %v1184_v40, 5  ;;  %v1396_v11 = vsel %vm4162_vm5, %v1394_v21, %v1395_v51 }
  0xa5   : > { %v1784_v54 = vshrl.u32 %v3488_v56, 16  ;;  %v2407_v21 = vpack.c.b16 %v4468_v32, %v4444_v59  ;;  %v2001_v40 = vrot.slane %v4452_v14, 5  ;;  %v3536_v14 = vrot.slane %v3520_v24, 9 }
  0xa6   : > { %v1690_v2 = vrot.slane %v1688_v19, 4  ;;  %v1693_v13 = vrot.slane %v1691_v20, 5  ;;  %v1191_v34 = vor.u32 %v1190_v30, %v1186_v18  ;;  %v1187_v61 = vsel %vm3960_vm2, %v1182_v42, %v1186_v18 }
  0xa7   : > { %v3540_v19 = vrot.slane %v3524_v33, 9  ;;  %v2032_v20 = vrot.slane %v4483_v7, 5  ;;  %v2003_v22 = vrot.slane %v2001_v40, 4  ;;  %v4528_v33 = vld [vmem:[%s3932_s19 + $0x40] sm:$0xf] }
  0xa8   : > { %2367 = vrot.lane.b32.xlu2 %v3791_v16, %s3882_s22  ;;  %v2170_v0 = vpop.permute.xlu0 %2169  ;;  %v1707_v16 = vshll.u32 %v4458_v6, 16  ;;  %v1694_v45 = vor.u32 %v1693_v13, %v1690_v2  ;;  %v1364_v37 = vrot.slane %v4528_v33, 5  ;;  %v996_v59 = vshrl.u32 %v4528_v33, 16 }
  0xa9   : > { %v4461_v55 = vsel %vm2791_vm6, %v3764_v9, %v2170_v0  ;;  %v1192_v9 = vrot.slane %v1191_v34, 4  ;;  %v1787_v0 = vshll.u32 %v3488_v56, 16  ;;  %v2030_v18 = vsel %vm4162_vm5, %v3540_v19, %v2029_v3  ;;  %v3792_v34 = vld [vmem:[%s3932_s19 + $0xa8] sm:$0xff] }
  0xaa   : > { %2357 = vrot.lane.b32.xlu0 %v3786_v29, %s3882_s22  ;;  %v1196_v29 = vrot.slane %v1194_v4, 5  ;;  %v1695_v51 = vrot.slane %v1694_v45, 4  ;;  %v1709_v57 = vrot.slane %v1707_v16, 5  ;;  %v3770_v45 = vld [vmem:[%s3932_s19 + $0x54] sm:$0xff] }
  0xab   : > { %2365 = vrot.lane.b32.xlu1 %v3790_v25, %s3882_s22  ;;  %v2472_v25 = vunpack.c.l.b16 %v1396_v11  ;;  %v2031_v11 = vrot.slane %v2029_v3, 4 }
  0xac   : > { %v1197_v4 = vsel %vm3960_vm2, %v1192_v9, %v1196_v29  ;;  %v1700_v30 = vsel %vm3960_vm2, %v1695_v51, %v1699_v46  ;;  %v3769_v9 = vld [vmem:[%s3932_s19 + $0x48] sm:$0xff] }
  0xad   : > { %v4496_v13 = vpack.c.b16 %v2472_v25, %v2471_v31  ;;  %v2033_v56 = vsel %vm4162_vm5, %v2031_v11, %v2032_v20  ;;  %v2002_v31 = vsel %vm4162_vm5, %v3536_v14, %v2001_v40  ;;  %v4513_v42 = vunpack.c.l.b16 %v1197_v4  ;;  %v3436_v4 = vld [vmem:[%s3932_s19 + $0x3c] sm:$0xe]  ;;  %v3432_v20 = vld [vmem:[%s3932_s19 + $0xc] sm:$0xe] }
  0xae   : > { %v1789_v25 = vrot.slane %v1787_v0, 5  ;;  %v2736_v58 = vunpack.c.l.b16 %v2033_v56  ;;  %v2727_v51 = vunpack.c.l.b16 %v2002_v31  ;;  %v1803_v0 = vshll.u32 %v4483_v7, 16  ;;  %v3392_v14 = vld [vmem:[%s3932_s19 + $0x3c] sm:$0xf] }
  0xaf   : > { %v3452_v7 = vrot.slane %v3436_v4, 9 }
  0xb0   : > { %v2196_v47 = vpop.permute.xlu2 %2195  ;;  %2373 = vrot.lane.b32.xlu2 %v3794_v63, %s3882_s22  ;;  %v1705_v63 = vrot.slane %v1704_v5, 4  ;;  %v2182_v2 = vpop.permute.xlu1 %2181  ;;  %v1797_v5 = vshrl.u32 %v3489_v52, 16 }
  0xb1   : > { %v4503_v39 = vsel %vm2791_vm6, %v3777_v62, %v2196_v47  ;;  %v2735_v62 = vunpack.c.l.b16 %v2030_v18  ;;  %v1786_v47 = vrot.slane %v1784_v54, 4  ;;  %v4547_v24 = vsel %vm2791_vm6, %v3770_v45, %v2182_v2 }
  0xb2   : > { %2363 = vrot.lane.b32.xlu0 %v3789_v12, %s3882_s22  ;;  %v2004_v12 = vrot.slane %v4458_v6, 5  ;;  %v1710_v16 = vsel %vm3960_vm2, %v1705_v63, %v1709_v57  ;;  %v4515_v6 = vunpack.c.l.b16 %v1700_v30  ;;  %v1793_v57 = vshll.u32 %v3489_v52, 16 }
  0xb3   : > { %2371 = vrot.lane.b32.xlu1 %v3793_v28, %s3882_s22  ;;  %v4511_v28 = vunpack.c.l.b16 %v1187_v61  ;;  %v4520_v46 = vunpack.c.l.b16 %v1710_v16  ;;  %v1790_v40 = vor.u32 %v1789_v25, %v1786_v47  ;;  %v4533_v61 = vld [vmem:[%s3932_s19 + $0x44] sm:$0x1]  ;;  %v1799_v19 = vrot.slane %v1797_v5, 4 }
  0xb4   : > { %v2005_v29 = vsel %vm4162_vm5, %v2003_v22, %v2004_v12  ;;  %v1795_v52 = vrot.slane %v1793_v57, 5  ;;  %v1366_v63 = vrot.slane %v1364_v37, 4  ;;  %v1367_v11 = vrot.slane %v4533_v61, 5  ;;  %v3773_v22 = vld [vmem:[%s3932_s19 + $0x78] sm:$0xff] }
  0xb5   : > { %v2728_v54 = vunpack.c.l.b16 %v2005_v29  ;;  %v1791_v30 = vrot.slane %v1790_v40, 4  ;;  %v2419_v36 = vpack.c.b16 %v4513_v42, %v4511_v28  ;;  %v2671_v2 = vpack.c.b16 %v4520_v46, %v4515_v6 }
  0xb6   : > { %v1800_v27 = vor.u32 %v1799_v19, %v1795_v52  ;;  %v1368_v12 = vsel %vm4162_vm5, %v1366_v63, %v1367_v11  ;;  %v4564_v56 = vpack.c.b16 %v2736_v58, %v2735_v62  ;;  %v1805_v29 = vrot.slane %v1803_v0, 5  ;;  %v4607_v19 = vld [vmem:[%s3932_s19 + $0x20] sm:$0x1]  ;;  %v3472_v63 = vld [vmem:[%s3932_s19 + $0x48] sm:$0xf] }
  0xb7   : > { %v4566_v31 = vpack.c.b16 %v2728_v54, %v2727_v51  ;;  %v983_v25 = vshrl.u32 %v3392_v14, 16  ;;  %v2464_v6 = vunpack.c.l.b16 %v1368_v12  ;;  %v1339_v62 = vrot.slane %v4365_v53, 5  ;;  %v3464_v51 = vld [vmem:[%s3932_s19 + $0x18] sm:$0xf]  ;;  %v3807_v11 = vld [vmem:[%s3932_s19 + $0xa8] sm:$0xff] }
  0xb8   : > { %2439 = vrot.lane.b32.xlu2 %v2415_v8, %s3883_s23  ;;  %v2180_v8 = vpop.permute.xlu0 %2179  ;;  %v1801_v45 = vrot.slane %v1800_v27, 4  ;;  %v992_v58 = vshll.u32 %v4528_v33, 16  ;;  %v1002_v32 = vshll.u32 %v4533_v61, 16  ;;  %v998_v61 = vrot.slane %v996_v59, 4 }
  0xb9   : > { %v2250_v3 = vpop.permute.xlu2 %2249  ;;  %v4557_v18 = vsel %vm2791_vm6, %v3769_v9, %v2180_v8  ;;  %v986_v9 = vshll.u32 %v3392_v14, 16 }
  0xba   : > { %2369 = vrot.lane.b32.xlu0 %v3792_v34, %s3882_s22  ;;  %v4543_v43 = vsel %vm2840_vm7, %v4461_v55, %v2250_v3  ;;  %v1336_v55 = vrot.slane %v4350_v38, 5  ;;  %v3448_v34 = vrot.slane %v3432_v20, 9  ;;  %v1796_v38 = vsel %vm3960_vm2, %v1791_v30, %v1795_v52 }
  0xbb   : > { %2425 = vrot.lane.b32.xlu1 %v2408_v35, %s3883_s23  ;;  %v1365_v35 = vsel %vm4162_vm5, %v3452_v7, %v1364_v37  ;;  %v988_v3 = vrot.slane %v986_v9, 5  ;;  %v4588_v54 = vunpack.c.l.b16 %v1796_v38  ;;  %v994_v40 = vrot.slane %v992_v58, 5  ;;  %v3516_v58 = vld [vmem:[%s3932_s19 + $0x48] sm:$0xe] }
  0xbc   : > { %v2463_v47 = vunpack.c.l.b16 %v1365_v35  ;;  %v1338_v46 = vrot.slane %v1336_v55, 4  ;;  %v4584_v5 = vsel %vm4162_vm5, %v3448_v34, %v1336_v55  ;;  %v1806_v4 = vsel %vm3960_vm2, %v1801_v45, %v1805_v29 }
  0xbd   : > { %v1496_v37 = vshrl.u32 %v3464_v51, 16  ;;  %v2455_v52 = vunpack.c.l.b16 %v4584_v5  ;;  %v1499_v30 = vshll.u32 %v3464_v51, 16  ;;  %v4612_v27 = vunpack.c.l.b16 %v1806_v4  ;;  %v3772_v5 = vld [vmem:[%s3932_s19 + $0x6c] sm:$0xff] }
  0xbe   : > { %v2188_v16 = vpop.permute.xlu1 %2187  ;;  %v4601_v8 = vpack.c.b16 %v2464_v6, %v2463_v47  ;;  %v1340_v33 = vsel %vm4162_vm5, %v1338_v46, %v1339_v62  ;;  %v999_v35 = vor.u32 %v998_v61, %v994_v40  ;;  %v1004_v55 = vrot.slane %v1002_v32, 5  ;;  %v4629_v62 = vld [vmem:[%s3932_s19 + $0x50] sm:$0x1] }
  0xbf   : > { %v4580_v57 = vsel %vm2791_vm6, %v3773_v22, %v2188_v16  ;;  %v1498_v20 = vrot.slane %v1496_v37, 4  ;;  %v1501_v34 = vrot.slane %v1499_v30, 5  ;;  %v1515_v38 = vshll.u32 %v4607_v19, 16  ;;  %v3803_v30 = vld [vmem:[%s3932_s19 + $0x78] sm:$0xff] }
  0xc0   : > { %2527 = vrot.lane.b32.xlu2 %v4475_v48, %s3884_s24  ;;  %v985_v48 = vrot.slane %v983_v25, 4  ;;  %v2456_v29 = vunpack.c.l.b16 %v1340_v33  ;;  %v1000_v45 = vrot.slane %v999_v35, 4  ;;  %v4620_v25 = vld [vmem:[%s3932_s19 + $0x4c] sm:$0xf]  ;;  %v1592_v9 = vshrl.u32 %v3472_v63, 16 }
  0xc1   : > { %v1502_v46 = vor.u32 %v1501_v34, %v1498_v20  ;;  %v1595_v51 = vshll.u32 %v3472_v63, 16  ;;  %v1517_v4 = vrot.slane %v1515_v38, 5 }
  0xc2   : > { %2423 = vrot.lane.b32.xlu0 %v2407_v21, %s3883_s23  ;;  %v2256_v53 = vpop.permute.xlu2 %2255  ;;  %v4593_v21 = vld [vmem:[%s3932_s19 + $0x1c] sm:$0xf]  ;;  %v1005_v28 = vsel %vm3960_vm2, %v1000_v45, %v1004_v55  ;;  %v4659_v55 = vpack.c.b16 %v2456_v29, %v2455_v52  ;;  %v1594_v29 = vrot.slane %v1592_v9, 4 }
  0xc3   : > { %2519 = vrot.lane.b32.xlu1 %v4496_v13, %s3884_s24  ;;  %v4597_v0 = vsel %vm2840_vm7, %v4361_v44, %v2256_v53  ;;  %v989_v13 = vor.u32 %v988_v3, %v985_v48  ;;  %v1505_v44 = vshll.u32 %v4593_v21, 16  ;;  %v1509_v14 = vshrl.u32 %v4593_v21, 16  ;;  %v3512_v53 = vld [vmem:[%s3932_s19 + $0x18] sm:$0xe] }
  0xc4   : > { %v2186_v22 = vpop.permute.xlu0 %2185  ;;  %v1976_v3 = vrot.slane %v4629_v62, 5  ;;  %v1503_v32 = vrot.slane %v1502_v46, 4  ;;  %v4644_v33 = vunpack.c.l.b16 %v1005_v28  ;;  %v1945_v20 = vrot.slane %v4593_v21, 5 }
  0xc5   : > { %v990_v7 = vrot.slane %v989_v13, 4  ;;  %v1507_v16 = vrot.slane %v1505_v44, 5  ;;  %v1511_v47 = vrot.slane %v1509_v14, 4  ;;  %v2675_v44 = vpack.c.b16 %v4612_v27, %v4588_v54 }
  0xc6   : > { %v4657_v35 = vsel %vm2791_vm6, %v3772_v5, %v2186_v22  ;;  %v1947_v38 = vrot.slane %v1945_v20, 4  ;;  %v1597_v45 = vrot.slane %v1595_v51, 5  ;;  %v1611_v28 = vshll.u32 %v4629_v62, 16 }
  0xc7   : > { %v995_v12 = vsel %vm3960_vm2, %v990_v7, %v994_v40  ;;  %v1512_v42 = vor.u32 %v1511_v47, %v1507_v16  ;;  %v3776_v40 = vld [vmem:[%s3932_s19 + $0x9c] sm:$0xff] }
  0xc8   : > { %2695 = vrot.lane.b32.xlu2 %v2671_v2, %s3885_s25  ;;  %v4626_v6 = vunpack.c.l.b16 %v995_v12  ;;  %v1973_v2 = vrot.slane %v4620_v25, 5 }
  0xc9   : > { %v1513_v61 = vrot.slane %v1512_v42, 4  ;;  %v3410_v42 = vld [vmem:[%s3932_s19 + $0xa8] sm:$0xf] }
  0xca   : > { %2447 = vrot.lane.b32.xlu0 %v2419_v36, %s3883_s23  ;;  %v2262_v48 = vpop.permute.xlu2 %2261  ;;  %v3532_v36 = vrot.slane %v3516_v58, 9  ;;  %v1975_v13 = vrot.slane %v1973_v2, 4  ;;  %v2411_v52 = vpack.c.b16 %v4644_v33, %v4626_v6  ;;  %v1605_v58 = vshrl.u32 %v4620_v25, 16 }
  0xcb   : > { %2623 = vrot.lane.b32.xlu1 %v3807_v11, %s3886_s26  ;;  %v4642_v59 = vsel %vm2840_vm7, %v4547_v24, %v2262_v48  ;;  %v1508_v24 = vsel %vm3960_vm2, %v1503_v32, %v1507_v16  ;;  %v3528_v11 = vrot.slane %v3512_v53, 9  ;;  %v1518_v34 = vsel %vm3960_vm2, %v1513_v61, %v1517_v4  ;;  %v4694_v53 = vld [vmem:[%s3932_s19 + $0x7c] sm:$0xf]  ;;  %v4698_v61 = vld [vmem:[%s3932_s19 + $0x80] sm:$0x1] }
  0xcc   : > { %v1974_v7 = vsel %vm4162_vm5, %v3532_v36, %v1973_v2  ;;  %v1977_v63 = vsel %vm4162_vm5, %v1975_v13, %v1976_v3  ;;  %v1948_v16 = vrot.slane %v4607_v19, 5  ;;  %v4671_v22 = vunpack.c.l.b16 %v1508_v24  ;;  %v3441_v2 = vld [vmem:[%s3932_s19 + $0x78] sm:$0xe] }
  0xcd   : > { %v2194_v37 = vpop.permute.xlu1 %2193  ;;  %v2719_v14 = vunpack.c.l.b16 %v1974_v7  ;;  %v2720_v12 = vunpack.c.l.b16 %v1977_v63  ;;  %v1946_v46 = vsel %vm4162_vm5, %v3528_v11, %v1945_v20  ;;  %v4683_v51 = vunpack.c.l.b16 %v1518_v34  ;;  %v3402_v63 = vld [vmem:[%s3932_s19 + $0x78] sm:$0xf]  ;;  %v4713_v34 = vld [vmem:[%s3932_s19 + $0xb0] sm:$0x1] }
  0xce   : > { %v4662_v21 = vsel %vm2791_vm6, %v3776_v40, %v2194_v37  ;;  %v1949_v19 = vsel %vm4162_vm5, %v1947_v38, %v1948_v16  ;;  %v1598_v48 = vor.u32 %v1597_v45, %v1594_v29  ;;  %v1607_v3 = vrot.slane %v1605_v58, 4  ;;  %v3775_v40 = vld [vmem:[%s3932_s19 + $0x90] sm:$0xff] }
  0xcf   : > { %v4685_v5 = vpack.c.b16 %v2720_v12, %v2719_v14  ;;  %v2711_v4 = vunpack.c.l.b16 %v1946_v46  ;;  %v2712_v13 = vunpack.c.l.b16 %v1949_v19  ;;  %v1399_v62 = vrot.slane %v4694_v53, 5 }
  0xd0   : > { %2783 = vrot.lane.b32.xlu2 %v4564_v56, %s3887_s27  ;;  %v1601_v56 = vshll.u32 %v4620_v25, 16  ;;  %v1599_v37 = vrot.slane %v1598_v48, 4  ;;  %v1402_v20 = vrot.slane %v4698_v61, 5  ;;  %v1199_v24 = vshrl.u32 %v3410_v42, 16 }
  0xd1   : > { %v2663_v11 = vpack.c.b16 %v4683_v51, %v4671_v22  ;;  %v1613_v14 = vrot.slane %v1611_v28, 5  ;;  %v1401_v12 = vrot.slane %v1399_v62, 4  ;;  %v1202_v38 = vshll.u32 %v3410_v42, 16 }
  0xd2   : > { %2615 = vrot.lane.b32.xlu0 %v3803_v30, %s3886_s26  ;;  %v2192_v47 = vpop.permute.xlu0 %2191  ;;  %v2268_v9 = vpop.permute.xlu2 %2267  ;;  %v1603_v25 = vrot.slane %v1601_v56, 5  ;;  %v4707_v30 = vld [vmem:[%s3932_s19 + $0xac] sm:$0xf]  ;;  %v1201_v45 = vrot.slane %v1199_v24, 4 }
  0xd3   : > { %2775 = vrot.lane.b32.xlu1 %v4566_v31, %s3887_s27  ;;  %v4691_v36 = vsel %vm2840_vm7, %v4580_v57, %v2268_v9  ;;  %v3457_v31 = vrot.slane %v3441_v2, 9  ;;  %v1403_v22 = vsel %vm4162_vm5, %v1401_v12, %v1402_v20  ;;  %v1204_v46 = vrot.slane %v1202_v38, 5  ;;  %v3799_v20 = vld [vmem:[%s3932_s19 + $0x48] sm:$0xff] }
  0xd4   : > { %v1608_v7 = vor.u32 %v1607_v3, %v1603_v25  ;;  %v1604_v16 = vsel %vm3960_vm2, %v1599_v37, %v1603_v25  ;;  %v1208_v19 = vshll.u32 %v4707_v30, 16  ;;  %v1212_v56 = vshrl.u32 %v4707_v30, 16 }
  0xd5   : > { %v2248_v32 = vpop.permute.xlu1 %2247  ;;  %v1400_v29 = vsel %vm4162_vm5, %v3457_v31, %v1399_v62  ;;  %v4726_v58 = vsel %vm2791_vm6, %v3775_v40, %v2192_v47  ;;  %v4732_v2 = vpack.c.b16 %v2712_v13, %v2711_v4  ;;  %v1103_v9 = vshrl.u32 %v3402_v63, 16  ;;  %v3445_v13 = vld [vmem:[%s3932_s19 + $0xa8] sm:$0xe] }
  0xd6   : > { %v4703_v57 = vsel %vm2840_vm7, %v4415_v41, %v2248_v32  ;;  %v1609_v41 = vrot.slane %v1608_v7, 4  ;;  %v4737_v48 = vunpack.c.l.b16 %v1604_v16  ;;  %v1205_v28 = vor.u32 %v1204_v46, %v1201_v45 }
  0xd7   : > { %v1210_v47 = vrot.slane %v1208_v19, 5  ;;  %v1214_v42 = vrot.slane %v1212_v56, 4  ;;  %v2474_v3 = vunpack.c.l.b16 %v1403_v22  ;;  %v1105_v4 = vrot.slane %v1103_v9, 4  ;;  %v3521_v9 = vld [vmem:[%s3932_s19 + $0x84] sm:$0xe] }
  0xd8   : > { %2511 = vrot.lane.b32.xlu2 %v4601_v8, %s3884_s24  ;;  %v1218_v8 = vshll.u32 %v4713_v34, 16  ;;  %v1614_v27 = vsel %vm3960_vm2, %v1609_v41, %v1613_v14  ;;  %v1106_v62 = vshll.u32 %v3402_v63, 16  ;;  %v1116_v7 = vshrl.u32 %v4694_v53, 16  ;;  %v3778_v63 = vld [vmem:[%s3932_s19 + $0xb4] sm:$0xff] }
  0xd9   : > { %v1215_v40 = vor.u32 %v1214_v42, %v1210_v47  ;;  %v4753_v24 = vunpack.c.l.b16 %v1614_v27  ;;  %v1122_v38 = vshll.u32 %v4698_v61, 16  ;;  %v1427_v22 = vrot.slane %v4707_v30, 5 }
  0xda   : > { %2703 = vrot.lane.b32.xlu0 %v2675_v44, %s3885_s25  ;;  %v2274_v51 = vpop.permute.xlu2 %2273  ;;  %v2473_v44 = vunpack.c.l.b16 %v1400_v29  ;;  %v1220_v32 = vrot.slane %v1218_v8, 5  ;;  %v1108_v16 = vrot.slane %v1106_v62, 5  ;;  %v3461_v29 = vrot.slane %v3445_v13, 9  ;;  %v3795_v13 = vld [vmem:[%s3932_s19 + $0x18] sm:$0xff] }
  0xdb   : > { %2503 = vrot.lane.b32.xlu1 %v4659_v55, %s3884_s24  ;;  %v4741_v54 = vsel %vm2840_vm7, %v4662_v21, %v2274_v51  ;;  %v1206_v55 = vrot.slane %v1205_v28, 4  ;;  %v1112_v21 = vshll.u32 %v4694_v53, 16  ;;  %v1216_v12 = vrot.slane %v1215_v40, 4  ;;  %v4800_v40 = vld [vmem:[%s3932_s19 + $0x8c] sm:$0x1] }
  0xdc   : > { %v2198_v25 = vpop.permute.xlu0 %2197  ;;  %v4760_v45 = vpack.c.b16 %v2474_v3, %v2473_v44  ;;  %v1430_v46 = vrot.slane %v4713_v34, 5  ;;  %v1109_v19 = vor.u32 %v1108_v16, %v1105_v4  ;;  %v1124_v8 = vrot.slane %v1122_v38, 5  ;;  %v4804_v4 = vld [vmem:[%s3932_s19 + $0xb8] sm:$0xf] }
  0xdd   : > { %v2254_v31 = vpop.permute.xlu1 %2253  ;;  %v1211_v14 = vsel %vm3960_vm2, %v1206_v55, %v1210_v47  ;;  %v1114_v41 = vrot.slane %v1112_v21, 5  ;;  %v1221_v53 = vsel %vm3960_vm2, %v1216_v12, %v1220_v32  ;;  %v1429_v34 = vrot.slane %v1427_v22, 4  ;;  %v3490_v32 = vld [vmem:[%s3932_s19 + $0xb4] sm:$0xf] }
  0xde   : > { %v4748_v37 = vsel %vm2840_vm7, %v4430_v50, %v2254_v31  ;;  %v1118_v50 = vrot.slane %v1116_v7, 4  ;;  %v4770_v61 = vunpack.c.l.b16 %v1211_v14  ;;  %v4777_v30 = vunpack.c.l.b16 %v1221_v53  ;;  %v4817_v7 = vld [vmem:[%s3932_s19 + $0xbc] sm:$0x1] }
  0xdf   : > { %v3537_v6 = vrot.slane %v3521_v9, 9  ;;  %v1110_v47 = vrot.slane %v1109_v19, 4  ;;  %v4786_v27 = vsel %vm4162_vm5, %v3461_v29, %v1427_v22  ;;  %v4789_v44 = vsel %vm2791_vm6, %v3778_v63, %v2198_v25  ;;  %v3482_v29 = vld [vmem:[%s3932_s19 + $0x84] sm:$0xf] }
  0xe0   : > { %2679 = vrot.lane.b32.xlu2 %v2663_v11, %s3885_s25  ;;  %v1119_v56 = vor.u32 %v1118_v50, %v1114_v41  ;;  %v4773_v11 = vld [vmem:[%s3932_s19 + $0x88] sm:$0xf]  ;;  %v2667_v55 = vpack.c.b16 %v4753_v24, %v4737_v48  ;;  %v2011_v21 = vrot.slane %v4800_v40, 5  ;;  %v2481_v14 = vunpack.c.l.b16 %v4786_v27  ;;  %v3433_v27 = vld [vmem:[%s3932_s19 + $0x18] sm:$0xe] }
  0xe1   : > { %v2008_v33 = vrot.slane %v4773_v11, 5  ;;  %v1808_v16 = vshrl.u32 %v3490_v32, 16  ;;  %v1817_v50 = vshll.u32 %v4804_v4, 16  ;;  %v1821_v22 = vshrl.u32 %v4804_v4, 16 }
  0xe2   : > { %2431 = vrot.lane.b32.xlu0 %v2411_v52, %s3883_s23  ;;  %v2344_v51 = vpop.permute.xlu2 %2343  ;;  %v1120_v42 = vrot.slane %v1119_v56, 4 }
  0xe3   : > { %2607 = vrot.lane.b32.xlu1 %v3799_v20, %s3886_s26  ;;  %v4782_v28 = vsel %vm2873_vm8, %v4703_v57, %v2344_v51  ;;  %v1431_v57 = vsel %vm4162_vm5, %v1429_v34, %v1430_v46  ;;  %v2420_v20 = vpack.c.b16 %v4777_v30, %v4770_v61  ;;  %v4824_v12 = vsel %vm4162_vm5, %v3537_v6, %v2008_v33 }
  0xe4   : > { %v2252_v52 = vpop.permute.xlu0 %2251  ;;  %v1125_v62 = vsel %vm3960_vm2, %v1120_v42, %v1124_v8  ;;  %v2482_v38 = vunpack.c.l.b16 %v1431_v57  ;;  %v1827_v46 = vshll.u32 %v4817_v7, 16  ;;  %v2729_v61 = vunpack.c.l.b16 %v4824_v12 }
  0xe5   : > { %v4793_v3 = vsel %vm2840_vm7, %v4387_v17, %v2252_v52  ;;  %v2260_v31 = vpop.permute.xlu1 %2259  ;;  %v1115_v17 = vsel %vm3960_vm2, %v1110_v47, %v1114_v41  ;;  %v1811_v41 = vshll.u32 %v3490_v32, 16  ;;  %v4832_v53 = vunpack.c.l.b16 %v1125_v62 }
  0xe6   : > { %v4809_v25 = vsel %vm2840_vm7, %v4557_v18, %v2260_v31  ;;  %v2010_v18 = vrot.slane %v2008_v33, 4  ;;  %v4830_v63 = vunpack.c.l.b16 %v1115_v17  ;;  %v1810_v19 = vrot.slane %v1808_v16, 4 }
  0xe7   : > { %v1813_v56 = vrot.slane %v1811_v41, 5  ;;  %v1819_v8 = vrot.slane %v1817_v50, 5  ;;  %v1823_v51 = vrot.slane %v1821_v22, 4  ;;  %v1712_v30 = vshrl.u32 %v3482_v29, 16 }
  0xe8   : > { %2767 = vrot.lane.b32.xlu2 %v4685_v5, %s3887_s27  ;;  %v2012_v9 = vsel %vm4162_vm5, %v2010_v18, %v2011_v21  ;;  %v1715_v34 = vshll.u32 %v3482_v29, 16  ;;  %v1829_v47 = vrot.slane %v1827_v46, 5  ;;  %v1721_v42 = vshll.u32 %v4773_v11, 16  ;;  %v3394_v46 = vld [vmem:[%s3932_s19 + $0x48] sm:$0xf] }
  0xe9   : > { %v1814_v52 = vor.u32 %v1813_v56, %v1810_v19  ;;  %v1824_v57 = vor.u32 %v1823_v51, %v1819_v8  ;;  %v1714_v32 = vrot.slane %v1712_v30, 4  ;;  %v1725_v21 = vshrl.u32 %v4773_v11, 16  ;;  %v4890_v51 = vld [vmem:[%s3932_s19 + $0x50] sm:$0x1] }
  0xea   : > { %2599 = vrot.lane.b32.xlu0 %v3795_v13, %s3886_s26  ;;  %v2350_v5 = vpop.permute.xlu2 %2349  ;;  %v1717_v13 = vrot.slane %v1715_v34, 5  ;;  %v1723_v62 = vrot.slane %v1721_v42, 5  ;;  %v2730_v12 = vunpack.c.l.b16 %v2012_v9  ;;  %v3449_v41 = vrot.slane %v3433_v27, 9  ;;  %v3525_v42 = vld [vmem:[%s3932_s19 + $0xb4] sm:$0xe] }
  0xeb   : > { %2759 = vrot.lane.b32.xlu1 %v4732_v2, %s3887_s27  ;;  %v4844_v33 = vsel %vm2873_vm8, %v4748_v37, %v2350_v5  ;;  %v1815_v37 = vrot.slane %v1814_v52, 4  ;;  %v1825_v18 = vrot.slane %v1824_v57, 4  ;;  %v1727_v50 = vrot.slane %v1725_v21, 4  ;;  %v3437_v21 = vld [vmem:[%s3932_s19 + $0x48] sm:$0xe] }
  0xec   : > { %v2258_v6 = vpop.permute.xlu0 %2257  ;;  %v1718_v16 = vor.u32 %v1717_v13, %v1714_v32  ;;  %v1731_v29 = vshll.u32 %v4800_v40, 16  ;;  %v1343_v22 = vrot.slane %v4330_v23, 5  ;;  %v4866_v11 = vpack.c.b16 %v2482_v38, %v2481_v14 }
  0xed   : > { %v4850_v2 = vsel %vm2840_vm7, %v4375_v10, %v2258_v6  ;;  %v2266_v31 = vpop.permute.xlu1 %2265  ;;  %v1820_v10 = vsel %vm3960_vm2, %v1815_v37, %v1819_v8  ;;  %v1830_v19 = vsel %vm3960_vm2, %v1825_v18, %v1829_v47  ;;  %v1728_v40 = vor.u32 %v1727_v50, %v1723_v62  ;;  %v3808_v6 = vld [vmem:[%s3932_s19 + $0xb4] sm:$0xff] }
  0xee   : > { %v4854_v17 = vsel %vm2840_vm7, %v4657_v35, %v2266_v31  ;;  %v2416_v35 = vpack.c.b16 %v4832_v53, %v4830_v63  ;;  %v1719_v56 = vrot.slane %v1718_v16, 4  ;;  %v4874_v23 = vunpack.c.l.b16 %v1820_v10  ;;  %v3395_v53 = vld [vmem:[%s3932_s19 + $0x4c] sm:$0xf] }
  0xef   : > { %v1345_v8 = vrot.slane %v1343_v22, 4  ;;  %v4878_v38 = vunpack.c.l.b16 %v1830_v19  ;;  %v1344_v63 = vsel %vm4162_vm5, %v3449_v41, %v1343_v22  ;;  %v1007_v48 = vshrl.u32 %v3394_v46, 16 }
  0xf0   : > { %2521 = vrot.lane.b32.xlu2 %v4760_v45, %s3884_s24  ;;  %v1346_v45 = vrot.slane %v4343_v1, 5  ;;  %v1010_v24 = vshll.u32 %v3394_v46, 16  ;;  %v4887_v1 = vpack.c.b16 %v2730_v12, %v2729_v61  ;;  %v1729_v9 = vrot.slane %v1728_v40, 4 }
  0xf1   : > { %v1724_v52 = vsel %vm3960_vm2, %v1719_v56, %v1723_v62  ;;  %v1009_v47 = vrot.slane %v1007_v48, 4  ;;  %v2457_v31 = vunpack.c.l.b16 %v1344_v63  ;;  %v1016_v57 = vshll.u32 %v3395_v53, 16  ;;  %v3513_v63 = vld [vmem:[%s3932_s19 + $0x24] sm:$0xe] }
  0xf2   : > { %2687 = vrot.lane.b32.xlu0 %v2667_v55, %s3885_s25  ;;  %v2356_v14 = vpop.permute.xlu2 %2355  ;;  %v1347_v27 = vsel %vm4162_vm5, %v1345_v8, %v1346_v45  ;;  %v2676_v32 = vpack.c.b16 %v4878_v38, %v4874_v23  ;;  %v1020_v37 = vshrl.u32 %v3395_v53, 16  ;;  %v1026_v62 = vshll.u32 %v4890_v51, 16 }
  0xf3   : > { %2449 = vrot.lane.b32.xlu1 %v2420_v20, %s3883_s23  ;;  %v4885_v5 = vsel %vm2873_vm8, %v4809_v25, %v2356_v14  ;;  %v1733_v20 = vrot.slane %v1731_v29, 5  ;;  %v1012_v25 = vrot.slane %v1010_v24, 5  ;;  %v1018_v18 = vrot.slane %v1016_v57, 5 }
  0xf4   : > { %v2264_v55 = vpop.permute.xlu0 %2263  ;;  %v2036_v16 = vrot.slane %v4804_v4, 5  ;;  %v4915_v41 = vunpack.c.l.b16 %v1724_v52  ;;  %v2458_v10 = vunpack.c.l.b16 %v1347_v27  ;;  %v1022_v29 = vrot.slane %v1020_v37, 4  ;;  %v3474_v52 = vld [vmem:[%s3932_s19 + $0x54] sm:$0xf] }
  0xf5   : > { %v4894_v30 = vsel %vm2840_vm7, %v4384_v15, %v2264_v55  ;;  %v2272_v34 = vpop.permute.xlu1 %2271  ;;  %v3804_v15 = vld [vmem:[%s3932_s19 + $0x84] sm:$0xff]  ;;  %v1013_v13 = vor.u32 %v1012_v25, %v1009_v47  ;;  %v1734_v12 = vsel %vm3960_vm2, %v1729_v9, %v1733_v20  ;;  %v2039_v19 = vrot.slane %v4817_v7, 5 }
  0xf6   : > { %v4902_v61 = vsel %vm2840_vm7, %v4726_v58, %v2272_v34  ;;  %v3541_v58 = vrot.slane %v3525_v42, 9  ;;  %v2038_v46 = vrot.slane %v2036_v16, 4  ;;  %v3453_v56 = vrot.slane %v3437_v21, 9 }
  0xf7   : > { %v1014_v50 = vrot.slane %v1013_v13, 4  ;;  %v4922_v40 = vunpack.c.l.b16 %v1734_v12  ;;  %v1023_v8 = vor.u32 %v1022_v29, %v1018_v18  ;;  %v1028_v45 = vrot.slane %v1026_v62, 5 }
  0xf8   : > { %2625 = vrot.lane.b32.xlu2 %v3808_v6, %s3886_s26  ;;  %v2037_v22 = vsel %vm4162_vm5, %v3541_v58, %v2036_v16  ;;  %v1371_v14 = vrot.slane %v3395_v53, 5  ;;  %v2040_v24 = vsel %vm4162_vm5, %v2038_v46, %v2039_v19  ;;  %v1374_v55 = vrot.slane %v4890_v51, 5  ;;  %v3467_v51 = vld [vmem:[%s3932_s19 + $0x28] sm:$0xf]  ;;  %v4968_v16 = vld [vmem:[%s3932_s19 + $0x5c] sm:$0x1] }
  0xf9   : > { %v1019_v7 = vsel %vm3960_vm2, %v1014_v50, %v1018_v18  ;;  %v2488_v20 = vpack.c.b16 %v2458_v10, %v2457_v31  ;;  %v1024_v34 = vrot.slane %v1023_v8, 4  ;;  %v2737_v6 = vunpack.c.l.b16 %v2037_v22  ;;  %v3497_v18 = vld [vmem:[%s3932_s19 + $0x2c] sm:$0x1]  ;;  %v3466_v46 = vld [vmem:[%s3932_s19 + $0x24] sm:$0xf] }
  0xfa   : > { %2441 = vrot.lane.b32.xlu0 %v2416_v35, %s3883_s23  ;;  %v2362_v4 = vpop.permute.xlu2 %2361  ;;  %v4945_v47 = vsel %vm4162_vm5, %v3453_v56, %v1371_v14  ;;  %v1373_v25 = vrot.slane %v1371_v14, 4  ;;  %v3529_v42 = vrot.slane %v3513_v63, 9  ;;  %v2385_v31 = vunpack.c.l.b16 %v1019_v7 }
  0xfb   : > { %2617 = vrot.lane.b32.xlu1 %v3804_v15, %s3886_s26  ;;  %v4927_v35 = vsel %vm2873_vm8, %v4854_v17, %v2362_v4  ;;  %v1029_v27 = vsel %vm3960_vm2, %v1024_v34, %v1028_v45  ;;  %v2738_v57 = vunpack.c.l.b16 %v2040_v24  ;;  %v1952_v15 = vrot.slane %v3467_v51, 5  ;;  %v3412_v24 = vld [vmem:[%s3932_s19 + $0xb4] sm:$0xf] }
  0xfc   : > { %v2270_v48 = vpop.permute.xlu0 %2269  ;;  %v2386_v13 = vunpack.c.l.b16 %v1029_v27  ;;  %v1616_v37 = vshrl.u32 %v3474_v52, 16  ;;  %v1619_v62 = vshll.u32 %v3474_v52, 16  ;;  %v2672_v21 = vpack.c.b16 %v4922_v40, %v4915_v41 }
  0xfd   : > { %v4936_v9 = vsel %vm2840_vm7, %v4427_v49, %v2270_v48  ;;  %v2278_v53 = vpop.permute.xlu1 %2277  ;;  %v4949_v49 = vld [vmem:[%s3932_s19 + $0x58] sm:$0xf]  ;;  %v2465_v12 = vunpack.c.l.b16 %v4945_v47  ;;  %v4965_v58 = vsel %vm4162_vm5, %v3529_v42, %v1952_v15  ;;  %v1954_v50 = vrot.slane %v1952_v15, 4 }
  0xfe   : > { %v4941_v17 = vsel %vm2840_vm7, %v4789_v44, %v2278_v53  ;;  %v4955_v44 = vsel %vm4162_vm5, %v1373_v25, %v1374_v55  ;;  %v1625_v10 = vshll.u32 %v4949_v49, 16  ;;  %v1955_v29 = vrot.slane %v3497_v18, 5  ;;  %v5002_v15 = vld [vmem:[%s3932_s19 + $0xb8] sm:$0xf] }
  0xff   : > { %v1621_v22 = vrot.slane %v1619_v62, 5  ;;  %v4980_v19 = vpack.c.b16 %v2738_v57, %v2737_v6  ;;  %v2466_v56 = vunpack.c.l.b16 %v4955_v44  ;;  %v2412_v8 = vpack.c.b16 %v2386_v13, %v2385_v31 }
 0x100   : > { %2777 = vrot.lane.b32.xlu2 %v4887_v1, %s3887_s27  ;;  %v1618_v1 = vrot.slane %v1616_v37, 4  ;;  %v1627_v4 = vrot.slane %v1625_v10, 5  ;;  %v2713_v45 = vunpack.c.l.b16 %v4965_v58  ;;  %v1635_v63 = vshll.u32 %v4968_v16, 16 }
 0x101   : > { %v1520_v48 = vshrl.u32 %v3466_v46, 16  ;;  %v1523_v7 = vshll.u32 %v3466_v46, 16  ;;  %v4997_v53 = vsel %vm4162_vm5, %v1954_v50, %v1955_v29  ;;  %v1529_v42 = vshll.u32 %v3467_v51, 16 }
 0x102   : > { %2529 = vrot.lane.b32.xlu0 %v4866_v11, %s3884_s24  ;;  %v4978_v41 = vpop.permute.xlu2 %2367  ;;  %v1629_v11 = vshrl.u32 %v4949_v49, 16  ;;  %v1622_v14 = vor.u32 %v1621_v22, %v1618_v1  ;;  %v1637_v6 = vrot.slane %v1635_v63, 5  ;;  %v1533_v31 = vshrl.u32 %v3467_v51, 16  ;;  %v5019_v63 = vld [vmem:[%s3932_s19 + $0xbc] sm:$0x1] }
 0x103   : > { %2705 = vrot.lane.b32.xlu1 %v2676_v32, %s3885_s25  ;;  %v1522_v25 = vrot.slane %v1520_v48, 4  ;;  %v1539_v57 = vshll.u32 %v3497_v18, 16  ;;  %v1223_v13 = vshrl.u32 %v3412_v24, 16  ;;  %v1531_v10 = vrot.slane %v1529_v42, 5 }
 0x104   : > { %v2276_v40 = vpop.permute.xlu0 %2275  ;;  %v1631_v32 = vrot.slane %v1629_v11, 4  ;;  %v1623_v34 = vrot.slane %v1622_v14, 4  ;;  %v1535_v29 = vrot.slane %v1533_v31, 4  ;;  %v1226_v51 = vshll.u32 %v3412_v24, 16 }
 0x105   : > { %v4988_v23 = vsel %vm2840_vm7, %v4503_v39, %v2276_v40  ;;  %v2348_v38 = vpop.permute.xlu1 %2347  ;;  %v1525_v39 = vrot.slane %v1523_v7, 5  ;;  %v1225_v1 = vrot.slane %v1223_v13, 4  ;;  %v1232_v46 = vshll.u32 %v5002_v15, 16  ;;  %v3800_v7 = vld [vmem:[%s3932_s19 + $0x54] sm:$0xff] }
 0x106   : > { %v4993_v55 = vsel %vm2873_vm8, %v4793_v3, %v2348_v38  ;;  %v1632_v52 = vor.u32 %v1631_v32, %v1627_v4  ;;  %v1628_v27 = vsel %vm3960_vm2, %v1623_v34, %v1627_v4  ;;  %v2714_v3 = vunpack.c.l.b16 %v4997_v53  ;;  %v3404_v38 = vld [vmem:[%s3932_s19 + $0x84] sm:$0xf]  ;;  %v5030_v34 = vld [vmem:[%s3932_s19 + $0x88] sm:$0xf] }
 0x107   : > { %v1526_v62 = vor.u32 %v1525_v39, %v1522_v25  ;;  %v5007_v50 = vunpack.c.l.b16 %v1628_v27  ;;  %v1236_v4 = vshrl.u32 %v5002_v15, 16  ;;  %v1536_v40 = vor.u32 %v1535_v29, %v1531_v10 }
 0x108   : > { %2505 = vrot.lane.b32.xlu2 %v2488_v20, %s3884_s24  ;;  %v1633_v37 = vrot.slane %v1632_v52, 4  ;;  %v1541_v14 = vrot.slane %v1539_v57, 5  ;;  %v1234_v53 = vrot.slane %v1232_v46, 5  ;;  %v1242_v31 = vshll.u32 %v5019_v63, 16 }
 0x109   : > { %v1527_v22 = vrot.slane %v1526_v62, 4  ;;  %v1537_v25 = vrot.slane %v1536_v40, 4  ;;  %v1127_v57 = vshrl.u32 %v3404_v38, 16  ;;  %v1130_v62 = vshll.u32 %v3404_v38, 16 }
 0x10a   : > { %2697 = vrot.lane.b32.xlu0 %v2672_v21, %s3885_s25  ;;  %v2374_v18 = vpop.permute.xlu2 %2373  ;;  %v1638_v20 = vsel %vm3960_vm2, %v1633_v37, %v1637_v6  ;;  %v5045_v37 = vld [vmem:[%s3932_s19 + $0x8c] sm:$0x1]  ;;  %v2492_v40 = vpack.c.b16 %v2466_v56, %v2465_v12  ;;  %v3446_v12 = vld [vmem:[%s3932_s19 + $0xb4] sm:$0xe] }
 0x10b   : > { %2433 = vrot.lane.b32.xlu1 %v2412_v8, %s3883_s23  ;;  %v5016_v11 = vsel %vm2873_vm8, %v4941_v17, %v2374_v18  ;;  %v1228_v8 = vrot.slane %v1226_v51, 5  ;;  %v1532_v24 = vsel %vm3960_vm2, %v1527_v22, %v1531_v10  ;;  %v1238_v17 = vrot.slane %v1236_v4, 4 }
 0x10c   : > { %v2346_v21 = vpop.permute.xlu0 %2345  ;;  %v5036_v52 = vunpack.c.l.b16 %v1638_v20  ;;  %v5038_v39 = vunpack.c.l.b16 %v1532_v24  ;;  %v1542_v13 = vsel %vm3960_vm2, %v1537_v25, %v1541_v14  ;;  %v1140_v10 = vshrl.u32 %v5030_v34, 16 }
 0x10d   : > { %v5024_v32 = vsel %vm2873_vm8, %v4543_v43, %v2346_v21  ;;  %v2354_v48 = vpop.permute.xlu1 %2353  ;;  %v3796_v43 = vld [vmem:[%s3932_s19 + $0x24] sm:$0xff]  ;;  %v1229_v42 = vor.u32 %v1228_v8, %v1225_v1  ;;  %v1239_v27 = vor.u32 %v1238_v17, %v1234_v53  ;;  %v5050_v29 = vunpack.c.l.b16 %v1542_v13  ;;  %v3517_v21 = vld [vmem:[%s3932_s19 + $0x54] sm:$0xe] }
 0x10e   : > { %v5034_v6 = vsel %vm2873_vm8, %v4850_v2, %v2354_v48  ;;  %v1136_v2 = vshll.u32 %v5030_v34, 16  ;;  %v1244_v18 = vrot.slane %v1242_v31, 5  ;;  %v1129_v20 = vrot.slane %v1127_v57, 4  ;;  %v3442_v57 = vld [vmem:[%s3932_s19 + $0x84] sm:$0xe] }
 0x10f   : > { %v1230_v1 = vrot.slane %v1229_v42, 4  ;;  %v1240_v51 = vrot.slane %v1239_v27, 4  ;;  %v1132_v22 = vrot.slane %v1130_v62, 5  ;;  %v1142_v4 = vrot.slane %v1140_v10, 4 }
 0x110   : > { %2609 = vrot.lane.b32.xlu2 %v3800_v7, %s3886_s26  ;;  %v1138_v46 = vrot.slane %v1136_v2, 5  ;;  %v2744_v8 = vpack.c.b16 %v2714_v3, %v2713_v45  ;;  %v1146_v38 = vshll.u32 %v5045_v37, 16  ;;  %v2668_v7 = vpack.c.b16 %v5036_v52, %v5007_v50 }
 0x111   : > { %v1245_v47 = vsel %vm3960_vm2, %v1240_v51, %v1244_v18  ;;  %v1133_v24 = vor.u32 %v1132_v22, %v1129_v20  ;;  %v3533_v3 = vrot.slane %v3517_v21, 9  ;;  %v2664_v17 = vpack.c.b16 %v5050_v29, %v5038_v39  ;;  %v3492_v29 = vld [vmem:[%s3932_s19 + $0xc0] sm:$0xf] }
 0x112   : > { %2785 = vrot.lane.b32.xlu0 %v4980_v19, %s3887_s27  ;;  %v5060_v14 = vpop.permute.xlu2 %2439  ;;  %v1235_v19 = vsel %vm3960_vm2, %v1230_v1, %v1234_v53  ;;  %v1143_v44 = vor.u32 %v1142_v4, %v1138_v46  ;;  %v1148_v45 = vrot.slane %v1146_v38, 5  ;;  %v1980_v53 = vrot.slane %v4949_v49, 5 }
 0x113   : > { %2601 = vrot.lane.b32.xlu1 %v3796_v43, %s3886_s26  ;;  %v2403_v50 = vunpack.c.l.b16 %v1235_v19  ;;  %v1134_v52 = vrot.slane %v1133_v24, 4  ;;  %v2404_v43 = vunpack.c.l.b16 %v1245_v47  ;;  %v1983_v27 = vrot.slane %v4968_v16, 5  ;;  %v5108_v19 = vld [vmem:[%s3932_s19 + $0xc4] sm:$0xf]  ;;  %v5117_v24 = vld [vmem:[%s3932_s19 + $0xc8] sm:$0x1] }
 0x114   : > { %v2352_v48 = vpop.permute.xlu0 %2351  ;;  %v1144_v25 = vrot.slane %v1143_v44, 4  ;;  %v1982_v42 = vrot.slane %v1980_v53, 4  ;;  %v3462_v31 = vrot.slane %v3446_v12, 9  ;;  %v1981_v49 = vsel %vm4162_vm5, %v3533_v3, %v1980_v53  ;;  %v3484_v44 = vld [vmem:[%s3932_s19 + $0x90] sm:$0xf] }
 0x115   : > { %v5074_v58 = vsel %vm2873_vm8, %v4597_v0, %v2352_v48  ;;  %v2360_v56 = vpop.permute.xlu1 %2359  ;;  %v1139_v0 = vsel %vm3960_vm2, %v1134_v52, %v1138_v46  ;;  %v1434_v39 = vrot.slane %v5002_v15, 5  ;;  %v1437_v10 = vrot.slane %v5019_v63, 5  ;;  %v5125_v53 = vld [vmem:[%s3932_s19 + $0x94] sm:$0xf] }
 0x116   : > { %v1149_v13 = vsel %vm3960_vm2, %v1144_v25, %v1148_v45  ;;  %v2395_v62 = vunpack.c.l.b16 %v1139_v0  ;;  %v1984_v16 = vsel %vm4162_vm5, %v1982_v42, %v1983_v27  ;;  %v5096_v1 = vsel %vm2873_vm8, %v4894_v30, %v2360_v56  ;;  %v5134_v0 = vld [vmem:[%s3932_s19 + $0x98] sm:$0x1] }
 0x117   : > { %v2396_v2 = vunpack.c.l.b16 %v1149_v13  ;;  %v1435_v15 = vsel %vm4162_vm5, %v3462_v31, %v1434_v39  ;;  %v1436_v51 = vrot.slane %v1434_v39, 4  ;;  %v3458_v18 = vrot.slane %v3442_v57, 9 }
 0x118   : > { %2761 = vrot.lane.b32.xlu2 %v2744_v8, %s3887_s27  ;;  %v2421_v22 = vpack.c.b16 %v2404_v43, %v2403_v50  ;;  %v2721_v63 = vunpack.c.l.b16 %v1981_v49  ;;  %v1406_v46 = vrot.slane %v5030_v34, 5  ;;  %v1409_v4 = vrot.slane %v5045_v37, 5 }
 0x119   : > { %v2417_v30 = vpack.c.b16 %v2396_v2, %v2395_v62  ;;  %v1438_v8 = vsel %vm4162_vm5, %v1436_v51, %v1437_v10  ;;  %v1832_v38 = vshrl.u32 %v3492_v29, 16  ;;  %v2483_v47 = vunpack.c.l.b16 %v1435_v15 }
 0x11a   : > { %2513 = vrot.lane.b32.xlu0 %v2492_v40, %s3884_s24  ;;  %v5101_v20 = vpop.permute.xlu2 %2527  ;;  %v2722_v40 = vunpack.c.l.b16 %v1984_v16  ;;  %v1407_v34 = vsel %vm4162_vm5, %v3458_v18, %v1406_v46  ;;  %v1408_v37 = vrot.slane %v1406_v46, 4  ;;  %v2484_v56 = vunpack.c.l.b16 %v1438_v8  ;;  %v3805_v8 = vld [vmem:[%s3932_s19 + $0x90] sm:$0xff] }
 0x11b   : > { %2689 = vrot.lane.b32.xlu1 %v2668_v7, %s3885_s25  ;;  %v1834_v45 = vrot.slane %v1832_v38, 4  ;;  %v1835_v3 = vshll.u32 %v3492_v29, 16  ;;  %v2475_v50 = vunpack.c.l.b16 %v1407_v34  ;;  %v1841_v52 = vshll.u32 %v5108_v19, 16 }
 0x11c   : > { %v2358_v21 = vpop.permute.xlu0 %2357  ;;  %v1845_v25 = vshrl.u32 %v5108_v19, 16  ;;  %v1851_v27 = vshll.u32 %v5117_v24, 16  ;;  %v1739_v13 = vshll.u32 %v3484_v44, 16  ;;  %v1745_v49 = vshll.u32 %v5125_v53, 16 }
 0x11d   : > { %v5112_v48 = vsel %vm2873_vm8, %v4642_v59, %v2358_v21  ;;  %v2366_v7 = vpop.permute.xlu1 %2365  ;;  %v1410_v59 = vsel %vm4162_vm5, %v1408_v37, %v1409_v4  ;;  %v1837_v42 = vrot.slane %v1835_v3, 5  ;;  %v1843_v31 = vrot.slane %v1841_v52, 5  ;;  %v5152_v37 = vld [vmem:[%s3932_s19 + $0x28] sm:$0xf] }
 0x11e   : > { %v5122_v12 = vsel %vm2873_vm8, %v4936_v9, %v2366_v7  ;;  %v2476_v43 = vunpack.c.l.b16 %v1410_v59  ;;  %v1736_v9 = vshrl.u32 %v3484_v44, 16  ;;  %v1847_v57 = vrot.slane %v1845_v25, 4 }
 0x11f   : > { %v2748_v39 = vpack.c.b16 %v2722_v40, %v2721_v63  ;;  %v1838_v62 = vor.u32 %v1837_v42, %v1834_v45  ;;  %v1853_v2 = vrot.slane %v1851_v27, 5  ;;  %v1741_v15 = vrot.slane %v1739_v13, 5  ;;  %v5161_v45 = vld [vmem:[%s3932_s19 + $0x2c] sm:$0x1]  ;;  %v3526_v27 = vld [vmem:[%s3932_s19 + $0xc0] sm:$0xe] }
 0x120   : > { %2451 = vrot.lane.b32.xlu2 %v2421_v22, %s3883_s23  ;;  %v1738_v16 = vrot.slane %v1736_v9, 4  ;;  %v1848_v29 = vor.u32 %v1847_v57, %v1843_v31  ;;  %v1747_v51 = vrot.slane %v1745_v49, 5  ;;  %v1749_v18 = vshrl.u32 %v5125_v53, 16  ;;  %v3388_v22 = vld [vmem:[%s3932_s19 + $0x24] sm:$0xf] }
 0x121   : > { %v2501_v4 = vpack.c.b16 %v2484_v56, %v2483_v47  ;;  %v1839_v63 = vrot.slane %v1838_v62, 4  ;;  %v1755_v21 = vshll.u32 %v5134_v0, 16  ;;  %v938_v42 = vshll.u32 %v3388_v22, 16 }
 0x122   : > { %2681 = vrot.lane.b32.xlu0 %v2664_v17, %s3885_s25  ;;  %v5139_v10 = vpop.permute.xlu2 %2695  ;;  %v5143_v17 = vpack.c.b16 %v2476_v43, %v2475_v50  ;;  %v1849_v38 = vrot.slane %v1848_v29, 4  ;;  %v1742_v7 = vor.u32 %v1741_v15, %v1738_v16  ;;  %v1751_v34 = vrot.slane %v1749_v18, 4  ;;  %v3522_v29 = vld [vmem:[%s3932_s19 + $0x90] sm:$0xe] }
 0x123   : > { %2443 = vrot.lane.b32.xlu1 %v2417_v30, %s3883_s23  ;;  %v1844_v44 = vsel %vm3960_vm2, %v1839_v63, %v1843_v31  ;;  %v1757_v56 = vrot.slane %v1755_v21, 5  ;;  %v948_v57 = vshrl.u32 %v5152_v37, 16  ;;  %v954_v13 = vshll.u32 %v5161_v45, 16 }
 0x124   : > { %v2364_v46 = vpop.permute.xlu0 %2363  ;;  %v1854_v3 = vsel %vm3960_vm2, %v1849_v38, %v1853_v2  ;;  %v2659_v59 = vunpack.c.l.b16 %v1844_v44  ;;  %v1743_v50 = vrot.slane %v1742_v7, 4  ;;  %v1752_v52 = vor.u32 %v1751_v34, %v1747_v51 }
 0x125   : > { %v5148_v30 = vsel %vm2873_vm8, %v4691_v36, %v2364_v46  ;;  %v2372_v40 = vpop.permute.xlu1 %2371  ;;  %v935_v36 = vshrl.u32 %v3388_v22, 16  ;;  %v2660_v25 = vunpack.c.l.b16 %v1854_v3  ;;  %v940_v2 = vrot.slane %v938_v42, 5  ;;  %v3438_v42 = vld [vmem:[%s3932_s19 + $0x54] sm:$0xe] }
 0x126   : > { %v5156_v47 = vsel %vm2873_vm8, %v4988_v23, %v2372_v40  ;;  %v944_v23 = vshll.u32 %v5152_v37, 16  ;;  %v1748_v9 = vsel %vm3960_vm2, %v1743_v50, %v1747_v51  ;;  %v1753_v31 = vrot.slane %v1752_v52, 4 }
 0x127   : > { %v937_v43 = vrot.slane %v935_v36, 4  ;;  %v2677_v49 = vpack.c.b16 %v2660_v25, %v2659_v59  ;;  %v2651_v62 = vunpack.c.l.b16 %v1748_v9  ;;  %v950_v51 = vrot.slane %v948_v57, 4 }
 0x128   : > { %2619 = vrot.lane.b32.xlu2 %v3805_v8, %s3886_s26  ;;  %v946_v16 = vrot.slane %v944_v23, 5  ;;  %v1758_v18 = vsel %vm3960_vm2, %v1753_v31, %v1757_v56  ;;  %v956_v22 = vrot.slane %v954_v13, 5  ;;  %v3542_v46 = vrot.slane %v3526_v27, 9 }
 0x129   : > { %v2652_v21 = vunpack.c.l.b16 %v1758_v18  ;;  %v941_v40 = vor.u32 %v940_v2, %v937_v43  ;;  %v2046_v8 = vrot.slane %v5117_v24, 5  ;;  %v3538_v34 = vrot.slane %v3522_v29, 9  ;;  %v3397_v29 = vld [vmem:[%s3932_s19 + $0x58] sm:$0xf]  ;;  %v3422_v18 = vld [vmem:[%s3932_s19 + $0x5c] sm:$0x1] }
 0x12a   : > { %2769 = vrot.lane.b32.xlu0 %v2748_v39, %s3887_s27  ;;  %v5175_v15 = vpop.permute.xlu2 %2783  ;;  %v2043_v39 = vrot.slane %v5108_v19, 5  ;;  %v951_v7 = vor.u32 %v950_v51, %v946_v16  ;;  %v2015_v44 = vrot.slane %v5125_v53, 5  ;;  %v2018_v25 = vrot.slane %v5134_v0, 5 }
 0x12b   : > { %2531 = vrot.lane.b32.xlu1 %v2501_v4, %s3884_s24  ;;  %v2673_v36 = vpack.c.b16 %v2652_v21, %v2651_v62  ;;  %v942_v3 = vrot.slane %v941_v40, 4  ;;  %v5214_v62 = vsel %vm2873_vm8, %v4902_v61, %v4978_v41  ;;  %v3454_v51 = vrot.slane %v3438_v42, 9  ;;  %v3396_v41 = vld [vmem:[%s3932_s19 + $0x54] sm:$0xf] }
 0x12c   : > { %v2370_v63 = vpop.permute.xlu0 %2369  ;;  %v2044_v19 = vsel %vm4162_vm5, %v3542_v46, %v2043_v39  ;;  %v952_v24 = vrot.slane %v951_v7, 4  ;;  %v2045_v59 = vrot.slane %v2043_v39, 4  ;;  %v2016_v52 = vsel %vm4162_vm5, %v3538_v34, %v2015_v44  ;;  %v3809_v7 = vld [vmem:[%s3932_s19 + $0xc0] sm:$0xff] }
 0x12d   : > { %v5183_v38 = vsel %vm2873_vm8, %v4741_v54, %v2370_v63  ;;  %v2426_v4 = vpop.permute.xlu1 %2425  ;;  %v3075_v54 = vld [vmem:[%s5748_s1 + $0x10] sm:$0x3]  ;;  %v2739_v50 = vunpack.c.l.b16 %v2044_v19  ;;  %v2017_v53 = vrot.slane %v2015_v44, 4  ;;  %v2731_v43 = vunpack.c.l.b16 %v2016_v52  ;;  %v3812_v44 = vld [vmem:[%s5748_s1 + $0x8] sm:$0xff] }
 0x12e   : > { %v5188_v56 = vsel %vm2906_vm9, %v5024_v32, %v2426_v4  ;;  %v947_v32 = vsel %vm3960_vm2, %v942_v3, %v946_v16  ;;  %v957_v23 = vsel %vm3960_vm2, %v952_v24, %v956_v22  ;;  %v2047_v9 = vsel %vm4162_vm5, %v2045_v59, %v2046_v8 }
 0x12f   : > { %v2379_v27 = vunpack.c.l.b16 %v947_v32  ;;  %v3089_v31 = vunpack.c.l.b16 %v3075_v54  ;;  %v2380_v57 = vunpack.c.l.b16 %v957_v23  ;;  %v2740_v13 = vunpack.c.l.b16 %v2047_v9  ;;  %v3811_v9 = vld [vmem:[%s5748_s1] sm:$0xff] }
 0x130   : > { %2707 = vrot.lane.b32.xlu2 %v2677_v49, %s3885_s25  ;;  %v2019_v0 = vsel %vm4162_vm5, %v2017_v53, %v2018_v25  ;;  %v3434_v49 = vld [vmem:[%s3932_s19 + $0x24] sm:$0xe]  ;;  %v2924_v46 = vsel %vm2906_vm9, %v5096_v1, %v5060_v14  ;;  %v1378_v63 = vrot.slane %v3397_v29, 5  ;;  %v1381_v61 = vrot.slane %v3422_v18, 5 }
 0x131   : > { %v2732_v16 = vunpack.c.l.b16 %v2019_v0  ;;  %v2409_v40 = vpack.c.b16 %v2380_v57, %v2379_v27  ;;  %v2757_v39 = vpack.c.b16 %v2740_v13, %v2739_v50  ;;  %v3450_v4 = vrot.slane %v3434_v49, 9 }
 0x132   : > { %2523 = vrot.lane.b32.xlu0 %v5143_v17, %s3884_s24  ;;  %v5217_v2 = vpop.permute.xlu2 %2511  ;;  %v3092_v17 = vpack.c.b16 %v3089_v31, %v3089_v31  ;;  %v1379_v14 = vsel %vm4162_vm5, %v3454_v51, %v1378_v63  ;;  %v1380_v1 = vrot.slane %v1378_v63, 4  ;;  %v1353_v19 = vrot.slane %v5161_v45, 5  ;;  %v3468_v31 = vld [vmem:[%s3932_s19 + $0x30] sm:$0xf] }
 0x133   : > { %2699 = vrot.lane.b32.xlu1 %v2673_v36, %s3885_s25  ;;  %v5229_v34 = vpack.c.b16 %v2732_v16, %v2731_v43  ;;  %v1350_v36 = vrot.slane %v5152_v37, 5  ;;  %v2467_v3 = vunpack.c.l.b16 %v1379_v14  ;;  %v1031_v54 = vshrl.u32 %v3396_v41, 16  ;;  %v5253_v16 = vld [vmem:[%s3932_s19 + $0x34] sm:$0xf] }
 0x134   : > { %v5221_v22 = vpop.permute.xlu0 %2423  ;;  %v3130_v8 = vsel %vm3128_vm10, %v3092_v17, 0  ;;  %v1034_v24 = vshll.u32 %v3396_v41, 16  ;;  %v1382_v59 = vsel %vm4162_vm5, %v1380_v1, %v1381_v61  ;;  %v1040_v32 = vshll.u32 %v3397_v29, 16 }
 0x135   : > { %v2520_v21 = vpop.permute.xlu1 %2519  ;;  %3814 = vmatpush.bf16.msra.mxu2 %v3130_v8  ;;  %3815 = vmatpush.bf16.msra.mxu3 %v3130_v8  ;;  %v1351_v50 = vsel %vm4162_vm5, %v3450_v4, %v1350_v36  ;;  %v1352_v52 = vrot.slane %v1350_v36, 4  ;;  %v2468_v37 = vunpack.c.l.b16 %v1382_v59  ;;  %v1033_v25 = vrot.slane %v1031_v54, 4  ;;  %v3514_v36 = vld [vmem:[%s3932_s19 + $0x30] sm:$0xe]  ;;  %v3477_v59 = vld [vmem:[%s3932_s19 + $0x64] sm:$0xf] }
 0x136   : > { %3137 = vmatpush.bf16.msra.mxu0 %v3130_v8  ;;  %3813 = vmatpush.bf16.msra.mxu1 %v3130_v8  ;;  %v2459_v53 = vunpack.c.l.b16 %v1351_v50  ;;  %v1036_v45 = vrot.slane %v1034_v24, 5  ;;  %v1042_v42 = vrot.slane %v1040_v32, 5  ;;  %v1044_v23 = vshrl.u32 %v3397_v29, 16 }
 0x137   : > { %v1354_v43 = vsel %vm4162_vm5, %v1352_v52, %v1353_v19  ;;  %v1050_v27 = vshll.u32 %v3422_v18, 16  ;;  %v2957_v57 = vsel %vm2939_vm11, %v2924_v46, %v2520_v21  ;;  %v2493_v13 = vpack.c.b16 %v2468_v37, %v2467_v3  ;;  %v5274_v52 = vld [vmem:[%s3932_s19 + $0x68] sm:$0x1] }
 0x138   : > { %2427 = vrot.lane.b32.xlu2 %v2409_v40, %s3883_s23  ;;  %v2460_v0 = vunpack.c.l.b16 %v1354_v43  ;;  %v1037_v49 = vor.u32 %v1036_v45, %v1033_v25  ;;  %v1046_v51 = vrot.slane %v1044_v23, 4  ;;  %v1544_v41 = vshrl.u32 %v3468_v31, 16 }
 0x139   : > { %3817 = vmatpush.bf16.msra.mxu2 %v3812_v44  ;;  %3818 = vmatpush.bf16.msra.mxu3 %v3812_v44  ;;  %v1052_v29 = vrot.slane %v1050_v27, 5  ;;  %v1547_v8 = vshll.u32 %v3468_v31, 16  ;;  %v1553_v4 = vshll.u32 %v5253_v16, 16  ;;  %v1557_v1 = vshrl.u32 %v5253_v16, 16 }
 0x13a   : > { %2627 = vrot.lane.b32.xlu0 %v3809_v7, %s3886_s26  ;;  %3138 = vmatpush.bf16.msra.mxu0 %v3812_v44  ;;  %v5257_v46 = vpop.permute.xlu2 %2679  ;;  %v1038_v61 = vrot.slane %v1037_v49, 4  ;;  %v2489_v21 = vpack.c.b16 %v2460_v0, %v2459_v53  ;;  %v1047_v40 = vor.u32 %v1046_v51, %v1042_v42  ;;  %v3518_v7 = vld [vmem:[%s3932_s19 + $0x60] sm:$0xe]  ;;  %v1546_v14 = vrot.slane %v1544_v41, 4 }
 0x13b   : > { %2787 = vrot.lane.b32.xlu1 %v2757_v39, %s3887_s27  ;;  %3816 = vmatpush.bf16.msra.mxu1 %v3812_v44  ;;  %v5260_v39 = vld [vmem:[%s3932_s19 + $0x38] sm:$0x1]  ;;  %v1549_v54 = vrot.slane %v1547_v8, 5  ;;  %v1555_v24 = vrot.slane %v1553_v4, 5  ;;  %v1559_v50 = vrot.slane %v1557_v1, 4  ;;  %v3534_v32 = vrot.slane %v3518_v7, 9 }
 0x13c   : > { %v2448_v17 = vpop.permute.xlu0 %2447  ;;  %v1043_v44 = vsel %vm3960_vm2, %v1038_v61, %v1042_v42  ;;  %v1048_v3 = vrot.slane %v1047_v40, 4  ;;  %v1987_v37 = vrot.slane %v3477_v59, 5  ;;  %v1990_v45 = vrot.slane %v5274_v52, 5  ;;  %v3476_v61 = vld [vmem:[%s3932_s19 + $0x60] sm:$0xf] }
 0x13d   : > { %v2932_v18 = vsel %vm2906_vm9, %v5214_v62, %v2448_v17  ;;  %v2624_v63 = vpop.permute.xlu1 %2623  ;;  %3820 = vmatpush.bf16.msra.mxu2 %v3811_v9  ;;  %3821 = vmatpush.bf16.msra.mxu3 %v3811_v9  ;;  %v2387_v19 = vunpack.c.l.b16 %v1043_v44  ;;  %v1550_v25 = vor.u32 %v1549_v54, %v1546_v14  ;;  %v3530_v43 = vrot.slane %v3514_v36, 9  ;;  %v3801_v7 = vld [vmem:[%s3932_s19 + $0x60] sm:$0xff] }
 0x13e   : > { %v2965_v62 = vsel %vm2939_vm11, %v2932_v18, %v5101_v20  ;;  %3139 = vmatpush.bf16.msra.mxu0 %v3811_v9  ;;  %v1563_v20 = vshll.u32 %v5260_v39, 16  ;;  %v1053_v53 = vsel %vm3960_vm2, %v1048_v3, %v1052_v29  ;;  %v1560_v27 = vor.u32 %v1559_v50, %v1555_v24 }
 0x13f   : > { %3819 = vmatpush.bf16.msra.mxu1 %v3811_v9  ;;  %v2998_v42 = vsel %vm2972_vm12, %v2965_v62, %v2624_v63  ;;  %v2388_v23 = vunpack.c.l.b16 %v1053_v53  ;;  %v1989_v0 = vrot.slane %v1987_v37, 4  ;;  %v1959_v49 = vrot.slane %v5253_v16, 5  ;;  %v5310_v53 = vld [vmem:[%s3932_s19 + $0x94] sm:$0xf] }
 0x140   : > { %2515 = vrot.lane.b32.xlu2 %v2493_v13, %s3884_s24  ;;  %v1565_v9 = vrot.slane %v1563_v20, 5  ;;  %v1551_v13 = vrot.slane %v1550_v25, 4  ;;  %v1561_v18 = vrot.slane %v1560_v27, 4  ;;  %v1962_v63 = vrot.slane %v5260_v39, 5 }
 0x141   : > { %v2413_v51 = vpack.c.b16 %v2388_v23, %v2387_v19  ;;  %v1991_v40 = vsel %vm4162_vm5, %v1989_v0, %v1990_v45  ;;  %v1960_v16 = vsel %vm4162_vm5, %v3530_v43, %v1959_v49  ;;  %v1961_v14 = vrot.slane %v1959_v49, 4  ;;  %v5314_v23 = vld [vmem:[%s3932_s19 + $0x98] sm:$0x1] }
 0x142   : > { %2779 = vrot.lane.b32.xlu0 %v5229_v34, %s3887_s27  ;;  %v1988_v34 = vsel %vm4162_vm5, %v3534_v32, %v1987_v37  ;;  %v1566_v39 = vsel %vm3960_vm2, %v1561_v18, %v1565_v9  ;;  %v2724_v44 = vunpack.c.l.b16 %v1991_v40  ;;  %v1640_v1 = vshrl.u32 %v3476_v61, 16  ;;  %v5322_v18 = vld [vmem:[%s3932_s19 + $0xc4] sm:$0xf] }
 0x143   : > { %2507 = vrot.lane.b32.xlu1 %v2489_v21, %s3884_s24  ;;  %v1556_v21 = vsel %vm3960_vm2, %v1551_v13, %v1555_v24  ;;  %v2636_v62 = vunpack.c.l.b16 %v1566_v39  ;;  %v2715_v36 = vunpack.c.l.b16 %v1960_v16  ;;  %v1643_v3 = vshll.u32 %v3476_v61, 16  ;;  %v3443_v24 = vld [vmem:[%s3932_s19 + $0x90] sm:$0xe] }
 0x144   : > { %v2616_v31 = vpop.permute.xlu0 %2615  ;;  %v2635_v4 = vunpack.c.l.b16 %v1556_v21  ;;  %v1649_v19 = vshll.u32 %v3477_v59, 16  ;;  %v1653_v54 = vshrl.u32 %v3477_v59, 16  ;;  %v1963_v20 = vsel %vm4162_vm5, %v1961_v14, %v1962_v63  ;;  %v3797_v61 = vld [vmem:[%s3932_s19 + $0x30] sm:$0xff] }
 0x145   : > { %v2990_v17 = vsel %vm2972_vm12, %v2957_v57, %v2616_v31  ;;  %v2776_v29 = vpop.permute.xlu1 %2775  ;;  %v5297_v57 = vpop.permute.xlu2 %2767  ;;  %v1642_v32 = vrot.slane %v1640_v1, 4  ;;  %v1659_v37 = vshll.u32 %v5274_v52, 16  ;;  %v2716_v25 = vunpack.c.l.b16 %v1963_v20 }
 0x146   : > { %v3023_v41 = vsel %vm3005_vm13, %v2990_v17, %v5139_v10  ;;  %v2723_v10 = vunpack.c.l.b16 %v1988_v34  ;;  %v2665_v50 = vpack.c.b16 %v2636_v62, %v2635_v4  ;;  %v1645_v45 = vrot.slane %v1643_v3, 5  ;;  %v3414_v34 = vld [vmem:[%s3932_s19 + $0xc0] sm:$0xf]  ;;  %v3406_v4 = vld [vmem:[%s3932_s19 + $0x90] sm:$0xf] }
 0x147   : > { %v3056_v8 = vsel %vm3038_vm14, %v3023_v41, %v2776_v29  ;;  %v1651_v43 = vrot.slane %v1649_v19, 5  ;;  %v1655_v59 = vrot.slane %v1653_v54, 4  ;;  %v3459_v31 = vrot.slane %v3443_v24, 9 }
 0x148   : > { %3752 = vmatmul.msk.bf16.vlgmr.msra.gmra.mxu2 %vm3095_vm15, %v3056_v8  ;;  %2683 = vrot.lane.b32.xlu2 %v2665_v50, %s3885_s25  ;;  %v2749_v9 = vpack.c.b16 %v2724_v44, %v2723_v10  ;;  %v1413_v13 = vrot.slane %v5310_v53, 5  ;;  %v1416_v52 = vrot.slane %v5314_v23, 5  ;;  %v1646_v17 = vor.u32 %v1645_v45, %v1642_v32  ;;  %v5334_v10 = vld [vmem:[%s3932_s19 + $0xc8] sm:$0x1] }
 0x149   : > { %v1661_v29 = vrot.slane %v1659_v37, 5  ;;  %v2745_v41 = vpack.c.b16 %v2716_v25, %v2715_v36  ;;  %v1247_v39 = vshrl.u32 %v3414_v34, 16  ;;  %v1250_v62 = vshll.u32 %v3414_v34, 16 }
 0x14a   : > { %2435 = vrot.lane.b32.xlu0 %v2413_v51, %s3883_s23  ;;  %v1656_v51 = vor.u32 %v1655_v59, %v1651_v43  ;;  %v1414_v21 = vsel %vm4162_vm5, %v3459_v31, %v1413_v13  ;;  %v1415_v40 = vrot.slane %v1413_v13, 4  ;;  %v1260_v44 = vshrl.u32 %v5322_v18, 16 }
 0x14b   : > { %2611 = vrot.lane.b32.xlu1 %v3801_v7, %s3886_s26  ;;  %v2477_v8 = vunpack.c.l.b16 %v1414_v21  ;;  %v1249_v19 = vrot.slane %v1247_v39, 4  ;;  %v1252_v50 = vrot.slane %v1250_v62, 5  ;;  %v2908_v32 = vsel %vm2906_vm9, %v4782_v28, %v5221_v22  ;;  %v3523_v39 = vld [vmem:[%s3932_s19 + $0x9c] sm:$0xe] }
 0x14c   : > { %v2704_v27 = vpop.permute.xlu0 %2703  ;;  %v1657_v16 = vrot.slane %v1656_v51, 4  ;;  %v1417_v7 = vsel %vm4162_vm5, %v1415_v40, %v1416_v52  ;;  %v1262_v37 = vrot.slane %v1260_v44, 4  ;;  %v1266_v25 = vshll.u32 %v5334_v10, 16 }
 0x14d   : > { %v3031_v0 = vsel %vm3005_vm13, %v2998_v42, %v2704_v27  ;;  %v2504_v49 = vpop.permute.xlu1 %2503  ;;  %v1647_v42 = vrot.slane %v1646_v17, 4  ;;  %v5338_v14 = vpop.permute.xlu2 %2521  ;;  %v2478_v3 = vunpack.c.l.b16 %v1417_v7  ;;  %v1151_v45 = vshrl.u32 %v3406_v4, 16  ;;  %v3447_v17 = vld [vmem:[%s3932_s19 + $0xc0] sm:$0xe] }
 0x14e   : > { %v3064_v63 = vsel %vm3038_vm14, %v3031_v0, %v5175_v15  ;;  %v1256_v15 = vshll.u32 %v5322_v18, 16  ;;  %v1662_v36 = vsel %vm3960_vm2, %v1657_v16, %v1661_v29  ;;  %v1253_v27 = vor.u32 %v1252_v50, %v1249_v19  ;;  %v5378_v19 = vld [vmem:[%s3932_s19 + $0xa4] sm:$0x1] }
 0x14f   : > { %3756 = vmatmul.msk.bf16.vlgmr.msra.gmra.mxu3 %vm3095_vm15, %v3064_v63  ;;  %v1652_v1 = vsel %vm3960_vm2, %v1647_v42, %v1651_v43  ;;  %v2644_v24 = vunpack.c.l.b16 %v1662_v36  ;;  %v2941_v43 = vsel %vm2939_vm11, %v2908_v32, %v2504_v49  ;;  %v1154_v31 = vshll.u32 %v3406_v4, 16 }
 0x150   : > { %v2643_v54 = vunpack.c.l.b16 %v1652_v1  ;;  %v1258_v20 = vrot.slane %v1256_v15, 5  ;;  %2771 = vrot.lane.b32.xlu2 %v2749_v9, %s3887_s27  ;;  %v1160_v13 = vshll.u32 %v5310_v53, 16  ;;  %v2498_v34 = vpack.c.b16 %v2478_v3, %v2477_v8 }
 0x151   : > { %v1268_v22 = vrot.slane %v1266_v25, 5  ;;  %v1153_v0 = vrot.slane %v1151_v45, 4  ;;  %v1254_v49 = vrot.slane %v1253_v27, 4  ;;  %v1156_v63 = vrot.slane %v1154_v31, 5  ;;  %v3494_v25 = vld [vmem:[%s3932_s19 + $0xcc] sm:$0xf] }
 0x152   : > { %2603 = vrot.lane.b32.xlu0 %v3797_v61, %s3886_s26  ;;  %v1263_v28 = vor.u32 %v1262_v37, %v1258_v20  ;;  %v2669_v29 = vpack.c.b16 %v2644_v24, %v2643_v54  ;;  %v1162_v9 = vrot.slane %v1160_v13, 5  ;;  %v1170_v21 = vshll.u32 %v5314_v23, 16 }
 0x153   : > { %2763 = vrot.lane.b32.xlu1 %v2745_v41, %s3887_s27  ;;  %v1164_v41 = vshrl.u32 %v5310_v53, 16  ;;  %v1259_v40 = vsel %vm3960_vm2, %v1254_v49, %v1258_v20  ;;  %v1157_v42 = vor.u32 %v1156_v63, %v1153_v0  ;;  %v3463_v16 = vrot.slane %v3447_v17, 9  ;;  %v5395_v0 = vld [vmem:[%s3932_s19 + $0xd0] sm:$0xf]  ;;  %v3486_v63 = vld [vmem:[%s3932_s19 + $0x9c] sm:$0xf] }
 0x154   : > { %v2432_v59 = vpop.permute.xlu0 %2431  ;;  %v1264_v61 = vrot.slane %v1263_v28, 4  ;;  %v1441_v8 = vrot.slane %v5322_v18, 5  ;;  %v2405_v7 = vunpack.c.l.b16 %v1259_v40  ;;  %v5372_v18 = vld [vmem:[%s3932_s19 + $0xa0] sm:$0xf]  ;;  %v1444_v3 = vrot.slane %v5334_v10, 5 }
 0x155   : > { %v5353_v52 = vpop.permute.xlu1 %2607  ;;  %v2916_v51 = vsel %vm2906_vm9, %v5074_v58, %v2432_v59  ;;  %v1166_v53 = vrot.slane %v1164_v41, 4  ;;  %v1158_v62 = vrot.slane %v1157_v42, 4  ;;  %v5374_v1 = vpop.permute.xlu2 %2625  ;;  %v3539_v54 = vrot.slane %v3523_v39, 9 }
 0x156   : > { %v2949_v58 = vsel %vm2939_vm11, %v2916_v51, %v5217_v2  ;;  %v1269_v4 = vsel %vm3960_vm2, %v1264_v61, %v1268_v22  ;;  %v1442_v15 = vsel %vm4162_vm5, %v3463_v16, %v1441_v8  ;;  %v1443_v44 = vrot.slane %v1441_v8, 4 }
 0x157   : > { %v2406_v23 = vunpack.c.l.b16 %v1269_v4  ;;  %v1167_v36 = vor.u32 %v1166_v53, %v1162_v9  ;;  %v1172_v2 = vrot.slane %v1170_v21, 5  ;;  %v1163_v20 = vsel %vm3960_vm2, %v1158_v62, %v1162_v9  ;;  %v3806_v4 = vld [vmem:[%s3932_s19 + $0x9c] sm:$0xff] }
 0x158   : > { %2525 = vrot.lane.b32.xlu2 %v2498_v34, %s3884_s24  ;;  %v2022_v32 = vrot.slane %v5372_v18, 5  ;;  %v2025_v37 = vrot.slane %v5378_v19, 5  ;;  %v1445_v27 = vsel %vm4162_vm5, %v1443_v44, %v1444_v3  ;;  %v2485_v31 = vunpack.c.l.b16 %v1442_v15 }
 0x159   : > { %v2422_v50 = vpack.c.b16 %v2406_v23, %v2405_v7  ;;  %v1168_v10 = vrot.slane %v1167_v36, 4  ;;  %v2397_v13 = vunpack.c.l.b16 %v1163_v20  ;;  %v2486_v51 = vunpack.c.l.b16 %v1445_v27 }
 0x15a   : > { %2691 = vrot.lane.b32.xlu0 %v2669_v29, %s3885_s25  ;;  %v2023_v28 = vsel %vm4162_vm5, %v3539_v54, %v2022_v32  ;;  %v2024_v22 = vrot.slane %v2022_v32, 4  ;;  %v5401_v29 = vld [vmem:[%s3932_s19 + $0xd4] sm:$0x1]  ;;  %v1856_v49 = vshrl.u32 %v3494_v25, 16  ;;  %v1859_v21 = vshll.u32 %v3494_v25, 16 }
 0x15b   : > { %2453 = vrot.lane.b32.xlu1 %v2422_v50, %s3883_s23  ;;  %v2733_v41 = vunpack.c.l.b16 %v2023_v28  ;;  %v1865_v16 = vshll.u32 %v5395_v0, 16  ;;  %v1869_v8 = vshrl.u32 %v5395_v0, 16  ;;  %v1875_v53 = vshll.u32 %v5401_v29, 16 }
 0x15c   : > { %v2600_v24 = vpop.permute.xlu0 %2599  ;;  %v2026_v9 = vsel %vm4162_vm5, %v2024_v22, %v2025_v37  ;;  %v1858_v42 = vrot.slane %v1856_v49, 4  ;;  %v1861_v7 = vrot.slane %v1859_v21, 5  ;;  %v1760_v23 = vshrl.u32 %v3486_v63, 16 }
 0x15d   : > { %v2974_v45 = vsel %vm2972_vm12, %v2941_v43, %v2600_v24  ;;  %v2760_v59 = vpop.permute.xlu1 %2759  ;;  %v1173_v43 = vsel %vm3960_vm2, %v1168_v10, %v1172_v2  ;;  %v2734_v40 = vunpack.c.l.b16 %v2026_v9  ;;  %v2982_v62 = vsel %vm2972_vm12, %v2949_v58, %v5353_v52  ;;  %v5416_v20 = vpop.permute.xlu2 %2777 }
 0x15e   : > { %v3007_v34 = vsel %vm3005_vm13, %v2974_v45, %v5257_v46  ;;  %v2398_v61 = vunpack.c.l.b16 %v1173_v43  ;;  %v3810_v46 = vld [vmem:[%s3932_s19 + $0xcc] sm:$0xff]  ;;  %v1867_v15 = vrot.slane %v1865_v16, 5  ;;  %v1871_v44 = vrot.slane %v1869_v8, 4  ;;  %v3398_v45 = vld [vmem:[%s3932_s19 + $0x60] sm:$0xf] }
 0x15f   : > { %v3040_v17 = vsel %vm3038_vm14, %v3007_v34, %v2760_v59  ;;  %v1763_v36 = vshll.u32 %v3486_v63, 16  ;;  %v2502_v3 = vpack.c.b16 %v2486_v51, %v2485_v31  ;;  %v1862_v54 = vor.u32 %v1861_v7, %v1858_v42  ;;  %v5430_v43 = vld [vmem:[%s3932_s19 + $0x64] sm:$0xf] }
 0x160   : > { %3744 = vmatmul.msk.bf16.vlgmr.msra.gmra.mxu0 %vm3095_vm15, %v3040_v17  ;;  %v2418_v39 = vpack.c.b16 %v2398_v61, %v2397_v13  ;;  %2629 = vrot.lane.b32.xlu2 %v3810_v46, %s3886_s26  ;;  %v1877_v24 = vrot.slane %v1875_v53, 5  ;;  %v1762_v50 = vrot.slane %v1760_v23, 4  ;;  %v1872_v52 = vor.u32 %v1871_v44, %v1867_v15 }
 0x161   : > { %v1765_v58 = vrot.slane %v1763_v36, 5  ;;  %v1769_v25 = vshll.u32 %v5372_v18, 16  ;;  %v2754_v59 = vpack.c.b16 %v2734_v40, %v2733_v41  ;;  %v1863_v27 = vrot.slane %v1862_v54, 4  ;;  %v5450_v54 = vld [vmem:[%s3932_s19 + $0x34] sm:$0xf] }
 0x162   : > { %2445 = vrot.lane.b32.xlu0 %v2418_v39, %s3883_s23  ;;  %v1773_v31 = vshrl.u32 %v5372_v18, 16  ;;  %v1873_v13 = vrot.slane %v1872_v52, 4  ;;  %v1779_v22 = vshll.u32 %v5378_v19, 16  ;;  %v1055_v49 = vshrl.u32 %v3398_v45, 16 }
 0x163   : > { %2621 = vrot.lane.b32.xlu1 %v3806_v4, %s3886_s26  ;;  %v1766_v34 = vor.u32 %v1765_v58, %v1762_v50  ;;  %v1771_v28 = vrot.slane %v1769_v25, 5  ;;  %v1868_v17 = vsel %vm3960_vm2, %v1863_v27, %v1867_v15  ;;  %v1058_v63 = vshll.u32 %v3398_v45, 16  ;;  %v3390_v4 = vld [vmem:[%s3932_s19 + $0x30] sm:$0xf]  ;;  %v5458_v45 = vld [vmem:[%s3932_s19 + $0x38] sm:$0x1] }
 0x164   : > { %v2688_v2 = vpop.permute.xlu0 %2687  ;;  %v1775_v51 = vrot.slane %v1773_v31, 4  ;;  %v1878_v18 = vsel %vm3960_vm2, %v1873_v13, %v1877_v24  ;;  %v2661_v61 = vunpack.c.l.b16 %v1868_v17  ;;  %v1781_v9 = vrot.slane %v1779_v22, 5 }
 0x165   : > { %v3015_v32 = vsel %vm3005_vm13, %v2982_v62, %v2688_v2  ;;  %v5419_v37 = vpop.permute.xlu1 %2449  ;;  %v1767_v46 = vrot.slane %v1766_v34, 4  ;;  %v2662_v41 = vunpack.c.l.b16 %v1878_v18  ;;  %v1057_v19 = vrot.slane %v1055_v49, 4 }
 0x166   : > { %v3048_v10 = vsel %vm3038_vm14, %v3015_v32, %v5297_v57  ;;  %v5435_v57 = vld [vmem:[%s3932_s19 + $0x68] sm:$0x1]  ;;  %v1776_v21 = vor.u32 %v1775_v51, %v1771_v28  ;;  %v1060_v40 = vrot.slane %v1058_v63, 5  ;;  %v1064_v16 = vshll.u32 %v5430_v43, 16  ;;  %v5455_v32 = vpop.permute.xlu2 %2505 }
 0x167   : > { %3748 = vmatmul.msk.bf16.vlgmr.msra.gmra.mxu1 %vm3095_vm15, %v3048_v10  ;;  %v1772_v42 = vsel %vm3960_vm2, %v1767_v46, %v1771_v28  ;;  %v1068_v8 = vshrl.u32 %v5430_v43, 16  ;;  %v1074_v39 = vshll.u32 %v5435_v57, 16  ;;  %v2678_v53 = vpack.c.b16 %v2662_v41, %v2661_v61  ;;  %v3439_v46 = vld [vmem:[%s3932_s19 + $0x60] sm:$0xe] }
 0x168   : > { %2781 = vrot.lane.b32.xlu2 %v2754_v59, %s3887_s27  ;;  %v1777_v23 = vrot.slane %v1776_v21, 4  ;;  %v1061_v62 = vor.u32 %v1060_v40, %v1057_v19  ;;  %v2653_v15 = vunpack.c.l.b16 %v1772_v42  ;;  %v1066_v36 = vrot.slane %v1064_v16, 5  ;;  %v3527_v59 = vld [vmem:[%s3932_s19 + $0xcc] sm:$0xe] }
 0x169   : > { %v1070_v2 = vrot.slane %v1068_v8, 4  ;;  %v959_v50 = vshrl.u32 %v3390_v4, 16  ;;  %v1076_v25 = vrot.slane %v1074_v39, 5  ;;  %v962_v10 = vshll.u32 %v3390_v4, 16 }
 0x16a   : > { %2533 = vrot.lane.b32.xlu0 %v2502_v3, %s3884_s24  ;;  %v1782_v3 = vsel %vm3960_vm2, %v1777_v23, %v1781_v9  ;;  %v1062_v24 = vrot.slane %v1061_v62, 4  ;;  %v968_v13 = vshll.u32 %v5450_v54, 16  ;;  %v972_v34 = vshrl.u32 %v5450_v54, 16 }
 0x16b   : > { %2709 = vrot.lane.b32.xlu1 %v2678_v53, %s3885_s25  ;;  %v2654_v52 = vunpack.c.l.b16 %v1782_v3  ;;  %v1071_v58 = vor.u32 %v1070_v2, %v1066_v36  ;;  %v961_v31 = vrot.slane %v959_v50, 4  ;;  %v964_v51 = vrot.slane %v962_v10, 5 }
 0x16c   : > { %v2442_v7 = vpop.permute.xlu0 %2441  ;;  %v1067_v27 = vsel %vm3960_vm2, %v1062_v24, %v1066_v36  ;;  %v970_v49 = vrot.slane %v968_v13, 5  ;;  %v974_v63 = vrot.slane %v972_v34, 4  ;;  %v978_v18 = vshll.u32 %v5458_v45, 16  ;;  %v3435_v36 = vld [vmem:[%s3932_s19 + $0x30] sm:$0xe] }
 0x16d   : > { %v5447_v44 = vpop.permute.xlu1 %2617  ;;  %v2674_v28 = vpack.c.b16 %v2654_v52, %v2653_v15  ;;  %v1072_v22 = vrot.slane %v1071_v58, 4  ;;  %v2389_v17 = vunpack.c.l.b16 %v1067_v27  ;;  %v3543_v61 = vrot.slane %v3527_v59, 9 }
 0x16e   : > { %v965_v41 = vor.u32 %v964_v51, %v961_v31  ;;  %v2050_v21 = vrot.slane %v5395_v0, 5  ;;  %v2053_v19 = vrot.slane %v5401_v29, 5  ;;  %v2926_v40 = vsel %vm2906_vm9, %v4927_v35, %v2442_v7  ;;  %v5494_v10 = vpop.permute.xlu2 %2609 }
 0x16f   : > { %v1077_v9 = vsel %vm3960_vm2, %v1072_v22, %v1076_v25  ;;  %v975_v8 = vor.u32 %v974_v63, %v970_v49  ;;  %v980_v39 = vrot.slane %v978_v18, 5  ;;  %v3455_v0 = vrot.slane %v3439_v46, 9  ;;  %v3470_v25 = vld [vmem:[%s3932_s19 + $0x3c] sm:$0xf]  ;;  %v3471_v46 = vld [vmem:[%s3932_s19 + $0x40] sm:$0xf] }
 0x170   : > { %v2390_v16 = vunpack.c.l.b16 %v1077_v9  ;;  %v966_v4 = vrot.slane %v965_v41, 4  ;;  %v2051_v53 = vsel %vm4162_vm5, %v3543_v61, %v2050_v21  ;;  %v2052_v23 = vrot.slane %v2050_v21, 4  ;;  %v3499_v21 = vld [vmem:[%s3932_s19 + $0x44] sm:$0x1] }
 0x171   : > { %v2934_v29 = vsel %vm2906_vm9, %v5183_v38, %v5419_v37  ;;  %v976_v7 = vrot.slane %v975_v8, 4  ;;  %v2741_v15 = vunpack.c.l.b16 %v2051_v53  ;;  %v2959_v2 = vsel %vm2939_vm11, %v2926_v40, %v5338_v14 }
 0x172   : > { %2701 = vrot.lane.b32.xlu0 %v2674_v28, %s3885_s25  ;;  %v2414_v35 = vpack.c.b16 %v2390_v16, %v2389_v17  ;;  %v971_v3 = vsel %vm3960_vm2, %v966_v4, %v970_v49  ;;  %v2054_v24 = vsel %vm4162_vm5, %v2052_v23, %v2053_v19  ;;  %v1385_v50 = vrot.slane %v5430_v43, 5 }
 0x173   : > { %v981_v38 = vsel %vm3960_vm2, %v976_v7, %v980_v39  ;;  %v2381_v37 = vunpack.c.l.b16 %v971_v3  ;;  %v2742_v52 = vunpack.c.l.b16 %v2054_v24  ;;  %v1388_v58 = vrot.slane %v5435_v57, 5  ;;  %v3478_v3 = vld [vmem:[%s3932_s19 + $0x6c] sm:$0xf] }
 0x174   : > { %v2530_v42 = vpop.permute.xlu0 %2529  ;;  %2437 = vrot.lane.b32.xlu2 %v2414_v35, %s3883_s23  ;;  %v2382_v14 = vunpack.c.l.b16 %v981_v38  ;;  %v1386_v59 = vsel %vm4162_vm5, %v3455_v0, %v1385_v50  ;;  %v1387_v27 = vrot.slane %v1385_v50, 4  ;;  %v3451_v31 = vrot.slane %v3435_v36, 9  ;;  %v3479_v35 = vld [vmem:[%s3932_s19 + $0x70] sm:$0xf]  ;;  %v3519_v36 = vld [vmem:[%s3932_s19 + $0x6c] sm:$0xe] }
 0x175   : > { %v5476_v62 = vpop.permute.xlu1 %2705  ;;  %v2992_v43 = vsel %vm2972_vm12, %v2959_v2, %v5447_v44  ;;  %v2758_v13 = vpack.c.b16 %v2742_v52, %v2741_v15  ;;  %v1357_v34 = vrot.slane %v5450_v54, 5  ;;  %v1360_v28 = vrot.slane %v5458_v45, 5  ;;  %v3798_v54 = vld [vmem:[%s3932_s19 + $0x3c] sm:$0xff] }
 0x176   : > { %v2410_v57 = vpack.c.b16 %v2382_v14, %v2381_v37  ;;  %v1389_v22 = vsel %vm4162_vm5, %v1387_v27, %v1388_v58  ;;  %v1568_v17 = vshrl.u32 %v3470_v25, 16  ;;  %v1571_v51 = vshll.u32 %v3470_v25, 16  ;;  %v3515_v38 = vld [vmem:[%s3932_s19 + $0x3c] sm:$0xe]  ;;  %v5527_v37 = vpop.permute.xlu2 %2761  ;;  %v3503_v14 = vld [vmem:[%s3932_s19 + $0x74] sm:$0x1] }
 0x177   : > { %v2469_v63 = vunpack.c.l.b16 %v1386_v59  ;;  %v2470_v18 = vunpack.c.l.b16 %v1389_v22  ;;  %v1358_v44 = vsel %vm4162_vm5, %v3451_v31, %v1357_v34  ;;  %v1359_v61 = vrot.slane %v1357_v34, 4 }
 0x178   : > { %2429 = vrot.lane.b32.xlu1 %v2410_v57, %s3883_s23  ;;  %v2461_v9 = vunpack.c.l.b16 %v1358_v44  ;;  %v1570_v19 = vrot.slane %v1568_v17, 4  ;;  %v1573_v40 = vrot.slane %v1571_v51, 5  ;;  %v2967_v16 = vsel %vm2939_vm11, %v2934_v29, %v2530_v42 }
 0x179   : > { %v1361_v39 = vsel %vm4162_vm5, %v1359_v61, %v1360_v28  ;;  %v1577_v23 = vshll.u32 %v3471_v46, 16  ;;  %v1581_v0 = vshrl.u32 %v3471_v46, 16  ;;  %v2494_v7 = vpack.c.b16 %v2470_v18, %v2469_v63 }
 0x17a   : > { %2789 = vrot.lane.b32.xlu0 %v2758_v13, %s3887_s27  ;;  %v2462_v4 = vunpack.c.l.b16 %v1361_v39  ;;  %v1574_v53 = vor.u32 %v1573_v40, %v1570_v19  ;;  %v1587_v15 = vshll.u32 %v3499_v21, 16  ;;  %v3000_v24 = vsel %vm2972_vm12, %v2967_v16, %v5374_v1 }
 0x17b   : > { %v1579_v29 = vrot.slane %v1577_v23, 5  ;;  %v1583_v2 = vrot.slane %v1581_v0, 4  ;;  %v1994_v50 = vrot.slane %v3479_v35, 5  ;;  %v1966_v59 = vrot.slane %v3471_v46, 5 }
 0x17c   : > { %v2698_v49 = vpop.permute.xlu0 %2697  ;;  %2605 = vrot.lane.b32.xlu2 %v3798_v54, %s3886_s26  ;;  %v2490_v42 = vpack.c.b16 %v2462_v4, %v2461_v9  ;;  %v1589_v25 = vrot.slane %v1587_v15, 5  ;;  %v3033_v27 = vsel %vm3005_vm13, %v3000_v24, %v5476_v62  ;;  %v1664_v13 = vshrl.u32 %v3478_v3, 16  ;;  %v3802_v54 = vld [vmem:[%s3932_s19 + $0x6c] sm:$0xff] }
 0x17d   : > { %v3025_v45 = vsel %vm3005_vm13, %v2992_v43, %v2698_v49  ;;  %v5511_v41 = vpop.permute.xlu1 %2433  ;;  %v1584_v58 = vor.u32 %v1583_v2, %v1579_v29  ;;  %v3535_v43 = vrot.slane %v3519_v36, 9  ;;  %v3531_v57 = vrot.slane %v3515_v38, 9 }
 0x17e   : > { %v3058_v8 = vsel %vm3038_vm14, %v3025_v45, %v5416_v20  ;;  %v1575_v20 = vrot.slane %v1574_v53, 4  ;;  %v1969_v22 = vrot.slane %v3499_v21, 5  ;;  %v1996_v51 = vrot.slane %v1994_v50, 4 }
 0x17f   : > { %3753 = vmatmul.msk.bf16.gmra.mxu2 %vm3095_vm15, %v3058_v8  ;;  %v1585_v34 = vrot.slane %v1584_v58, 4  ;;  %v1997_v49 = vrot.slane %v3503_v14, 5  ;;  %v1968_v62 = vrot.slane %v1966_v59, 4  ;;  %v1666_v18 = vrot.slane %v1664_v13, 4 }
 0x180   : > { %v1580_v52 = vsel %vm3960_vm2, %v1575_v20, %v1579_v29  ;;  %2517 = vrot.lane.b32.xlu1 %v2494_v7, %s3884_s24  ;;  %v1667_v44 = vshll.u32 %v3478_v3, 16  ;;  %v1673_v61 = vshll.u32 %v3479_v35, 16  ;;  %v1677_v45 = vshrl.u32 %v3479_v35, 16 }
 0x181   : > { %v2637_v17 = vunpack.c.l.b16 %v1580_v52  ;;  %v1590_v63 = vsel %vm3960_vm2, %v1585_v34, %v1589_v25  ;;  %v1683_v9 = vshll.u32 %v3503_v14, 16  ;;  %v1967_v19 = vsel %vm4162_vm5, %v3531_v57, %v1966_v59 }
 0x182   : > { %2509 = vrot.lane.b32.xlu0 %v2490_v42, %s3884_s24  ;;  %v2638_v46 = vunpack.c.l.b16 %v1590_v63  ;;  %v1970_v21 = vsel %vm4162_vm5, %v1968_v62, %v1969_v22  ;;  %v1669_v40 = vrot.slane %v1667_v44, 5  ;;  %v1675_v16 = vrot.slane %v1673_v61, 5  ;;  %v2452_v42 = vpop.permute.xlu2 %2451 }
 0x183   : > { %v1995_v39 = vsel %vm4162_vm5, %v3535_v43, %v1994_v50  ;;  %v1998_v4 = vsel %vm4162_vm5, %v1996_v51, %v1997_v49  ;;  %v1679_v53 = vrot.slane %v1677_v45, 4  ;;  %v2717_v35 = vunpack.c.l.b16 %v1967_v19 }
 0x184   : > { %v2786_v31 = vpop.permute.xlu0 %2785  ;;  %v2666_v8 = vpack.c.b16 %v2638_v46, %v2637_v17  ;;  %v1670_v23 = vor.u32 %v1669_v40, %v1666_v18  ;;  %v2718_v7 = vunpack.c.l.b16 %v1970_v21  ;;  %v1685_v36 = vrot.slane %v1683_v9, 5 }
 0x185   : > { %v3066_v1 = vsel %vm3038_vm14, %v3033_v27, %v2786_v31  ;;  %v2602_v28 = vpop.permute.xlu1 %2601  ;;  %v1680_v15 = vor.u32 %v1679_v53, %v1675_v16  ;;  %v2725_v20 = vunpack.c.l.b16 %v1995_v39  ;;  %v2726_v29 = vunpack.c.l.b16 %v1998_v4 }
 0x186   : > { %3757 = vmatmul.msk.bf16.gmra.mxu3 %vm3095_vm15, %v3066_v1  ;;  %v1671_v3 = vrot.slane %v1670_v23, 4  ;;  %v2746_v50 = vpack.c.b16 %v2718_v7, %v2717_v35  ;;  %v2943_v14 = vsel %vm2939_vm11, %v5188_v56, %v5455_v32  ;;  %v2918_v56 = vsel %vm2906_vm9, %v5034_v6, %v5511_v41 }
 0x187   : > { %v1681_v24 = vrot.slane %v1680_v15, 4  ;;  %v2750_v58 = vpack.c.b16 %v2726_v29, %v2725_v20  ;;  %v2976_v27 = vsel %vm2972_vm12, %v2943_v14, %v2602_v28  ;;  %v2936_v6 = vsel %vm2906_vm9, %v5156_v47, %v2452_v42 }
 0x188   : > { %2685 = vrot.lane.b32.xlu1 %v2666_v8, %s3885_s25  ;;  %v1676_v60 = vsel %vm3960_vm2, %v1671_v3, %v1675_v16 }
 0x189   : > { %v1686_v38 = vsel %vm3960_vm2, %v1681_v24, %v1685_v36  ;;  %v2645_v52 = vunpack.c.l.b16 %v1676_v60 }
 0x18a   : > { %2613 = vrot.lane.b32.xlu0 %v3802_v54, %s3886_s26  ;;  %v2646_v25 = vunpack.c.l.b16 %v1686_v38  ;;  %v2620_v32 = vpop.permute.xlu2 %2619 }
 0x18c   : > { %v2514_v0 = vpop.permute.xlu0 %2513  ;;  %v2670_v59 = vpack.c.b16 %v2646_v25, %v2645_v52 }
 0x18d   : > { %v2690_v2 = vpop.permute.xlu1 %2689  ;;  %v2951_v1 = vsel %vm2939_vm11, %v2918_v56, %v2514_v0 }
 0x18e   : > { %2693 = vrot.lane.b32.xlu2 %v2670_v59, %s3885_s25  ;;  %v2984_v34 = vsel %vm2972_vm12, %v2951_v1, %v5494_v10 }
 0x18f   : > { %v3017_v28 = vsel %vm3005_vm13, %v2984_v34, %v2690_v2 }
 0x190   : > { %2773 = vrot.lane.b32.xlu1 %v2750_v58, %s3887_s27 }
 0x192   : > { %2765 = vrot.lane.b32.xlu0 %v2746_v50, %s3887_s27 }
 0x194   : > { %v2682_v31 = vpop.permute.xlu0 %2681 }
 0x195   : > { %v3009_v43 = vsel %vm3005_vm13, %v2976_v27, %v2682_v31  ;;  %v2444_v13 = vpop.permute.xlu1 %2443 }
 0x196   : > { %v3042_v26 = vsel %vm3038_vm14, %v3009_v43, %v5527_v37  ;;  %v2708_v37 = vpop.permute.xlu2 %2707  ;;  %v2928_v61 = vsel %vm2906_vm9, %v5148_v30, %v2444_v13 }
 0x197   : > { %3745 = vmatmul.msk.bf16.gmra.mxu0 %vm3095_vm15, %v3042_v26 }
 0x19c   : > { %v2770_v57 = vpop.permute.xlu0 %2769 }
 0x19d   : > { %v3050_v22 = vsel %vm3038_vm14, %v3017_v28, %v2770_v57  ;;  %v2532_v17 = vpop.permute.xlu1 %2531 }
 0x19e   : > { %3749 = vmatmul.msk.bf16.gmra.mxu1 %vm3095_vm15, %v3050_v22  ;;  %v2428_v41 = vpop.permute.xlu2 %2427  ;;  %v2969_v62 = vsel %vm2939_vm11, %v2936_v6, %v2532_v17 }
 0x19f   : > { %v2912_v39 = vsel %vm2906_vm9, %v4993_v55, %v2428_v41  ;;  %v5602_v55 = vld [vmem:[%s5749_s2] ss:$0 sm:$0xff] }
 0x1a4   : > { %v2524_v51 = vpop.permute.xlu0 %2523 }
 0x1a5   : > { %v2700_v49 = vpop.permute.xlu1 %2699  ;;  %v2961_v54 = vsel %vm2939_vm11, %v2928_v61, %v2524_v51 }
 0x1a6   : > { %v2994_v47 = vsel %vm2972_vm12, %v2961_v54, %v2620_v32  ;;  %v2516_v19 = vpop.permute.xlu2 %2515 }
 0x1a7   : > { %v3027_v45 = vsel %vm3005_vm13, %v2994_v47, %v2700_v49 }
 0x1ac   : > { %v2628_v63 = vpop.permute.xlu0 %2627 }
 0x1ad   : > { %v3002_v10 = vsel %vm2972_vm12, %v2969_v62, %v2628_v63  ;;  %v2788_v18 = vpop.permute.xlu1 %2787 }
 0x1ae   : > { %v3035_v44 = vsel %vm3005_vm13, %v3002_v10, %v2708_v37  ;;  %v2684_v8 = vpop.permute.xlu2 %2683 }
 0x1af   : > { %v3068_v46 = vsel %vm3038_vm14, %v3035_v44, %v2788_v18 }
 0x1b0   : > { %3758 = vmatmul.msk.bf16.gmra.mxu3 %vm3095_vm15, %v3068_v46 }
 0x1b4   : > { %v2780_v9 = vpop.permute.xlu0 %2779 }
 0x1b5   : > { %v3060_v21 = vsel %vm3038_vm14, %v3027_v45, %v2780_v9  ;;  %v2508_v40 = vpop.permute.xlu1 %2507 }
 0x1b6   : > { %3754 = vmatmul.msk.bf16.gmra.mxu2 %vm3095_vm15, %v3060_v21  ;;  %v2945_v4 = vsel %vm2939_vm11, %v2912_v39, %v2508_v40  ;;  %v2772_v36 = vpop.permute.xlu2 %2771 }
 0x1bc   : > { %v2436_v16 = vpop.permute.xlu0 %2435 }
 0x1bd   : > { %v2612_v30 = vpop.permute.xlu1 %2611  ;;  %v2920_v15 = vsel %vm2906_vm9, %v4885_v5, %v2436_v16 }
 0x1be   : > { %v2953_v42 = vsel %vm2939_vm11, %v2920_v15, %v2516_v19  ;;  %v2526_v38 = vpop.permute.xlu2 %2525 }
 0x1bf   : > { %v2986_v5 = vsel %vm2972_vm12, %v2953_v42, %v2612_v30 }
 0x1c4   : > { %v2604_v53 = vpop.permute.xlu0 %2603 }
 0x1c5   : > { %v2978_v23 = vsel %vm2972_vm12, %v2945_v4, %v2604_v53  ;;  %v2764_v0 = vpop.permute.xlu1 %2763 }
 0x1c6   : > { %v3011_v35 = vsel %vm3005_vm13, %v2978_v23, %v2684_v8  ;;  %v2630_v43 = vpop.permute.xlu2 %2629 }
 0x1c7   : > { %v3044_v7 = vsel %vm3038_vm14, %v3011_v35, %v2764_v0 }
 0x1c8   : > { %3746 = vmatmul.msk.bf16.gmra.mxu0 %vm3095_vm15, %v3044_v7 }
 0x1cb   : > { %v3181_v20 = vpop.f32.mrf.mxu2 }
 0x1cc   : > { %v2692_v29 = vpop.permute.xlu0 %2691  ;;  %v3182_v2 = vadd.f32 %v5602_v55, %v3181_v20 }
 0x1cd   : > { %v3019_v3 = vsel %vm3005_vm13, %v2986_v5, %v2692_v29  ;;  %v2454_v60 = vpop.permute.xlu1 %2453 }
 0x1ce   : > { %v3052_v24 = vsel %vm3038_vm14, %v3019_v3, %v2772_v36  ;;  %3237 = vst.msk [vmem:[%s5608_s16 + $0x80] sm:$0xff] %vm2791_vm6, %v3182_v2  ;;  %v2782_v49 = vpop.permute.xlu2 %2781  ;;  %v2938_v41 = vsel %vm2906_vm9, %v5016_v11, %v2454_v60 }
 0x1cf   : > { %3750 = vmatmul.msk.bf16.gmra.mxu1 %vm3095_vm15, %v3052_v24 }
 0x1d2   : > { %v3201_v50 = vpop.f32.mrf.mxu3 }
 0x1d3   : > { %v3202_v52 = vadd.f32 %v5602_v55, %v3201_v50  ;;  %v3183_v58 = vpop.f32.mrf.mxu2 }
 0x1d4   : > { %v3184_v25 = vadd.f32 %v5602_v55, %v3183_v58  ;;  %v2446_v14 = vpop.permute.xlu0 %2445 }
 0x1d5   : > { %3245 = vst.msk [vmem:[%s5608_s16 + $0xc0] sm:$0xff] %vm2791_vm6, %v3202_v52  ;;  %v2622_v31 = vpop.permute.xlu1 %2621  ;;  %v2930_v32 = vsel %vm2906_vm9, %v5122_v12, %v2446_v14 }
 0x1d6   : > { %3238 = vst.msk [vmem:[%s5608_s16 + $0x88] sm:$0xff] %vm2791_vm6, %v3184_v25  ;;  %v2963_v34 = vsel %vm2939_vm11, %v2930_v32, %v2526_v38  ;;  %v2438_v11 = vpop.permute.xlu2 %2437 }
 0x1d7   : > { %v2996_v17 = vsel %vm2972_vm12, %v2963_v34, %v2622_v31  ;;  %v2922_v16 = vsel %vm2906_vm9, %v5112_v48, %v2438_v11 }
 0x1da   : > { %v3203_v59 = vpop.f32.mrf.mxu3 }
 0x1db   : > { %v3204_v27 = vadd.f32 %v5602_v55, %v3203_v59 }
 0x1dc   : > { %v2534_v26 = vpop.permute.xlu0 %2533 }
 0x1dd   : > { %3246 = vst.msk [vmem:[%s5608_s16 + $0xc8] sm:$0xff] %vm2791_vm6, %v3204_v27  ;;  %v3141_v13 = vpop.f32.mrf.mxu0  ;;  %v2710_v28 = vpop.permute.xlu1 %2709  ;;  %v2971_v62 = vsel %vm2939_vm11, %v2938_v41, %v2534_v26 }
 0x1de   : > { %v3142_v56 = vadd.f32 %v5602_v55, %v3141_v13  ;;  %v3004_v10 = vsel %vm2972_vm12, %v2971_v62, %v2630_v43  ;;  %v2606_v9 = vpop.permute.xlu2 %2605 }
 0x1df   : > { %v3037_v44 = vsel %vm3005_vm13, %v3004_v10, %v2710_v28 }
 0x1e0   : > { %3221 = vst.msk [vmem:[%s5608_s16] sm:$0xff] %vm2791_vm6, %v3142_v56 }
 0x1e4   : > { %v3161_v1 = vpop.f32.mrf.mxu1  ;;  %v2702_v37 = vpop.permute.xlu0 %2701 }
 0x1e5   : > { %v3162_v57 = vadd.f32 %v5602_v55, %v3161_v1  ;;  %v3143_v22 = vpop.f32.mrf.mxu0  ;;  %v3029_v6 = vsel %vm3005_vm13, %v2996_v17, %v2702_v37 }
 0x1e6   : > { %v3144_v51 = vadd.f32 %v5602_v55, %v3143_v22  ;;  %v3062_v12 = vsel %vm3038_vm14, %v3029_v6, %v2782_v49 }
 0x1e7   : > { %3229 = vst.msk [vmem:[%s5608_s16 + $0x40] sm:$0xff] %vm2791_vm6, %v3162_v57  ;;  %3755 = vmatmul.msk.bf16.gmra.mxu2 %vm3095_vm15, %v3062_v12 }
 0x1e8   : > { %3222 = vst.msk [vmem:[%s5608_s16 + $0x8] sm:$0xff] %vm2791_vm6, %v3144_v51  ;;  %v2694_v23 = vpop.permute.xlu2 %2693 }
 0x1ea   : > { %v2430_v46 = vpop.permute.xlu1 %2429 }
 0x1eb   : > { %v2914_v40 = vsel %vm2906_vm9, %v4844_v33, %v2430_v46 }
 0x1ec   : > { %v3163_v63 = vpop.f32.mrf.mxu1  ;;  %v2790_v61 = vpop.permute.xlu0 %2789 }
 0x1ed   : > { %v3164_v18 = vadd.f32 %v5602_v55, %v3163_v63  ;;  %v3070_v54 = vsel %vm3038_vm14, %v3037_v44, %v2790_v61 }
 0x1ee   : > { %3759 = vmatmul.msk.bf16.gmra.mxu3 %vm3095_vm15, %v3070_v54 }
 0x1ef   : > { %3230 = vst.msk [vmem:[%s5608_s16 + $0x48] sm:$0xff] %vm2791_vm6, %v3164_v18 }
 0x1f2   : > { %v2518_v45 = vpop.permute.xlu1 %2517 }
 0x1f3   : > { %v2955_v39 = vsel %vm2939_vm11, %v2922_v16, %v2518_v45 }
 0x1f4   : > { %v2510_v47 = vpop.permute.xlu0 %2509 }
 0x1f5   : > { %v2947_v30 = vsel %vm2939_vm11, %v2914_v40, %v2510_v47 }
 0x1f6   : > { %v2980_v0 = vsel %vm2972_vm12, %v2947_v30, %v2606_v9 }
 0x1fa   : > { %v2686_v21 = vpop.permute.xlu1 %2685 }
 0x1fb   : > { %v3013_v33 = vsel %vm3005_vm13, %v2980_v0, %v2686_v21 }
 0x1fc   : > { %v2614_v19 = vpop.permute.xlu0 %2613 }
 0x1fd   : > { %v2988_v53 = vsel %vm2972_vm12, %v2955_v39, %v2614_v19 }
 0x1fe   : > { %v3021_v35 = vsel %vm3005_vm13, %v2988_v53, %v2694_v23 }
 0x202   : > { %v3186_v8 = vpop.f32.mrf.mxu2  ;;  %v2774_v7 = vpop.permute.xlu1 %2773 }
 0x203   : > { %v3187_v4 = vadd.f32 %v5602_v55, %v3186_v8  ;;  %v3054_v36 = vsel %vm3038_vm14, %v3021_v35, %v2774_v7 }
 0x204   : > { %v2766_v48 = vpop.permute.xlu0 %2765  ;;  %3751 = vmatmul.msk.bf16.gmra.mxu1 %vm3095_vm15, %v3054_v36 }
 0x205   : > { %3239 = vst.msk [vmem:[%s5608_s16 + $0x90] sm:$0xff] %vm2791_vm6, %v3187_v4  ;;  %v3046_v15 = vsel %vm3038_vm14, %v3013_v33, %v2766_v48 }
 0x206   : > { %3747 = vmatmul.msk.bf16.gmra.mxu0 %vm3095_vm15, %v3046_v15 }
 0x209   : > { %v3206_v42 = vpop.f32.mrf.mxu3 }
 0x20a   : > { %v3207_v20 = vadd.f32 %v5602_v55, %v3206_v42  ;;  %v3188_v5 = vpop.f32.mrf.mxu2 }
 0x20b   : > { %v3189_v29 = vadd.f32 %v5602_v55, %v3188_v5 }
 0x20c   : > { %3247 = vst.msk [vmem:[%s5608_s16 + $0xd0] sm:$0xff] %vm2791_vm6, %v3207_v20 }
 0x20d   : > { %3240 = vst.msk [vmem:[%s5608_s16 + $0x98] sm:$0xff] %vm2791_vm6, %v3189_v29 }
 0x211   : > { %v3208_v2 = vpop.f32.mrf.mxu3 }
 0x212   : > { %v3209_v3 = vadd.f32 %v5602_v55, %v3208_v2 }
 0x214   : > { %3248 = vst.msk [vmem:[%s5608_s16 + $0xd8] sm:$0xff] %vm2791_vm6, %v3209_v3  ;;  %v3146_v24 = vpop.f32.mrf.mxu0 }
 0x215   : > { %v3147_v60 = vadd.f32 %v5602_v55, %v3146_v24 }
 0x217   : > { %3223 = vst.msk [vmem:[%s5608_s16 + $0x10] sm:$0xff] %vm2791_vm6, %v3147_v60 }
 0x21b   : > { %v3166_v50 = vpop.f32.mrf.mxu1 }
 0x21c   : > { %v3167_v38 = vadd.f32 %v5602_v55, %v3166_v50  ;;  %v3148_v52 = vpop.f32.mrf.mxu0 }
 0x21d   : > { %v3149_v58 = vadd.f32 %v5602_v55, %v3148_v52 }
 0x21e   : > { %3231 = vst.msk [vmem:[%s5608_s16 + $0x50] sm:$0xff] %vm2791_vm6, %v3167_v38 }
 0x21f   : > { %3224 = vst.msk [vmem:[%s5608_s16 + $0x18] sm:$0xff] %vm2791_vm6, %v3149_v58 }
 0x223   : > { %v3168_v25 = vpop.f32.mrf.mxu1 }
 0x224   : > { %v3169_v14 = vadd.f32 %v5602_v55, %v3168_v25 }
 0x226   : > { %3232 = vst.msk [vmem:[%s5608_s16 + $0x58] sm:$0xff] %vm2791_vm6, %v3169_v14 }
 0x233   : > { %v3211_v59 = vpop.f32.mrf.mxu3 }
 0x234   : > { %v3212_v27 = vadd.f32 %v5602_v55, %v3211_v59 }
 0x236   : > { %3249 = vst.msk [vmem:[%s5608_s16 + $0xe0] sm:$0xff] %vm2791_vm6, %v3212_v27 }
 0x239   : > { %v3191_v31 = vpop.f32.mrf.mxu2 }
 0x23a   : > { %v3192_v43 = vadd.f32 %v5602_v55, %v3191_v31 }
 0x23b   : > { %v3213_v13 = vpop.f32.mrf.mxu3 }
 0x23c   : > { %3241 = vst.msk [vmem:[%s5608_s16 + $0xa0] sm:$0xff] %vm2791_vm6, %v3192_v43  ;;  %v3214_v26 = vadd.f32 %v5602_v55, %v3213_v13 }
 0x23e   : > { %3250 = vst.msk [vmem:[%s5608_s16 + $0xe8] sm:$0xff] %vm2791_vm6, %v3214_v26 }
 0x241   : > { %v3193_v56 = vpop.f32.mrf.mxu2 }
 0x242   : > { %v3194_v32 = vadd.f32 %v5602_v55, %v3193_v56 }
 0x244   : > { %3242 = vst.msk [vmem:[%s5608_s16 + $0xa8] sm:$0xff] %vm2791_vm6, %v3194_v32 }
 0x245   : > { %v3151_v1 = vpop.f32.mrf.mxu0 }
 0x246   : > { %v3152_v34 = vadd.f32 %v5602_v55, %v3151_v1 }
 0x248   : > { %3225 = vst.msk [vmem:[%s5608_s16 + $0x20] sm:$0xff] %vm2791_vm6, %v3152_v34 }
 0x24c   : > { %v3171_v28 = vpop.f32.mrf.mxu1 }
 0x24d   : > { %v3172_v57 = vadd.f32 %v5602_v55, %v3171_v28  ;;  %v3153_v22 = vpop.f32.mrf.mxu0 }
 0x24e   : > { %v3154_v17 = vadd.f32 %v5602_v55, %v3153_v22 }
 0x24f   : > { %3233 = vst.msk [vmem:[%s5608_s16 + $0x60] sm:$0xff] %vm2791_vm6, %v3172_v57 }
 0x250   : > { %3226 = vst.msk [vmem:[%s5608_s16 + $0x28] sm:$0xff] %vm2791_vm6, %v3154_v17 }
 0x254   : > { %v3173_v37 = vpop.f32.mrf.mxu1 }
 0x255   : > { %v3174_v51 = vadd.f32 %v5602_v55, %v3173_v37 }
 0x257   : > { %3234 = vst.msk [vmem:[%s5608_s16 + $0x68] sm:$0xff] %vm2791_vm6, %v3174_v51 }
 0x26a   : > { %v3196_v49 = vpop.f32.mrf.mxu2 }
 0x26b   : > { %v3197_v6 = vadd.f32 %v5602_v55, %v3196_v49 }
 0x26d   : > { %3243 = vst.msk [vmem:[%s5608_s16 + $0xb0] sm:$0xff] %vm2791_vm6, %v3197_v6 }
 0x271   : > { %v3216_v12 = vpop.f32.mrf.mxu3 }
 0x272   : > { %v3217_v41 = vadd.f32 %v5602_v55, %v3216_v12  ;;  %v3198_v62 = vpop.f32.mrf.mxu2 }
 0x273   : > { %v3199_v63 = vadd.f32 %v5602_v55, %v3198_v62 }
 0x274   : > { %3251 = vst.msk [vmem:[%s5608_s16 + $0xf0] sm:$0xff] %vm2791_vm6, %v3217_v41 }
 0x275   : > { %3244 = vst.msk [vmem:[%s5608_s16 + $0xb8] sm:$0xff] %vm2791_vm6, %v3199_v63 }
 0x279   : > { %v3218_v10 = vpop.f32.mrf.mxu3 }
 0x27a   : > { %v3219_v18 = vadd.f32 %v5602_v55, %v3218_v10 }
 0x27c   : > { %3252 = vst.msk [vmem:[%s5608_s16 + $0xf8] sm:$0xff] %vm2791_vm6, %v3219_v18 }
 0x281   : > { %v3176_v46 = vpop.f32.mrf.mxu1 }
 0x282   : > { %v3177_v54 = vadd.f32 %v5602_v55, %v3176_v46 }
 0x283   : > { %v3156_v44 = vpop.f32.mrf.mxu0 }
 0x284   : > { %v3157_v61 = vadd.f32 %v5602_v55, %v3156_v44  ;;  %3235 = vst.msk [vmem:[%s5608_s16 + $0x70] sm:$0xff] %vm2791_vm6, %v3177_v54 }
 0x286   : > { %3227 = vst.msk [vmem:[%s5608_s16 + $0x30] sm:$0xff] %vm2791_vm6, %v3157_v61 }
 0x289   : > { %v3178_v45 = vpop.f32.mrf.mxu1 }
 0x28a   : > { %v3179_v9 = vadd.f32 %v5602_v55, %v3178_v45 }
 0x28b   : > { %v3158_v11 = vpop.f32.mrf.mxu0 }
 0x28c   : > { %v3159_v47 = vadd.f32 %v5602_v55, %v3158_v11  ;;  %3236 = vst.msk [vmem:[%s5608_s16 + $0x78] sm:$0xff] %vm2791_vm6, %v3179_v9 }
 0x28e   : > { %3228 = vst.msk [vmem:[%s5608_s16 + $0x38] sm:$0xff] %vm2791_vm6, %v3159_v47 }
 0x28f PF: > { %s13_s14 = sadd.s32 1, %s3878_s14   ;;  %s5755_s12 = smov %s3874_s13 }
 0x290   : > { %p10_p5 = scmp.ge.s32.totalorder %s13_s14, 4   ;;  %s5756_s13 = smov %s5758_s15 }
 0x292   :  { %12 = sbr.rel (!%p10_p5) target bundleno = 2 (0x2), region = 70 }

</bundles_post_ra>
